<compile_context>
chip_gen: v5e
topology: v5e:2x2
jax: 0.10.0
libtpu: 0.0.40
codegen_flags: <defaults>
</compile_context>

<pallas_src>
import functools
import numpy as np
import jax
import jax.numpy as jnp
from jax import lax
from jax.experimental import pallas as pl
from jax.experimental.pallas import tpu as pltpu


def _make_branch_mask(n_neurons, n_branch, fan_in, seed=0):
    """Replicates DH-SNN create_mask(): each neuron's fan-in is randomly
    partitioned across its dendritic branches (deterministic, numpy glue)."""
    rng = np.random.default_rng(seed)
    mask = np.zeros((n_neurons * n_branch, fan_in), dtype=np.float32)
    for i in range(n_neurons):
        perm = rng.permutation(fan_in)
        for j in range(n_branch):
            lo = j * fan_in // n_branch
            hi = (j + 1) * fan_in // n_branch
            mask[i * n_branch + j, perm[lo:hi]] = 1.0
    return mask


def _round_up(v, m):
    return ((v + m - 1) // m) * m


# ---------------------------------------------------------------------------
# Phase 1: hoisted input projection  lin_x[t] = x_t @ W1x + b1  (one big matmul)
# ---------------------------------------------------------------------------
def _input_projection(x_flat, w1x_p, b1, *, nb):
    M, Din_p = x_flat.shape
    Nt = 256 if nb % 256 == 0 else nb  # tile the output columns

    def proj_kernel(x_ref, w_ref, b_ref, o_ref):
        o_ref[...] = (jnp.dot(x_ref[...], w_ref[...],
                              preferred_element_type=jnp.float32)
                      + b_ref[...])

    return pl.pallas_call(
        proj_kernel,
        out_shape=jax.ShapeDtypeStruct((M, nb), jnp.float32),
        grid_spec=pltpu.PrefetchScalarGridSpec(
            num_scalar_prefetch=0,
            grid=(nb // Nt,),
            in_specs=[
                pl.BlockSpec((M, Din_p), lambda j: (0, 0)),
                pl.BlockSpec((Din_p, Nt), lambda j: (0, j)),
                pl.BlockSpec((1, Nt), lambda j: (0, j)),
            ],
            out_specs=pl.BlockSpec((M, Nt), lambda j: (0, j)),
        ),
        compiler_params=pltpu.CompilerParams(
            dimension_semantics=("parallel",),
            vmem_limit_bytes=32 << 20,
        ),
    )(x_flat, w1x_p, b1)


# ---------------------------------------------------------------------------
# Phase 2: time recurrence as one grid-less kernel with an in-kernel fori_loop
# ---------------------------------------------------------------------------
def rnn_test_forward(x, params, *, vth=1.0):
    """Forward pass of `rnn_test`.

    x: [B, T, D_in] float32 spike input.
    Returns (output, pre_spike, post_spike, t_pre, t_post); the first three
    match the PyTorch module's return tuple, the last two correspond to the
    attributes self.t_pre / self.t_post recorded during forward.
    """
    B, T, Din = x.shape
    n = params["alpha1"].shape[1]
    nout = params["alpha2"].shape[1]
    nb = params["beta"].shape[1]

    # Host-side padding: batch -> multiple of 8 (f32 sublane), Din -> multiple
    # of 128 (lane / contraction alignment). Zero padding is exact.
    Bp = _round_up(B, 8)
    Din_p = _round_up(Din, 128)

    x_p = jnp.pad(x.astype(jnp.float32),
                  ((0, Bp - B), (0, 0), (0, Din_p - Din)))
    x_flat = jnp.transpose(x_p, (1, 0, 2)).reshape(T * Bp, Din_p)  # time-major
    w1x_p = jnp.pad(params["w1x"], ((0, Din_p - Din), (0, 0)))

    # Precompute leak complements on the host (off the serial critical path).
    alpha1 = params["alpha1"]
    beta = params["beta"]
    alpha2 = params["alpha2"]
    om_alpha1 = 1.0 - alpha1
    om_beta = 1.0 - beta
    om_alpha2 = 1.0 - alpha2

    # Phase 1: one well-shaped (T*Bp, Din_p) @ (Din_p, nb) matmul, b1 folded in.
    lin_x = _input_projection(x_flat, w1x_p, params["b1"], nb=nb)
    lin_x = lin_x.reshape(T, Bp, nb)

    def recur_kernel(linx_ref, w1h_ref, a1_ref, oma1_ref, beta_ref, omb_ref,
                     s_ref, w2_ref, b2_ref, a2_ref, oma2_ref,
                     out_ref, pre_ref, post_ref, tpre_ref, tpost_ref):
        # Hoist the small per-neuron constants out of the recurrence.
        a1 = a1_ref[...]         # [1, n]   sigmoid(tau_m) of rnn_1
        oma1 = oma1_ref[...]
        beta_v = beta_ref[...]   # [1, nb]  sigmoid(tau_n), flattened
        omb = omb_ref[...]
        a2 = a2_ref[...]         # [1, nout]
        oma2 = oma2_ref[...]
        b2 = b2_ref[...]         # [1, nout]

        Tf = jnp.float32(T)
        zeros_n = jnp.zeros((Bp, n), jnp.float32)
        zeros_nb = jnp.zeros((Bp, nb), jnp.float32)
        zeros_o = jnp.zeros((Bp, nout), jnp.float32)

        def step(t, carry):
            mem1, spk1, dcur, mem2, acc, anyp, anyq, tpre, tpost = carry

            # ---- rnn_1: spike_rnn_test_denri_wotanh_R ----
            # x @ W1x + b1 was precomputed; only the recurrent term stays here.
            lin1 = linx_ref[t] + jnp.dot(spk1, w1h_ref[...],
                                         preferred_element_type=jnp.float32)
            d_new = beta_v * dcur + omb * lin1
            # branch-sum via MXU (S[j, j // branch] = 1); "wotanh" => no tanh
            l_in = jnp.dot(d_new, s_ref[...],
                           preferred_element_type=jnp.float32)   # [Bp, n]
            mem1_n = a1 * mem1 + oma1 * l_in - vth * spk1
            spike1 = (mem1_n > vth).astype(jnp.float32)

            # ---- dense_2: ReadoutIntegratorWithSpike ----
            lin2 = jnp.dot(spike1, w2_ref[...],
                           preferred_element_type=jnp.float32) + b2
            mem2_n = a2 * mem2 + oma2 * lin2
            spike2 = (mem2_n > 0.0).astype(jnp.float32)

            # ---- output accumulation: softmax(mem_layer2) for t > 10 ----
            m = jnp.max(mem2_n, axis=1, keepdims=True)
            e = jnp.exp(mem2_n - m)
            sm = e / jnp.sum(e, axis=1, keepdims=True)
            acc = jnp.where(t > 10, acc + sm, acc)

            # ---- first-spike-time tracking and any-spike flags ----
            tf = t.astype(jnp.float32)
            tpre = jnp.where((tpre == Tf) & (spike1 == 1.0), tf, tpre)
            tpost = jnp.where((tpost == Tf) & (spike2 == 1.0), tf, tpost)
            anyp = jnp.maximum(anyp, spike1)
            anyq = jnp.maximum(anyq, spike2)

            return (mem1_n, spike1, d_new, mem2_n, acc, anyp, anyq, tpre, tpost)

        # TODO(synk): DH-SNN set_neuron_state may init the rnn membrane with
        # torch.rand; base-class source not provided, zeros used here.
        init = (zeros_n, zeros_n, zeros_nb, zeros_o, zeros_o, zeros_n, zeros_o,
                jnp.full((Bp, n), Tf), jnp.full((Bp, nout), Tf))
        (_, _, _, _, acc, anyp, anyq, tpre, tpost) = lax.fori_loop(
            0, T, step, init)

        out_ref[...] = acc
        pre_ref[...] = anyp
        post_ref[...] = anyq
        tpre_ref[...] = tpre
        tpost_ref[...] = tpost

    vmem_spec = pl.BlockSpec(memory_space=pltpu.MemorySpace.VMEM)

    out_shapes = (
        jax.ShapeDtypeStruct((Bp, nout), jnp.float32),  # output
        jax.ShapeDtypeStruct((Bp, n), jnp.float32),     # pre_spike
        jax.ShapeDtypeStruct((Bp, nout), jnp.float32),  # post_spike
        jax.ShapeDtypeStruct((Bp, n), jnp.float32),     # t_pre
        jax.ShapeDtypeStruct((Bp, nout), jnp.float32),  # t_post
    )

    output, pre_spike, post_spike, t_pre, t_post = pl.pallas_call(
        recur_kernel,
        out_shape=out_shapes,
        in_specs=[vmem_spec] * 11,
        out_specs=(vmem_spec,) * 5,
        compiler_params=pltpu.CompilerParams(vmem_limit_bytes=32 << 20),
    )(lin_x, params["w1h"], alpha1, om_alpha1, beta, om_beta, params["S"],
      params["w2"], params["b2"], alpha2, om_alpha2)

    # Drop the batch padding.
    return (output[:B], pre_spike[:B], post_spike[:B], t_pre[:B], t_post[:B])


def init_params(key, Din=700, n=128, nout=20, branch=8,
                low_n=2.0, high_n=6.0, low_m=0.0, high_m=4.0):
    """Deterministic parameter init matching the module's shapes."""
    nb = n * branch
    fan_in = Din + n
    ks = jax.random.split(key, 6)

    # rnn_1.dense : Linear(Din + n, n * branch) with branch mask folded in.
    bound1 = 1.0 / np.sqrt(fan_in)
    W1 = jax.random.uniform(ks[0], (nb, fan_in), minval=-bound1, maxval=bound1,
                            dtype=jnp.float32)
    b1 = jax.random.uniform(ks[1], (1, nb), minval=-bound1, maxval=bound1,
                            dtype=jnp.float32)
    mask = jnp.asarray(_make_branch_mask(n, branch, fan_in, seed=0))
    W1m = W1 * mask
    w1x = jnp.transpose(W1m[:, :Din])   # [Din, nb]
    w1h = jnp.transpose(W1m[:, Din:])   # [n,  nb]

    tau_n = jax.random.uniform(ks[2], (n, branch), minval=low_n, maxval=high_n,
                               dtype=jnp.float32)
    beta = jax.nn.sigmoid(tau_n).reshape(1, nb)       # flat index = i*branch + b
    tau_m1 = jax.random.uniform(ks[3], (1, n), minval=low_m, maxval=high_m,
                                dtype=jnp.float32)
    alpha1 = jax.nn.sigmoid(tau_m1)

    # branch summation matrix: S[j, j // branch] = 1
    S = (jnp.arange(nb)[:, None] // branch == jnp.arange(n)[None, :]).astype(jnp.float32)

    # dense_2.dense : Linear(n, nout), xavier_normal_ weight, zero bias.
    std2 = float(np.sqrt(2.0 / (n + nout)))
    W2 = jax.random.normal(ks[4], (nout, n), dtype=jnp.float32) * std2
    w2 = jnp.transpose(W2)              # [n, nout]
    b2 = jnp.zeros((1, nout), jnp.float32)
    tau_m2 = jax.random.uniform(ks[5], (1, nout), minval=low_m, maxval=high_m,
                                dtype=jnp.float32)
    alpha2 = jax.nn.sigmoid(tau_m2)

    return dict(w1x=w1x, w1h=w1h, b1=b1, alpha1=alpha1, beta=beta, S=S,
                w2=w2, b2=b2, alpha2=alpha2)


if __name__ == "__main__":
    key = jax.random.PRNGKey(0)
    kp, kx = jax.random.split(key)

    B, T, Din = 2, 16, 700          # small batch/seq; module dims 700 -> 128 -> 20
    params = init_params(kp, Din=Din, n=128, nout=20, branch=8)
    x = jax.random.bernoulli(kx, 0.3, (B, T, Din)).astype(jnp.float32)

    fwd = jax.jit(functools.partial(rnn_test_forward, vth=1.0))
    output, pre_spike, post_spike, t_pre, t_post = jax.block_until_ready(fwd(x, params))

    assert output.shape == (B, 20)
    assert pre_spike.shape == (B, 128) and post_spike.shape == (B, 20)
    assert t_pre.shape == (B, 128) and t_post.shape == (B, 20)
    assert bool(jnp.all(jnp.isfinite(output)))
    assert bool(jnp.all(jnp.isfinite(t_pre))) and bool(jnp.all(jnp.isfinite(t_post)))
    print("KERNEL_OK")
</pallas_src>

<mosaic_0001>
module attributes {stable_mosaic.version = 11 : i64} {
  func.func @proj_kernel(%arg0: i32, %arg1: memref<128x768xf32, #tpu.memory_space<vmem>>, %arg2: memref<768x256xf32, #tpu.memory_space<vmem>>, %arg3: memref<1x256xf32, #tpu.memory_space<vmem>>, %arg4: memref<128x256xf32, #tpu.memory_space<vmem>>) attributes {dimension_semantics = [#tpu.dimension_semantics<parallel>], iteration_bounds = array<i64: 4>, scalar_prefetch = 0 : i64, scratch_operands = 0 : i64, tpu.core_type = #tpu.core_type<tc>, window_params = [{pipeline_mode = #tpu.pipeline_mode<synchronous>, transform_indices = @transform_0, window_bounds = array<i64: 128, 768>}, {transform_indices = @transform_1, window_bounds = array<i64: 768, 256>}, {transform_indices = @transform_2, window_bounds = array<i64: 1, 256>}, {transform_indices = @transform_3, window_bounds = array<i64: 128, 256>}]} {
    %c0 = arith.constant 0 : index
    %c0_0 = arith.constant 0 : index
    %0 = vector.load %arg1[%c0, %c0_0] : memref<128x768xf32, #tpu.memory_space<vmem>>, vector<128x768xf32>
    %c0_1 = arith.constant 0 : index
    %c0_2 = arith.constant 0 : index
    %1 = vector.load %arg2[%c0_1, %c0_2] : memref<768x256xf32, #tpu.memory_space<vmem>>, vector<768x256xf32>
    %cst = arith.constant dense<0.000000e+00> : vector<128x256xf32>
    %2 = tpu.matmul %0, %1, %cst {dimension_numbers = #tpu.dot_dimension_numbers<[1], [0], [0], [1], [0, 0, 1, 1], [], []>} : vector<128x768xf32>, vector<768x256xf32>, vector<128x256xf32> -> vector<128x256xf32>
    %c0_3 = arith.constant 0 : index
    %c0_4 = arith.constant 0 : index
    %3 = vector.load %arg3[%c0_3, %c0_4] : memref<1x256xf32, #tpu.memory_space<vmem>>, vector<1x256xf32>
    %4 = vector.broadcast %3 : vector<1x256xf32> to vector<128x256xf32>
    %5 = arith.addf %2, %4 : vector<128x256xf32>
    %c0_5 = arith.constant 0 : index
    %c0_6 = arith.constant 0 : index
    %6 = vector.load %arg4[%c0_5, %c0_6] : memref<128x256xf32, #tpu.memory_space<vmem>>, vector<128x256xf32>
    tpu.vector_store %arg4[%c0_5, %c0_6], %5 {strides = array<i32>} : memref<128x256xf32, #tpu.memory_space<vmem>>, vector<128x256xf32>,
    return
  }
  func.func @transform_0(%arg0: i32) -> (i32, i32) {
    %c0_i32 = arith.constant 0 : i32
    %c0_i32_0 = arith.constant 0 : i32
    %c0_i32_1 = arith.constant 0 : i32
    return %c0_i32, %c0_i32_0 : i32, i32
  }
  func.func @transform_1(%arg0: i32) -> (i32, i32) {
    %c0_i32 = arith.constant 0 : i32
    %c0_i32_0 = arith.constant 0 : i32
    return %c0_i32, %arg0 : i32, i32
  }
  func.func @transform_2(%arg0: i32) -> (i32, i32) {
    %c0_i32 = arith.constant 0 : i32
    %c0_i32_0 = arith.constant 0 : i32
    return %c0_i32, %arg0 : i32, i32
  }
  func.func @transform_3(%arg0: i32) -> (i32, i32) {
    %c0_i32 = arith.constant 0 : i32
    %c0_i32_0 = arith.constant 0 : i32
    return %c0_i32, %arg0 : i32, i32
  }
}

module attributes {stable_mosaic.version = 11 : i64} {
  func.func @recur_kernel(%arg0: memref<16x8x1024xf32, #tpu.memory_space<vmem>>, %arg1: memref<128x1024xf32, #tpu.memory_space<vmem>>, %arg2: memref<1x128xf32, #tpu.memory_space<vmem>>, %arg3: memref<1x128xf32, #tpu.memory_space<vmem>>, %arg4: memref<1x1024xf32, #tpu.memory_space<vmem>>, %arg5: memref<1x1024xf32, #tpu.memory_space<vmem>>, %arg6: memref<1024x128xf32, #tpu.memory_space<vmem>>, %arg7: memref<128x20xf32, #tpu.memory_space<vmem>>, %arg8: memref<1x20xf32, #tpu.memory_space<vmem>>, %arg9: memref<1x20xf32, #tpu.memory_space<vmem>>, %arg10: memref<1x20xf32, #tpu.memory_space<vmem>>, %arg11: memref<8x20xf32, #tpu.memory_space<vmem>>, %arg12: memref<8x128xf32, #tpu.memory_space<vmem>>, %arg13: memref<8x20xf32, #tpu.memory_space<vmem>>, %arg14: memref<8x128xf32, #tpu.memory_space<vmem>>, %arg15: memref<8x20xf32, #tpu.memory_space<vmem>>) attributes {dimension_semantics = [], scalar_prefetch = 0 : i64, scratch_operands = 0 : i64, tpu.core_type = #tpu.core_type<tc>} {
    %c0 = arith.constant 0 : index
    %c0_0 = arith.constant 0 : index
    %0 = vector.load %arg2[%c0, %c0_0] : memref<1x128xf32, #tpu.memory_space<vmem>>, vector<1x128xf32>
    %c0_1 = arith.constant 0 : index
    %c0_2 = arith.constant 0 : index
    %1 = vector.load %arg3[%c0_1, %c0_2] : memref<1x128xf32, #tpu.memory_space<vmem>>, vector<1x128xf32>
    %c0_3 = arith.constant 0 : index
    %c0_4 = arith.constant 0 : index
    %2 = vector.load %arg4[%c0_3, %c0_4] : memref<1x1024xf32, #tpu.memory_space<vmem>>, vector<1x1024xf32>
    %c0_5 = arith.constant 0 : index
    %c0_6 = arith.constant 0 : index
    %3 = vector.load %arg5[%c0_5, %c0_6] : memref<1x1024xf32, #tpu.memory_space<vmem>>, vector<1x1024xf32>
    %c0_7 = arith.constant 0 : index
    %c0_8 = arith.constant 0 : index
    %4 = vector.load %arg9[%c0_7, %c0_8] : memref<1x20xf32, #tpu.memory_space<vmem>>, vector<1x20xf32>
    %c0_9 = arith.constant 0 : index
    %c0_10 = arith.constant 0 : index
    %5 = vector.load %arg10[%c0_9, %c0_10] : memref<1x20xf32, #tpu.memory_space<vmem>>, vector<1x20xf32>
    %c0_11 = arith.constant 0 : index
    %c0_12 = arith.constant 0 : index
    %6 = vector.load %arg8[%c0_11, %c0_12] : memref<1x20xf32, #tpu.memory_space<vmem>>, vector<1x20xf32>
    %cst = arith.constant 0.000000e+00 : f32
    %7 = vector.broadcast %cst : f32 to vector<8x128xf32>
    %cst_13 = arith.constant 0.000000e+00 : f32
    %8 = vector.broadcast %cst_13 : f32 to vector<8x1024xf32>
    %cst_14 = arith.constant 0.000000e+00 : f32
    %9 = vector.broadcast %cst_14 : f32 to vector<8x20xf32>
    %cst_15 = arith.constant 1.600000e+01 : f32
    %10 = vector.broadcast %cst_15 : f32 to vector<8x128xf32>
    %cst_16 = arith.constant 1.600000e+01 : f32
    %11 = vector.broadcast %cst_16 : f32 to vector<8x20xf32>
    %cst_17 = arith.constant 1.600000e+01 : f32
    %c0_i32 = arith.constant 0 : i32
    %c16_i32 = arith.constant 16 : i32
    %12 = arith.addi %c0_i32, %c16_i32 : i32
    %c1_i32 = arith.constant 1 : i32
    %13:9 = scf.for %arg16 = %c0_i32 to %12 step %c1_i32 iter_args(%arg17 = %7, %arg18 = %7, %arg19 = %8, %arg20 = %9, %arg21 = %9, %arg22 = %7, %arg23 = %9, %arg24 = %10, %arg25 = %11) -> (vector<8x128xf32>, vector<8x128xf32>, vector<8x1024xf32>, vector<8x20xf32>, vector<8x20xf32>, vector<8x128xf32>, vector<8x20xf32>, vector<8x128xf32>, vector<8x20xf32>)  : i32 {
      %19 = arith.index_cast %arg16 : i32 to index
      %c0_29 = arith.constant 0 : index
      %c0_30 = arith.constant 0 : index
      %20 = vector.load %arg0[%19, %c0_29, %c0_30] : memref<16x8x1024xf32, #tpu.memory_space<vmem>>, vector<1x8x1024xf32>
      %21 = vector.shape_cast %20 : vector<1x8x1024xf32> to vector<8x1024xf32>
      %c0_31 = arith.constant 0 : index
      %c0_32 = arith.constant 0 : index
      %22 = vector.load %arg1[%c0_31, %c0_32] : memref<128x1024xf32, #tpu.memory_space<vmem>>, vector<128x1024xf32>
      %cst_33 = arith.constant dense<0.000000e+00> : vector<8x1024xf32>
      %23 = tpu.matmul %arg18, %22, %cst_33 {dimension_numbers = #tpu.dot_dimension_numbers<[1], [0], [0], [1], [0, 0, 1, 1], [], []>} : vector<8x128xf32>, vector<128x1024xf32>, vector<8x1024xf32> -> vector<8x1024xf32>
      %24 = arith.addf %21, %23 : vector<8x1024xf32>
      %25 = vector.broadcast %2 : vector<1x1024xf32> to vector<8x1024xf32>
      %26 = arith.mulf %25, %arg19 : vector<8x1024xf32>
      %27 = vector.broadcast %3 : vector<1x1024xf32> to vector<8x1024xf32>
      %28 = arith.mulf %27, %24 : vector<8x1024xf32>
      %29 = arith.addf %26, %28 : vector<8x1024xf32>
      %c0_34 = arith.constant 0 : index
      %c0_35 = arith.constant 0 : index
      %30 = vector.load %arg6[%c0_34, %c0_35] : memref<1024x128xf32, #tpu.memory_space<vmem>>, vector<1024x128xf32>
      %cst_36 = arith.constant dense<0.000000e+00> : vector<8x128xf32>
      %31 = tpu.matmul %29, %30, %cst_36 {dimension_numbers = #tpu.dot_dimension_numbers<[1], [0], [0], [1], [0, 0, 1, 1], [], []>} : vector<8x1024xf32>, vector<1024x128xf32>, vector<8x128xf32> -> vector<8x128xf32>
      %32 = vector.broadcast %0 : vector<1x128xf32> to vector<8x128xf32>
      %33 = arith.mulf %32, %arg17 : vector<8x128xf32>
      %34 = vector.broadcast %1 : vector<1x128xf32> to vector<8x128xf32>
      %35 = arith.mulf %34, %31 : vector<8x128xf32>
      %36 = arith.addf %33, %35 : vector<8x128xf32>
      %cst_37 = arith.constant 1.000000e+00 : f32
      %37 = vector.broadcast %cst_37 : f32 to vector<8x128xf32>
      %38 = arith.mulf %37, %arg18 : vector<8x128xf32>
      %39 = arith.subf %36, %38 : vector<8x128xf32>
      %cst_38 = arith.constant 1.000000e+00 : f32
      %40 = vector.broadcast %cst_38 : f32 to vector<8x128xf32>
      %41 = arith.cmpf ogt, %39, %40 : vector<8x128xf32>
      %42 = arith.extui %41 : vector<8x128xi1> to vector<8x128xi32>
      %43 = arith.sitofp %42 : vector<8x128xi32> to vector<8x128xf32>
      %c0_39 = arith.constant 0 : index
      %c0_40 = arith.constant 0 : index
      %44 = vector.load %arg7[%c0_39, %c0_40] : memref<128x20xf32, #tpu.memory_space<vmem>>, vector<128x20xf32>
      %cst_41 = arith.constant dense<0.000000e+00> : vector<8x20xf32>
      %45 = tpu.matmul %43, %44, %cst_41 {dimension_numbers = #tpu.dot_dimension_numbers<[1], [0], [0], [1], [0, 0, 1, 1], [], []>} : vector<8x128xf32>, vector<128x20xf32>, vector<8x20xf32> -> vector<8x20xf32>
      %46 = vector.broadcast %6 : vector<1x20xf32> to vector<8x20xf32>
      %47 = arith.addf %45, %46 : vector<8x20xf32>
      %48 = vector.broadcast %4 : vector<1x20xf32> to vector<8x20xf32>
      %49 = arith.mulf %48, %arg20 : vector<8x20xf32>
      %50 = vector.broadcast %5 : vector<1x20xf32> to vector<8x20xf32>
      %51 = arith.mulf %50, %47 : vector<8x20xf32>
      %52 = arith.addf %49, %51 : vector<8x20xf32>
      %cst_42 = arith.constant 0.000000e+00 : f32
      %53 = vector.broadcast %cst_42 : f32 to vector<8x20xf32>
      %54 = arith.cmpf ogt, %52, %53 : vector<8x20xf32>
      %55 = arith.extui %54 : vector<8x20xi1> to vector<8x20xi32>
      %56 = arith.sitofp %55 : vector<8x20xi32> to vector<8x20xf32>
      %cst_43 = arith.constant dense<0xFF800000> : vector<8xf32>
      %57 = vector.multi_reduction <maximumf>, %52, %cst_43 [1] : vector<8x20xf32> to vector<8xf32>
      %58 = vector.shape_cast %57 : vector<8xf32> to vector<8x1xf32>
      %59 = vector.broadcast %58 : vector<8x1xf32> to vector<8x20xf32>
      %60 = arith.subf %52, %59 : vector<8x20xf32>
      %61 = math.exp %60 : vector<8x20xf32>
      %cst_44 = arith.constant dense<0.000000e+00> : vector<8xf32>
      %62 = vector.multi_reduction <add>, %61, %cst_44 [1] : vector<8x20xf32> to vector<8xf32>
      %63 = vector.shape_cast %62 : vector<8xf32> to vector<8x1xf32>
      %64 = vector.broadcast %63 : vector<8x1xf32> to vector<8x20xf32>
      %65 = arith.divf %61, %64 : vector<8x20xf32>
      %c10_i32 = arith.constant 10 : i32
      %66 = arith.cmpi sgt, %arg16, %c10_i32 : i32
      %67 = arith.addf %arg21, %65 : vector<8x20xf32>
      %68 = arith.select %66, %67, %arg21 : vector<8x20xf32>
      %69 = arith.sitofp %arg16 : i32 to f32
      %70 = vector.broadcast %cst_17 : f32 to vector<8x128xf32>
      %71 = arith.cmpf oeq, %arg24, %70 : vector<8x128xf32>
      %cst_45 = arith.constant 1.000000e+00 : f32
      %72 = vector.broadcast %cst_45 : f32 to vector<8x128xf32>
      %73 = arith.cmpf oeq, %43, %72 : vector<8x128xf32>
      %74 = arith.andi %71, %73 : vector<8x128xi1>
      %75 = vector.broadcast %69 : f32 to vector<8x128xf32>
      %76 = arith.select %74, %75, %arg24 : vector<8x128xi1>, vector<8x128xf32>
      %77 = vector.broadcast %cst_17 : f32 to vector<8x20xf32>
      %78 = arith.cmpf oeq, %arg25, %77 : vector<8x20xf32>
      %cst_46 = arith.constant 1.000000e+00 : f32
      %79 = vector.broadcast %cst_46 : f32 to vector<8x20xf32>
      %80 = arith.cmpf oeq, %56, %79 : vector<8x20xf32>
      %81 = arith.andi %78, %80 : vector<8x20xi1>
      %82 = vector.broadcast %69 : f32 to vector<8x20xf32>
      %83 = arith.select %81, %82, %arg25 : vector<8x20xi1>, vector<8x20xf32>
      %84 = arith.maximumf %arg22, %43 : vector<8x128xf32>
      %85 = arith.maximumf %arg23, %56 : vector<8x20xf32>
      scf.yield %39, %43, %29, %52, %68, %84, %85, %76, %83 : vector<8x128xf32>, vector<8x128xf32>, vector<8x1024xf32>, vector<8x20xf32>, vector<8x20xf32>, vector<8x128xf32>, vector<8x20xf32>, vector<8x128xf32>, vector<8x20xf32>
    }
    %c16_i32_18 = arith.constant 16 : i32
    %c0_19 = arith.constant 0 : index
    %c0_20 = arith.constant 0 : index
    %14 = vector.load %arg11[%c0_19, %c0_20] : memref<8x20xf32, #tpu.memory_space<vmem>>, vector<8x20xf32>
    tpu.vector_store %arg11[%c0_19, %c0_20], %13#4 {strides = array<i32>} : memref<8x20xf32, #tpu.memory_space<vmem>>, vector<8x20xf32>,
    %c0_21 = arith.constant 0 : index
    %c0_22 = arith.constant 0 : index
    %15 = vector.load %arg12[%c0_21, %c0_22] : memref<8x128xf32, #tpu.memory_space<vmem>>, vector<8x128xf32>
    tpu.vector_store %arg12[%c0_21, %c0_22], %13#5 {strides = array<i32>} : memref<8x128xf32, #tpu.memory_space<vmem>>, vector<8x128xf32>,
    %c0_23 = arith.constant 0 : index
    %c0_24 = arith.constant 0 : index
    %16 = vector.load %arg13[%c0_23, %c0_24] : memref<8x20xf32, #tpu.memory_space<vmem>>, vector<8x20xf32>
    tpu.vector_store %arg13[%c0_23, %c0_24], %13#6 {strides = array<i32>} : memref<8x20xf32, #tpu.memory_space<vmem>>, vector<8x20xf32>,
    %c0_25 = arith.constant 0 : index
    %c0_26 = arith.constant 0 : index
    %17 = vector.load %arg14[%c0_25, %c0_26] : memref<8x128xf32, #tpu.memory_space<vmem>>, vector<8x128xf32>
    tpu.vector_store %arg14[%c0_25, %c0_26], %13#7 {strides = array<i32>} : memref<8x128xf32, #tpu.memory_space<vmem>>, vector<8x128xf32>,
    %c0_27 = arith.constant 0 : index
    %c0_28 = arith.constant 0 : index
    %18 = vector.load %arg15[%c0_27, %c0_28] : memref<8x20xf32, #tpu.memory_space<vmem>>, vector<8x20xf32>
    tpu.vector_store %arg15[%c0_27, %c0_28], %13#8 {strides = array<i32>} : memref<8x20xf32, #tpu.memory_space<vmem>>, vector<8x20xf32>,
    return
  }
}

</mosaic_0001>

<bundles_post_ra>
// kernel: rnn_test_forward.2
= control target key start
LH: loop header
LB: loop body
LE: loop exit
PB: predicated region body
PF: predicated region fallthrough
CT: control target
= control target key end

     0   :  { %s1966_s12 = smov 0   ;;  %s1968_s13 = smov 0   ;;  %s3492_s0 = inlined_call_operand.vmem [shape: f32[128,768], index: 0, kind: input, shape index: {}]   ;;  %s3493_s1 = inlined_call_operand.vmem [shape: f32[768,1024], index: 1, kind: input, shape index: {}]   ;;  %s3494_s2 = inlined_call_operand.vmem [shape: f32[1,1024], index: 2, kind: input, shape index: {}]   ;;  %s3495_s3 = inlined_call_operand.vmem [shape: f32[128,1024], index: 3, kind: output, shape index: {}]  }
   0x1   :  { %s1970_s14 = smov 0  }
   0x2 LB: > { %s1982_s15 = sadd.s32 4294967295, %s1944_s14   ;;  %s1985_s16 = sadd.s32 1, %s1944_s14   ;;  %s1944_s14 = sphi %s1970_s14, %s3499_s14   ;;  %s1940_s13 = sphi %s1968_s13, %s3498_s13   ;;  %s1936_s12 = sphi %s1966_s12, %s3497_s12  }
   0x3   : > { %s38_s17 = ssub.s32 %s1944_s14, %s1985_s16  ;;  %s41_s18 = sadd.s32 1, %s1940_s13 }
   0x4   : > { %p39_p0 = scmp.eq.s32.totalorder %s38_s17, 0  ;;  %p48_p1 = scmp.ne.s32.totalorder %s1940_s13, %s1936_s12 }
   0x5   : > { %p49_p2 = scmp.eq.s32.totalorder %s1944_s14, 0  ;;  %p104_p3 = scmp.eq.s32.totalorder %s1982_s15, 3 }
   0x6   : > { %s1995_s19 = scalar_select %p39_p0, %s1940_s13, %s41_s18  }
   0x7   : > { %p50_p4 = por %p49_p2, %p48_p1  ;;  %p1997_p5 = por %p104_p3, %p48_p1 }
   0x8   : > { %p1851_p6 = scmp.ge.s32.totalorder %s1944_s14, 4 }
   0xa   : > { %129 = sbr.rel (%p1851_p6) target bundleno = 211 (0xd3), region = 20 }
   0xf   : > { %132 = sbr.rel (!%p50_p4) target bundleno = 211 (0xd3), region = 24  ;;  %s134_s21 = sand.u32 (%p50_p4), 1, %s1940_s13  }
  0x10   : > { %s1862_s22 = sshll.u32 (%p50_p4), %s1944_s14, 4  ;;  %s1864_s23 = smul.u32 (%p50_p4), 1536, %s134_s21 }
  0x11   : > { %s2007_s26 = scalar_lea.vmem (%p50_p4), %s3493_s1, %s1862_s22 }
  0x12   : > { %v152_v0 = vld [vmem:[%s2007_s26] sm:$0xff] (%p50_p4)  ;;  %v154_v1 = vld [vmem:[%s2007_s26 + $0x8] sm:$0xff] (%p50_p4)  ;;  %s2012_s27 = scalar_lea.vmem (%p50_p4), [#allocation2], %s1864_s23 }
  0x13   : > { %v156_v2 = vld [vmem:[%s2007_s26 + $0x40] sm:$0xff] (%p50_p4)  ;;  %153 = vst [vmem:[%s2012_s27] sm:$0xff] (%p50_p4), %v152_v0  ;;  %v158_v3 = vld [vmem:[%s2007_s26 + $0x48] sm:$0xff] (%p50_p4) }
  0x14   : > { %155 = vst [vmem:[%s2012_s27 + $0x8] sm:$0xff] %v154_v1  ;;  %v160_v4 = vld [vmem:[%s2007_s26 + $0x80] sm:$0xff]  ;;  %v162_v5 = vld [vmem:[%s2007_s26 + $0x88] sm:$0xff] }
  0x15   : > { %157 = vst [vmem:[%s2012_s27 + $0x10] sm:$0xff] %v156_v2  ;;  %v164_v6 = vld [vmem:[%s2007_s26 + $0xc0] sm:$0xff]  ;;  %v166_v7 = vld [vmem:[%s2007_s26 + $0xc8] sm:$0xff] }
  0x16   : > { %159 = vst [vmem:[%s2012_s27 + $0x18] sm:$0xff] %v158_v3  ;;  %v168_v8 = vld [vmem:[%s2007_s26 + $0x100] sm:$0xff]  ;;  %v170_v9 = vld [vmem:[%s2007_s26 + $0x108] sm:$0xff] }
  0x17   : > { %161 = vst [vmem:[%s2012_s27 + $0x20] sm:$0xff] %v160_v4  ;;  %v172_v10 = vld [vmem:[%s2007_s26 + $0x140] sm:$0xff]  ;;  %v174_v11 = vld [vmem:[%s2007_s26 + $0x148] sm:$0xff] }
  0x18   : > { %163 = vst [vmem:[%s2012_s27 + $0x28] sm:$0xff] %v162_v5  ;;  %v176_v12 = vld [vmem:[%s2007_s26 + $0x180] sm:$0xff]  ;;  %v178_v13 = vld [vmem:[%s2007_s26 + $0x188] sm:$0xff] }
  0x19   : > { %165 = vst [vmem:[%s2012_s27 + $0x30] sm:$0xff] %v164_v6  ;;  %v180_v14 = vld [vmem:[%s2007_s26 + $0x1c0] sm:$0xff]  ;;  %v182_v15 = vld [vmem:[%s2007_s26 + $0x1c8] sm:$0xff] }
  0x1a   : > { %167 = vst [vmem:[%s2012_s27 + $0x38] sm:$0xff] %v166_v7  ;;  %v184_v16 = vld [vmem:[%s2007_s26 + $0x200] sm:$0xff]  ;;  %v186_v17 = vld [vmem:[%s2007_s26 + $0x208] sm:$0xff] }
  0x1b   : > { %169 = vst [vmem:[%s2012_s27 + $0x40] sm:$0xff] %v168_v8  ;;  %v188_v18 = vld [vmem:[%s2007_s26 + $0x240] sm:$0xff]  ;;  %v190_v19 = vld [vmem:[%s2007_s26 + $0x248] sm:$0xff] }
  0x1c   : > { %171 = vst [vmem:[%s2012_s27 + $0x48] sm:$0xff] %v170_v9  ;;  %v192_v20 = vld [vmem:[%s2007_s26 + $0x280] sm:$0xff]  ;;  %v194_v21 = vld [vmem:[%s2007_s26 + $0x288] sm:$0xff] }
  0x1d   : > { %173 = vst [vmem:[%s2012_s27 + $0x50] sm:$0xff] %v172_v10  ;;  %v196_v22 = vld [vmem:[%s2007_s26 + $0x2c0] sm:$0xff]  ;;  %v198_v23 = vld [vmem:[%s2007_s26 + $0x2c8] sm:$0xff] }
  0x1e   : > { %175 = vst [vmem:[%s2012_s27 + $0x58] sm:$0xff] %v174_v11  ;;  %v200_v24 = vld [vmem:[%s2007_s26 + $0x300] sm:$0xff]  ;;  %v202_v25 = vld [vmem:[%s2007_s26 + $0x308] sm:$0xff] }
  0x1f   : > { %177 = vst [vmem:[%s2012_s27 + $0x60] sm:$0xff] %v176_v12  ;;  %v204_v26 = vld [vmem:[%s2007_s26 + $0x340] sm:$0xff]  ;;  %v206_v27 = vld [vmem:[%s2007_s26 + $0x348] sm:$0xff] }
  0x20   : > { %179 = vst [vmem:[%s2012_s27 + $0x68] sm:$0xff] %v178_v13  ;;  %v208_v28 = vld [vmem:[%s2007_s26 + $0x380] sm:$0xff]  ;;  %v210_v29 = vld [vmem:[%s2007_s26 + $0x388] sm:$0xff] }
  0x21   : > { %181 = vst [vmem:[%s2012_s27 + $0x70] sm:$0xff] %v180_v14  ;;  %v212_v30 = vld [vmem:[%s2007_s26 + $0x3c0] sm:$0xff]  ;;  %v214_v31 = vld [vmem:[%s2007_s26 + $0x3c8] sm:$0xff] }
  0x22   : > { %183 = vst [vmem:[%s2012_s27 + $0x78] sm:$0xff] %v182_v15  ;;  %v216_v32 = vld [vmem:[%s2007_s26 + $0x400] sm:$0xff]  ;;  %v218_v33 = vld [vmem:[%s2007_s26 + $0x408] sm:$0xff] }
  0x23   : > { %185 = vst [vmem:[%s2012_s27 + $0x80] sm:$0xff] %v184_v16  ;;  %v220_v34 = vld [vmem:[%s2007_s26 + $0x440] sm:$0xff]  ;;  %v222_v35 = vld [vmem:[%s2007_s26 + $0x448] sm:$0xff] }
  0x24   : > { %187 = vst [vmem:[%s2012_s27 + $0x88] sm:$0xff] %v186_v17  ;;  %v224_v36 = vld [vmem:[%s2007_s26 + $0x480] sm:$0xff]  ;;  %v226_v37 = vld [vmem:[%s2007_s26 + $0x488] sm:$0xff] }
  0x25   : > { %189 = vst [vmem:[%s2012_s27 + $0x90] sm:$0xff] %v188_v18  ;;  %v228_v38 = vld [vmem:[%s2007_s26 + $0x4c0] sm:$0xff]  ;;  %v230_v39 = vld [vmem:[%s2007_s26 + $0x4c8] sm:$0xff] }
  0x26   : > { %191 = vst [vmem:[%s2012_s27 + $0x98] sm:$0xff] %v190_v19  ;;  %v232_v40 = vld [vmem:[%s2007_s26 + $0x500] sm:$0xff]  ;;  %v234_v41 = vld [vmem:[%s2007_s26 + $0x508] sm:$0xff] }
  0x27   : > { %193 = vst [vmem:[%s2012_s27 + $0xa0] sm:$0xff] %v192_v20  ;;  %v236_v42 = vld [vmem:[%s2007_s26 + $0x540] sm:$0xff]  ;;  %v238_v43 = vld [vmem:[%s2007_s26 + $0x548] sm:$0xff] }
  0x28   : > { %195 = vst [vmem:[%s2012_s27 + $0xa8] sm:$0xff] %v194_v21  ;;  %v240_v44 = vld [vmem:[%s2007_s26 + $0x580] sm:$0xff]  ;;  %v242_v45 = vld [vmem:[%s2007_s26 + $0x588] sm:$0xff] }
  0x29   : > { %197 = vst [vmem:[%s2012_s27 + $0xb0] sm:$0xff] %v196_v22  ;;  %v244_v46 = vld [vmem:[%s2007_s26 + $0x5c0] sm:$0xff]  ;;  %v246_v47 = vld [vmem:[%s2007_s26 + $0x5c8] sm:$0xff] }
  0x2a   : > { %199 = vst [vmem:[%s2012_s27 + $0xb8] sm:$0xff] %v198_v23  ;;  %v248_v48 = vld [vmem:[%s2007_s26 + $0x600] sm:$0xff]  ;;  %v250_v49 = vld [vmem:[%s2007_s26 + $0x608] sm:$0xff] }
  0x2b   : > { %201 = vst [vmem:[%s2012_s27 + $0xc0] sm:$0xff] %v200_v24  ;;  %v252_v50 = vld [vmem:[%s2007_s26 + $0x640] sm:$0xff]  ;;  %v254_v51 = vld [vmem:[%s2007_s26 + $0x648] sm:$0xff] }
  0x2c   : > { %203 = vst [vmem:[%s2012_s27 + $0xc8] sm:$0xff] %v202_v25  ;;  %v256_v52 = vld [vmem:[%s2007_s26 + $0x680] sm:$0xff]  ;;  %v258_v53 = vld [vmem:[%s2007_s26 + $0x688] sm:$0xff] }
  0x2d   : > { %205 = vst [vmem:[%s2012_s27 + $0xd0] sm:$0xff] %v204_v26  ;;  %v260_v54 = vld [vmem:[%s2007_s26 + $0x6c0] sm:$0xff]  ;;  %v262_v55 = vld [vmem:[%s2007_s26 + $0x6c8] sm:$0xff] }
  0x2e   : > { %207 = vst [vmem:[%s2012_s27 + $0xd8] sm:$0xff] %v206_v27  ;;  %v264_v56 = vld [vmem:[%s2007_s26 + $0x700] sm:$0xff]  ;;  %v266_v57 = vld [vmem:[%s2007_s26 + $0x708] sm:$0xff] }
  0x2f   : > { %209 = vst [vmem:[%s2012_s27 + $0xe0] sm:$0xff] %v208_v28  ;;  %v268_v58 = vld [vmem:[%s2007_s26 + $0x740] sm:$0xff]  ;;  %v270_v59 = vld [vmem:[%s2007_s26 + $0x748] sm:$0xff] }
  0x30   : > { %211 = vst [vmem:[%s2012_s27 + $0xe8] sm:$0xff] %v210_v29  ;;  %v272_v60 = vld [vmem:[%s2007_s26 + $0x780] sm:$0xff]  ;;  %v274_v61 = vld [vmem:[%s2007_s26 + $0x788] sm:$0xff] }
  0x31   : > { %213 = vst [vmem:[%s2012_s27 + $0xf0] sm:$0xff] %v212_v30  ;;  %v276_v62 = vld [vmem:[%s2007_s26 + $0x7c0] sm:$0xff]  ;;  %v278_v63 = vld [vmem:[%s2007_s26 + $0x7c8] sm:$0xff] }
  0x32   : > { %215 = vst [vmem:[%s2012_s27 + $0xf8] sm:$0xff] %v214_v31  ;;  %v280_v0 = vld [vmem:[%s2007_s26 + $0x800] sm:$0xff]  ;;  %v282_v1 = vld [vmem:[%s2007_s26 + $0x808] sm:$0xff] }
  0x33   : > { %217 = vst [vmem:[%s2012_s27 + $0x100] sm:$0xff] %v216_v32  ;;  %v284_v2 = vld [vmem:[%s2007_s26 + $0x840] sm:$0xff]  ;;  %v286_v3 = vld [vmem:[%s2007_s26 + $0x848] sm:$0xff] }
  0x34   : > { %219 = vst [vmem:[%s2012_s27 + $0x108] sm:$0xff] %v218_v33  ;;  %v288_v4 = vld [vmem:[%s2007_s26 + $0x880] sm:$0xff]  ;;  %v290_v5 = vld [vmem:[%s2007_s26 + $0x888] sm:$0xff] }
  0x35   : > { %221 = vst [vmem:[%s2012_s27 + $0x110] sm:$0xff] %v220_v34  ;;  %v292_v6 = vld [vmem:[%s2007_s26 + $0x8c0] sm:$0xff]  ;;  %v294_v7 = vld [vmem:[%s2007_s26 + $0x8c8] sm:$0xff] }
  0x36   : > { %223 = vst [vmem:[%s2012_s27 + $0x118] sm:$0xff] %v222_v35  ;;  %v296_v8 = vld [vmem:[%s2007_s26 + $0x900] sm:$0xff]  ;;  %v298_v9 = vld [vmem:[%s2007_s26 + $0x908] sm:$0xff] }
  0x37   : > { %225 = vst [vmem:[%s2012_s27 + $0x120] sm:$0xff] %v224_v36  ;;  %v300_v10 = vld [vmem:[%s2007_s26 + $0x940] sm:$0xff]  ;;  %v302_v11 = vld [vmem:[%s2007_s26 + $0x948] sm:$0xff] }
  0x38   : > { %227 = vst [vmem:[%s2012_s27 + $0x128] sm:$0xff] %v226_v37  ;;  %v304_v12 = vld [vmem:[%s2007_s26 + $0x980] sm:$0xff]  ;;  %v306_v13 = vld [vmem:[%s2007_s26 + $0x988] sm:$0xff] }
  0x39   : > { %229 = vst [vmem:[%s2012_s27 + $0x130] sm:$0xff] %v228_v38  ;;  %v308_v14 = vld [vmem:[%s2007_s26 + $0x9c0] sm:$0xff]  ;;  %v310_v15 = vld [vmem:[%s2007_s26 + $0x9c8] sm:$0xff] }
  0x3a   : > { %231 = vst [vmem:[%s2012_s27 + $0x138] sm:$0xff] %v230_v39  ;;  %v312_v16 = vld [vmem:[%s2007_s26 + $0xa00] sm:$0xff]  ;;  %v314_v17 = vld [vmem:[%s2007_s26 + $0xa08] sm:$0xff] }
  0x3b   : > { %233 = vst [vmem:[%s2012_s27 + $0x140] sm:$0xff] %v232_v40  ;;  %v316_v18 = vld [vmem:[%s2007_s26 + $0xa40] sm:$0xff]  ;;  %v318_v19 = vld [vmem:[%s2007_s26 + $0xa48] sm:$0xff] }
  0x3c   : > { %235 = vst [vmem:[%s2012_s27 + $0x148] sm:$0xff] %v234_v41  ;;  %v320_v20 = vld [vmem:[%s2007_s26 + $0xa80] sm:$0xff]  ;;  %v322_v21 = vld [vmem:[%s2007_s26 + $0xa88] sm:$0xff] }
  0x3d   : > { %237 = vst [vmem:[%s2012_s27 + $0x150] sm:$0xff] %v236_v42  ;;  %v324_v22 = vld [vmem:[%s2007_s26 + $0xac0] sm:$0xff]  ;;  %v326_v23 = vld [vmem:[%s2007_s26 + $0xac8] sm:$0xff] }
  0x3e   : > { %239 = vst [vmem:[%s2012_s27 + $0x158] sm:$0xff] %v238_v43  ;;  %v328_v24 = vld [vmem:[%s2007_s26 + $0xb00] sm:$0xff]  ;;  %v330_v25 = vld [vmem:[%s2007_s26 + $0xb08] sm:$0xff] }
  0x3f   : > { %241 = vst [vmem:[%s2012_s27 + $0x160] sm:$0xff] %v240_v44  ;;  %v332_v26 = vld [vmem:[%s2007_s26 + $0xb40] sm:$0xff]  ;;  %v334_v27 = vld [vmem:[%s2007_s26 + $0xb48] sm:$0xff] }
  0x40   : > { %243 = vst [vmem:[%s2012_s27 + $0x168] sm:$0xff] %v242_v45  ;;  %v336_v28 = vld [vmem:[%s2007_s26 + $0xb80] sm:$0xff]  ;;  %v338_v29 = vld [vmem:[%s2007_s26 + $0xb88] sm:$0xff] }
  0x41   : > { %245 = vst [vmem:[%s2012_s27 + $0x170] sm:$0xff] %v244_v46  ;;  %v340_v30 = vld [vmem:[%s2007_s26 + $0xbc0] sm:$0xff]  ;;  %v342_v31 = vld [vmem:[%s2007_s26 + $0xbc8] sm:$0xff] }
  0x42   : > { %247 = vst [vmem:[%s2012_s27 + $0x178] sm:$0xff] %v246_v47  ;;  %v344_v32 = vld [vmem:[%s2007_s26 + $0xc00] sm:$0xff]  ;;  %v346_v33 = vld [vmem:[%s2007_s26 + $0xc08] sm:$0xff] }
  0x43   : > { %249 = vst [vmem:[%s2012_s27 + $0x180] sm:$0xff] %v248_v48  ;;  %v348_v34 = vld [vmem:[%s2007_s26 + $0xc40] sm:$0xff]  ;;  %v350_v35 = vld [vmem:[%s2007_s26 + $0xc48] sm:$0xff] }
  0x44   : > { %251 = vst [vmem:[%s2012_s27 + $0x188] sm:$0xff] %v250_v49  ;;  %v352_v36 = vld [vmem:[%s2007_s26 + $0xc80] sm:$0xff]  ;;  %v354_v37 = vld [vmem:[%s2007_s26 + $0xc88] sm:$0xff] }
  0x45   : > { %253 = vst [vmem:[%s2012_s27 + $0x190] sm:$0xff] %v252_v50  ;;  %v356_v38 = vld [vmem:[%s2007_s26 + $0xcc0] sm:$0xff]  ;;  %v358_v39 = vld [vmem:[%s2007_s26 + $0xcc8] sm:$0xff] }
  0x46   : > { %255 = vst [vmem:[%s2012_s27 + $0x198] sm:$0xff] %v254_v51  ;;  %v360_v40 = vld [vmem:[%s2007_s26 + $0xd00] sm:$0xff]  ;;  %v362_v41 = vld [vmem:[%s2007_s26 + $0xd08] sm:$0xff] }
  0x47   : > { %257 = vst [vmem:[%s2012_s27 + $0x1a0] sm:$0xff] %v256_v52  ;;  %v364_v42 = vld [vmem:[%s2007_s26 + $0xd40] sm:$0xff]  ;;  %v366_v43 = vld [vmem:[%s2007_s26 + $0xd48] sm:$0xff] }
  0x48   : > { %259 = vst [vmem:[%s2012_s27 + $0x1a8] sm:$0xff] %v258_v53  ;;  %v368_v44 = vld [vmem:[%s2007_s26 + $0xd80] sm:$0xff]  ;;  %v370_v45 = vld [vmem:[%s2007_s26 + $0xd88] sm:$0xff] }
  0x49   : > { %261 = vst [vmem:[%s2012_s27 + $0x1b0] sm:$0xff] %v260_v54  ;;  %v372_v46 = vld [vmem:[%s2007_s26 + $0xdc0] sm:$0xff]  ;;  %v374_v47 = vld [vmem:[%s2007_s26 + $0xdc8] sm:$0xff] }
  0x4a   : > { %263 = vst [vmem:[%s2012_s27 + $0x1b8] sm:$0xff] %v262_v55  ;;  %v376_v48 = vld [vmem:[%s2007_s26 + $0xe00] sm:$0xff]  ;;  %v378_v49 = vld [vmem:[%s2007_s26 + $0xe08] sm:$0xff] }
  0x4b   : > { %265 = vst [vmem:[%s2012_s27 + $0x1c0] sm:$0xff] %v264_v56  ;;  %v380_v50 = vld [vmem:[%s2007_s26 + $0xe40] sm:$0xff]  ;;  %v382_v51 = vld [vmem:[%s2007_s26 + $0xe48] sm:$0xff] }
  0x4c   : > { %267 = vst [vmem:[%s2012_s27 + $0x1c8] sm:$0xff] %v266_v57  ;;  %v384_v52 = vld [vmem:[%s2007_s26 + $0xe80] sm:$0xff]  ;;  %v386_v53 = vld [vmem:[%s2007_s26 + $0xe88] sm:$0xff] }
  0x4d   : > { %269 = vst [vmem:[%s2012_s27 + $0x1d0] sm:$0xff] %v268_v58  ;;  %v388_v54 = vld [vmem:[%s2007_s26 + $0xec0] sm:$0xff]  ;;  %v390_v55 = vld [vmem:[%s2007_s26 + $0xec8] sm:$0xff] }
  0x4e   : > { %271 = vst [vmem:[%s2012_s27 + $0x1d8] sm:$0xff] %v270_v59  ;;  %v392_v56 = vld [vmem:[%s2007_s26 + $0xf00] sm:$0xff]  ;;  %v394_v57 = vld [vmem:[%s2007_s26 + $0xf08] sm:$0xff] }
  0x4f   : > { %273 = vst [vmem:[%s2012_s27 + $0x1e0] sm:$0xff] %v272_v60  ;;  %v396_v58 = vld [vmem:[%s2007_s26 + $0xf40] sm:$0xff]  ;;  %v398_v59 = vld [vmem:[%s2007_s26 + $0xf48] sm:$0xff] }
  0x50   : > { %275 = vst [vmem:[%s2012_s27 + $0x1e8] sm:$0xff] %v274_v61  ;;  %v400_v60 = vld [vmem:[%s2007_s26 + $0xf80] sm:$0xff]  ;;  %v402_v61 = vld [vmem:[%s2007_s26 + $0xf88] sm:$0xff] }
  0x51   : > { %277 = vst [vmem:[%s2012_s27 + $0x1f0] sm:$0xff] %v276_v62  ;;  %v404_v62 = vld [vmem:[%s2007_s26 + $0xfc0] sm:$0xff] }
  0x52   : > { %279 = vst [vmem:[%s2012_s27 + $0x1f8] sm:$0xff] %v278_v63  ;;  %v406_v63 = vld [vmem:[%s2007_s26 + $0xfc8] sm:$0xff] }
  0x53   : > { %281 = vst [vmem:[%s2012_s27 + $0x200] sm:$0xff] %v280_v0  ;;  %v408_v0 = vld [vmem:[%s2007_s26 + $0x1000] sm:$0xff] }
  0x54   : > { %283 = vst [vmem:[%s2012_s27 + $0x208] sm:$0xff] %v282_v1  ;;  %v410_v1 = vld [vmem:[%s2007_s26 + $0x1008] sm:$0xff] }
  0x55   : > { %285 = vst [vmem:[%s2012_s27 + $0x210] sm:$0xff] %v284_v2  ;;  %v412_v2 = vld [vmem:[%s2007_s26 + $0x1040] sm:$0xff] }
  0x56   : > { %287 = vst [vmem:[%s2012_s27 + $0x218] sm:$0xff] %v286_v3  ;;  %v414_v3 = vld [vmem:[%s2007_s26 + $0x1048] sm:$0xff] }
  0x57   : > { %289 = vst [vmem:[%s2012_s27 + $0x220] sm:$0xff] %v288_v4  ;;  %v416_v4 = vld [vmem:[%s2007_s26 + $0x1080] sm:$0xff] }
  0x58   : > { %291 = vst [vmem:[%s2012_s27 + $0x228] sm:$0xff] %v290_v5  ;;  %v418_v5 = vld [vmem:[%s2007_s26 + $0x1088] sm:$0xff] }
  0x59   : > { %293 = vst [vmem:[%s2012_s27 + $0x230] sm:$0xff] %v292_v6  ;;  %v420_v6 = vld [vmem:[%s2007_s26 + $0x10c0] sm:$0xff] }
  0x5a   : > { %295 = vst [vmem:[%s2012_s27 + $0x238] sm:$0xff] %v294_v7  ;;  %v422_v7 = vld [vmem:[%s2007_s26 + $0x10c8] sm:$0xff] }
  0x5b   : > { %297 = vst [vmem:[%s2012_s27 + $0x240] sm:$0xff] %v296_v8  ;;  %v424_v8 = vld [vmem:[%s2007_s26 + $0x1100] sm:$0xff] }
  0x5c   : > { %299 = vst [vmem:[%s2012_s27 + $0x248] sm:$0xff] %v298_v9  ;;  %v426_v9 = vld [vmem:[%s2007_s26 + $0x1108] sm:$0xff] }
  0x5d   : > { %301 = vst [vmem:[%s2012_s27 + $0x250] sm:$0xff] %v300_v10  ;;  %v428_v10 = vld [vmem:[%s2007_s26 + $0x1140] sm:$0xff] }
  0x5e   : > { %303 = vst [vmem:[%s2012_s27 + $0x258] sm:$0xff] %v302_v11  ;;  %v430_v11 = vld [vmem:[%s2007_s26 + $0x1148] sm:$0xff] }
  0x5f   : > { %305 = vst [vmem:[%s2012_s27 + $0x260] sm:$0xff] %v304_v12  ;;  %v432_v12 = vld [vmem:[%s2007_s26 + $0x1180] sm:$0xff] }
  0x60   : > { %307 = vst [vmem:[%s2012_s27 + $0x268] sm:$0xff] %v306_v13  ;;  %v434_v13 = vld [vmem:[%s2007_s26 + $0x1188] sm:$0xff] }
  0x61   : > { %309 = vst [vmem:[%s2012_s27 + $0x270] sm:$0xff] %v308_v14  ;;  %v436_v14 = vld [vmem:[%s2007_s26 + $0x11c0] sm:$0xff] }
  0x62   : > { %311 = vst [vmem:[%s2012_s27 + $0x278] sm:$0xff] %v310_v15  ;;  %v438_v15 = vld [vmem:[%s2007_s26 + $0x11c8] sm:$0xff] }
  0x63   : > { %313 = vst [vmem:[%s2012_s27 + $0x280] sm:$0xff] %v312_v16  ;;  %v440_v16 = vld [vmem:[%s2007_s26 + $0x1200] sm:$0xff] }
  0x64   : > { %315 = vst [vmem:[%s2012_s27 + $0x288] sm:$0xff] %v314_v17  ;;  %v442_v17 = vld [vmem:[%s2007_s26 + $0x1208] sm:$0xff] }
  0x65   : > { %317 = vst [vmem:[%s2012_s27 + $0x290] sm:$0xff] %v316_v18  ;;  %v444_v18 = vld [vmem:[%s2007_s26 + $0x1240] sm:$0xff] }
  0x66   : > { %319 = vst [vmem:[%s2012_s27 + $0x298] sm:$0xff] %v318_v19  ;;  %v446_v19 = vld [vmem:[%s2007_s26 + $0x1248] sm:$0xff] }
  0x67   : > { %321 = vst [vmem:[%s2012_s27 + $0x2a0] sm:$0xff] %v320_v20  ;;  %v448_v20 = vld [vmem:[%s2007_s26 + $0x1280] sm:$0xff] }
  0x68   : > { %323 = vst [vmem:[%s2012_s27 + $0x2a8] sm:$0xff] %v322_v21  ;;  %v450_v21 = vld [vmem:[%s2007_s26 + $0x1288] sm:$0xff] }
  0x69   : > { %325 = vst [vmem:[%s2012_s27 + $0x2b0] sm:$0xff] %v324_v22  ;;  %v452_v22 = vld [vmem:[%s2007_s26 + $0x12c0] sm:$0xff] }
  0x6a   : > { %327 = vst [vmem:[%s2012_s27 + $0x2b8] sm:$0xff] %v326_v23  ;;  %v454_v23 = vld [vmem:[%s2007_s26 + $0x12c8] sm:$0xff] }
  0x6b   : > { %329 = vst [vmem:[%s2012_s27 + $0x2c0] sm:$0xff] %v328_v24  ;;  %v456_v24 = vld [vmem:[%s2007_s26 + $0x1300] sm:$0xff] }
  0x6c   : > { %331 = vst [vmem:[%s2012_s27 + $0x2c8] sm:$0xff] %v330_v25  ;;  %v458_v25 = vld [vmem:[%s2007_s26 + $0x1308] sm:$0xff] }
  0x6d   : > { %333 = vst [vmem:[%s2012_s27 + $0x2d0] sm:$0xff] %v332_v26  ;;  %v460_v26 = vld [vmem:[%s2007_s26 + $0x1340] sm:$0xff] }
  0x6e   : > { %335 = vst [vmem:[%s2012_s27 + $0x2d8] sm:$0xff] %v334_v27  ;;  %v462_v27 = vld [vmem:[%s2007_s26 + $0x1348] sm:$0xff] }
  0x6f   : > { %337 = vst [vmem:[%s2012_s27 + $0x2e0] sm:$0xff] %v336_v28  ;;  %v464_v28 = vld [vmem:[%s2007_s26 + $0x1380] sm:$0xff] }
  0x70   : > { %339 = vst [vmem:[%s2012_s27 + $0x2e8] sm:$0xff] %v338_v29  ;;  %v466_v29 = vld [vmem:[%s2007_s26 + $0x1388] sm:$0xff] }
  0x71   : > { %341 = vst [vmem:[%s2012_s27 + $0x2f0] sm:$0xff] %v340_v30  ;;  %v468_v30 = vld [vmem:[%s2007_s26 + $0x13c0] sm:$0xff] }
  0x72   : > { %343 = vst [vmem:[%s2012_s27 + $0x2f8] sm:$0xff] %v342_v31  ;;  %v470_v31 = vld [vmem:[%s2007_s26 + $0x13c8] sm:$0xff] }
  0x73   : > { %345 = vst [vmem:[%s2012_s27 + $0x300] sm:$0xff] %v344_v32  ;;  %v472_v32 = vld [vmem:[%s2007_s26 + $0x1400] sm:$0xff] }
  0x74   : > { %347 = vst [vmem:[%s2012_s27 + $0x308] sm:$0xff] %v346_v33  ;;  %v474_v33 = vld [vmem:[%s2007_s26 + $0x1408] sm:$0xff] }
  0x75   : > { %349 = vst [vmem:[%s2012_s27 + $0x310] sm:$0xff] %v348_v34  ;;  %v476_v34 = vld [vmem:[%s2007_s26 + $0x1440] sm:$0xff] }
  0x76   : > { %351 = vst [vmem:[%s2012_s27 + $0x318] sm:$0xff] %v350_v35  ;;  %v478_v35 = vld [vmem:[%s2007_s26 + $0x1448] sm:$0xff] }
  0x77   : > { %353 = vst [vmem:[%s2012_s27 + $0x320] sm:$0xff] %v352_v36  ;;  %v480_v36 = vld [vmem:[%s2007_s26 + $0x1480] sm:$0xff] }
  0x78   : > { %355 = vst [vmem:[%s2012_s27 + $0x328] sm:$0xff] %v354_v37  ;;  %v482_v37 = vld [vmem:[%s2007_s26 + $0x1488] sm:$0xff] }
  0x79   : > { %357 = vst [vmem:[%s2012_s27 + $0x330] sm:$0xff] %v356_v38  ;;  %v484_v38 = vld [vmem:[%s2007_s26 + $0x14c0] sm:$0xff] }
  0x7a   : > { %359 = vst [vmem:[%s2012_s27 + $0x338] sm:$0xff] %v358_v39  ;;  %v486_v39 = vld [vmem:[%s2007_s26 + $0x14c8] sm:$0xff] }
  0x7b   : > { %361 = vst [vmem:[%s2012_s27 + $0x340] sm:$0xff] %v360_v40  ;;  %v488_v40 = vld [vmem:[%s2007_s26 + $0x1500] sm:$0xff] }
  0x7c   : > { %363 = vst [vmem:[%s2012_s27 + $0x348] sm:$0xff] %v362_v41  ;;  %v490_v41 = vld [vmem:[%s2007_s26 + $0x1508] sm:$0xff] }
  0x7d   : > { %365 = vst [vmem:[%s2012_s27 + $0x350] sm:$0xff] %v364_v42  ;;  %v492_v42 = vld [vmem:[%s2007_s26 + $0x1540] sm:$0xff] }
  0x7e   : > { %367 = vst [vmem:[%s2012_s27 + $0x358] sm:$0xff] %v366_v43  ;;  %v494_v43 = vld [vmem:[%s2007_s26 + $0x1548] sm:$0xff] }
  0x7f   : > { %369 = vst [vmem:[%s2012_s27 + $0x360] sm:$0xff] %v368_v44  ;;  %v496_v44 = vld [vmem:[%s2007_s26 + $0x1580] sm:$0xff] }
  0x80   : > { %371 = vst [vmem:[%s2012_s27 + $0x368] sm:$0xff] %v370_v45  ;;  %v498_v45 = vld [vmem:[%s2007_s26 + $0x1588] sm:$0xff] }
  0x81   : > { %373 = vst [vmem:[%s2012_s27 + $0x370] sm:$0xff] %v372_v46  ;;  %v500_v46 = vld [vmem:[%s2007_s26 + $0x15c0] sm:$0xff] }
  0x82   : > { %375 = vst [vmem:[%s2012_s27 + $0x378] sm:$0xff] %v374_v47  ;;  %v502_v47 = vld [vmem:[%s2007_s26 + $0x15c8] sm:$0xff] }
  0x83   : > { %377 = vst [vmem:[%s2012_s27 + $0x380] sm:$0xff] %v376_v48  ;;  %v504_v48 = vld [vmem:[%s2007_s26 + $0x1600] sm:$0xff] }
  0x84   : > { %379 = vst [vmem:[%s2012_s27 + $0x388] sm:$0xff] %v378_v49  ;;  %v506_v49 = vld [vmem:[%s2007_s26 + $0x1608] sm:$0xff] }
  0x85   : > { %381 = vst [vmem:[%s2012_s27 + $0x390] sm:$0xff] %v380_v50  ;;  %v508_v50 = vld [vmem:[%s2007_s26 + $0x1640] sm:$0xff] }
  0x86   : > { %383 = vst [vmem:[%s2012_s27 + $0x398] sm:$0xff] %v382_v51  ;;  %v510_v51 = vld [vmem:[%s2007_s26 + $0x1648] sm:$0xff] }
  0x87   : > { %385 = vst [vmem:[%s2012_s27 + $0x3a0] sm:$0xff] %v384_v52  ;;  %v512_v52 = vld [vmem:[%s2007_s26 + $0x1680] sm:$0xff] }
  0x88   : > { %387 = vst [vmem:[%s2012_s27 + $0x3a8] sm:$0xff] %v386_v53  ;;  %v514_v53 = vld [vmem:[%s2007_s26 + $0x1688] sm:$0xff] }
  0x89   : > { %389 = vst [vmem:[%s2012_s27 + $0x3b0] sm:$0xff] %v388_v54  ;;  %v516_v54 = vld [vmem:[%s2007_s26 + $0x16c0] sm:$0xff] }
  0x8a   : > { %391 = vst [vmem:[%s2012_s27 + $0x3b8] sm:$0xff] %v390_v55  ;;  %v518_v55 = vld [vmem:[%s2007_s26 + $0x16c8] sm:$0xff] }
  0x8b   : > { %393 = vst [vmem:[%s2012_s27 + $0x3c0] sm:$0xff] %v392_v56  ;;  %v520_v56 = vld [vmem:[%s2007_s26 + $0x1700] sm:$0xff] }
  0x8c   : > { %395 = vst [vmem:[%s2012_s27 + $0x3c8] sm:$0xff] %v394_v57  ;;  %v522_v57 = vld [vmem:[%s2007_s26 + $0x1708] sm:$0xff] }
  0x8d   : > { %397 = vst [vmem:[%s2012_s27 + $0x3d0] sm:$0xff] %v396_v58  ;;  %v524_v58 = vld [vmem:[%s2007_s26 + $0x1740] sm:$0xff] }
  0x8e   : > { %399 = vst [vmem:[%s2012_s27 + $0x3d8] sm:$0xff] %v398_v59  ;;  %v526_v59 = vld [vmem:[%s2007_s26 + $0x1748] sm:$0xff] }
  0x8f   : > { %401 = vst [vmem:[%s2012_s27 + $0x3e0] sm:$0xff] %v400_v60  ;;  %v528_v60 = vld [vmem:[%s2007_s26 + $0x1780] sm:$0xff] }
  0x90   : > { %403 = vst [vmem:[%s2012_s27 + $0x3e8] sm:$0xff] %v402_v61  ;;  %v530_v61 = vld [vmem:[%s2007_s26 + $0x1788] sm:$0xff] }
  0x91   : > { %405 = vst [vmem:[%s2012_s27 + $0x3f0] sm:$0xff] %v404_v62  ;;  %v532_v62 = vld [vmem:[%s2007_s26 + $0x17c0] sm:$0xff] }
  0x92   : > { %407 = vst [vmem:[%s2012_s27 + $0x3f8] sm:$0xff] %v406_v63  ;;  %v534_v63 = vld [vmem:[%s2007_s26 + $0x17c8] sm:$0xff] }
  0x93   : > { %409 = vst [vmem:[%s2012_s27 + $0x400] sm:$0xff] %v408_v0 }
  0x94   : > { %411 = vst [vmem:[%s2012_s27 + $0x408] sm:$0xff] %v410_v1 }
  0x95   : > { %413 = vst [vmem:[%s2012_s27 + $0x410] sm:$0xff] %v412_v2 }
  0x96   : > { %415 = vst [vmem:[%s2012_s27 + $0x418] sm:$0xff] %v414_v3 }
  0x97   : > { %417 = vst [vmem:[%s2012_s27 + $0x420] sm:$0xff] %v416_v4 }
  0x98   : > { %419 = vst [vmem:[%s2012_s27 + $0x428] sm:$0xff] %v418_v5 }
  0x99   : > { %421 = vst [vmem:[%s2012_s27 + $0x430] sm:$0xff] %v420_v6 }
  0x9a   : > { %423 = vst [vmem:[%s2012_s27 + $0x438] sm:$0xff] %v422_v7 }
  0x9b   : > { %425 = vst [vmem:[%s2012_s27 + $0x440] sm:$0xff] %v424_v8 }
  0x9c   : > { %427 = vst [vmem:[%s2012_s27 + $0x448] sm:$0xff] %v426_v9 }
  0x9d   : > { %429 = vst [vmem:[%s2012_s27 + $0x450] sm:$0xff] %v428_v10 }
  0x9e   : > { %431 = vst [vmem:[%s2012_s27 + $0x458] sm:$0xff] %v430_v11 }
  0x9f   : > { %433 = vst [vmem:[%s2012_s27 + $0x460] sm:$0xff] %v432_v12 }
  0xa0   : > { %435 = vst [vmem:[%s2012_s27 + $0x468] sm:$0xff] %v434_v13 }
  0xa1   : > { %437 = vst [vmem:[%s2012_s27 + $0x470] sm:$0xff] %v436_v14 }
  0xa2   : > { %439 = vst [vmem:[%s2012_s27 + $0x478] sm:$0xff] %v438_v15 }
  0xa3   : > { %441 = vst [vmem:[%s2012_s27 + $0x480] sm:$0xff] %v440_v16 }
  0xa4   : > { %443 = vst [vmem:[%s2012_s27 + $0x488] sm:$0xff] %v442_v17 }
  0xa5   : > { %445 = vst [vmem:[%s2012_s27 + $0x490] sm:$0xff] %v444_v18 }
  0xa6   : > { %447 = vst [vmem:[%s2012_s27 + $0x498] sm:$0xff] %v446_v19 }
  0xa7   : > { %449 = vst [vmem:[%s2012_s27 + $0x4a0] sm:$0xff] %v448_v20 }
  0xa8   : > { %451 = vst [vmem:[%s2012_s27 + $0x4a8] sm:$0xff] %v450_v21 }
  0xa9   : > { %453 = vst [vmem:[%s2012_s27 + $0x4b0] sm:$0xff] %v452_v22 }
  0xaa   : > { %455 = vst [vmem:[%s2012_s27 + $0x4b8] sm:$0xff] %v454_v23 }
  0xab   : > { %457 = vst [vmem:[%s2012_s27 + $0x4c0] sm:$0xff] %v456_v24 }
  0xac   : > { %459 = vst [vmem:[%s2012_s27 + $0x4c8] sm:$0xff] %v458_v25 }
  0xad   : > { %461 = vst [vmem:[%s2012_s27 + $0x4d0] sm:$0xff] %v460_v26 }
  0xae   : > { %463 = vst [vmem:[%s2012_s27 + $0x4d8] sm:$0xff] %v462_v27 }
  0xaf   : > { %465 = vst [vmem:[%s2012_s27 + $0x4e0] sm:$0xff] %v464_v28 }
  0xb0   : > { %467 = vst [vmem:[%s2012_s27 + $0x4e8] sm:$0xff] %v466_v29 }
  0xb1   : > { %469 = vst [vmem:[%s2012_s27 + $0x4f0] sm:$0xff] %v468_v30 }
  0xb2   : > { %471 = vst [vmem:[%s2012_s27 + $0x4f8] sm:$0xff] %v470_v31 }
  0xb3   : > { %473 = vst [vmem:[%s2012_s27 + $0x500] sm:$0xff] %v472_v32 }
  0xb4   : > { %475 = vst [vmem:[%s2012_s27 + $0x508] sm:$0xff] %v474_v33 }
  0xb5   : > { %477 = vst [vmem:[%s2012_s27 + $0x510] sm:$0xff] %v476_v34 }
  0xb6   : > { %479 = vst [vmem:[%s2012_s27 + $0x518] sm:$0xff] %v478_v35 }
  0xb7   : > { %481 = vst [vmem:[%s2012_s27 + $0x520] sm:$0xff] %v480_v36 }
  0xb8   : > { %483 = vst [vmem:[%s2012_s27 + $0x528] sm:$0xff] %v482_v37 }
  0xb9   : > { %485 = vst [vmem:[%s2012_s27 + $0x530] sm:$0xff] %v484_v38 }
  0xba   : > { %487 = vst [vmem:[%s2012_s27 + $0x538] sm:$0xff] %v486_v39 }
  0xbb   : > { %489 = vst [vmem:[%s2012_s27 + $0x540] sm:$0xff] %v488_v40 }
  0xbc   : > { %491 = vst [vmem:[%s2012_s27 + $0x548] sm:$0xff] %v490_v41 }
  0xbd   : > { %493 = vst [vmem:[%s2012_s27 + $0x550] sm:$0xff] %v492_v42 }
  0xbe   : > { %495 = vst [vmem:[%s2012_s27 + $0x558] sm:$0xff] %v494_v43 }
  0xbf   : > { %497 = vst [vmem:[%s2012_s27 + $0x560] sm:$0xff] %v496_v44 }
  0xc0   : > { %499 = vst [vmem:[%s2012_s27 + $0x568] sm:$0xff] %v498_v45 }
  0xc1   : > { %501 = vst [vmem:[%s2012_s27 + $0x570] sm:$0xff] %v500_v46 }
  0xc2   : > { %503 = vst [vmem:[%s2012_s27 + $0x578] sm:$0xff] %v502_v47 }
  0xc3   : > { %505 = vst [vmem:[%s2012_s27 + $0x580] sm:$0xff] %v504_v48 }
  0xc4   : > { %507 = vst [vmem:[%s2012_s27 + $0x588] sm:$0xff] %v506_v49 }
  0xc5   : > { %509 = vst [vmem:[%s2012_s27 + $0x590] sm:$0xff] %v508_v50 }
  0xc6   : > { %511 = vst [vmem:[%s2012_s27 + $0x598] sm:$0xff] %v510_v51 }
  0xc7   : > { %513 = vst [vmem:[%s2012_s27 + $0x5a0] sm:$0xff] %v512_v52 }
  0xc8   : > { %515 = vst [vmem:[%s2012_s27 + $0x5a8] sm:$0xff] %v514_v53 }
  0xc9   : > { %517 = vst [vmem:[%s2012_s27 + $0x5b0] sm:$0xff] %v516_v54 }
  0xca   : > { %519 = vst [vmem:[%s2012_s27 + $0x5b8] sm:$0xff] %v518_v55 }
  0xcb   : > { %521 = vst [vmem:[%s2012_s27 + $0x5c0] sm:$0xff] %v520_v56 }
  0xcc   : > { %523 = vst [vmem:[%s2012_s27 + $0x5c8] sm:$0xff] %v522_v57 }
  0xcd   : > { %525 = vst [vmem:[%s2012_s27 + $0x5d0] sm:$0xff] %v524_v58 }
  0xce   : > { %527 = vst [vmem:[%s2012_s27 + $0x5d8] sm:$0xff] %v526_v59 }
  0xcf   : > { %529 = vst [vmem:[%s2012_s27 + $0x5e0] sm:$0xff] %v528_v60 }
  0xd0   : > { %531 = vst [vmem:[%s2012_s27 + $0x5e8] sm:$0xff] %v530_v61 }
  0xd1   : > { %533 = vst [vmem:[%s2012_s27 + $0x5f0] sm:$0xff] %v532_v62 }
  0xd2   : > { %535 = vst [vmem:[%s2012_s27 + $0x5f8] sm:$0xff] %v534_v63 }
  0xd3 PF: > { %p1854_p7 = scmp.ge.s32.totalorder %s1944_s14, 1  ;;  %p548_p8 = scmp.lt.s32.totalorder %s1944_s14, 5 }
  0xd5   : > { %p549_p9 = pnand %p1854_p7, %p548_p8 }
  0xd6   : > { %s555_s28 = sand.u32 (!%p549_p9), 1, %s1936_s12   ;;  %s1856_s27 = sshll.u32 (!%p549_p9), %s1982_s15, 1 }
  0xd7   : > { %552 = sbr.rel (%p549_p9) target bundleno = 775 (0x307), region = 51  ;;  %p583_p10 = scmp.lt.s32.totalorder (!%p549_p9), %s1856_s27, 7 }
  0xd8   : > { %s1865_s29 = smul.u32 (!%p549_p9), 1536, %s555_s28  ;;  %s1855_s9 = sshll.u32 (!%p549_p9), %s555_s28, 8 }
  0xd9   : > { %s3173_s12 = scalar_lea.vmem (!%p549_p9), [#allocation3], %s1855_s9 }
  0xda   : > { %s2400_s30 = scalar_lea.vmem (!%p549_p9), [#allocation2], %s1865_s29 }
  0xdc   : > { %v714_v0 = vld [vmem:[%s2400_s30 + $0xf0] sm:$0xff]  ;;  %v712_v2 = vld [vmem:[%s2400_s30 + $0xe0] sm:$0xff]  ;;  %s3501_s27 = smov (!%p583_p10, %s1856_s27), 7  ;;  %s1863_s11 = sshll.u32 (%p1997_p5), %s1982_s15, 4 }
  0xdd   : > { %v778_v1 = vld [vmem:[%s2400_s30 + $0x2f0] sm:$0xff]  ;;  %882 = vmatpush.msra.mxu0 %v714_v0  ;;  %v776_v4 = vld [vmem:[%s2400_s30 + $0x2e0] sm:$0xff]  ;;  %v715_v0 = vld [vmem:[%s2400_s30 + $0xf8] sm:$0xff]  ;;  %s585_s17 = scalar_lea.vmem %s3494_s2, %s3501_s27 }
  0xde   : > { %1012 = vmatpush.msra.mxu2 %v778_v1  ;;  %v746_v3 = vld [vmem:[%s2400_s30 + $0x1f0] sm:$0xff]  ;;  %v744_v7 = vld [vmem:[%s2400_s30 + $0x1e0] sm:$0xff] }
  0xdf   : > { %v810_v5 = vld [vmem:[%s2400_s30 + $0x3f0] sm:$0xff]  ;;  %947 = vmatpush.msra.mxu1 %v746_v3  ;;  %883 = vmatpush.msra.mxu0 %v712_v2  ;;  %v808_v9 = vld [vmem:[%s2400_s30 + $0x3e0] sm:$0xff]  ;;  %v2478_v3 = vld [vmem:[%s3492_s0 + $0x8] sm:$0xff] }
  0xe0   : > { %1077 = vmatpush.msra.mxu3 %v810_v5  ;;  %v710_v6 = vld [vmem:[%s2400_s30 + $0xd0] sm:$0xff]  ;;  %1013 = vmatpush.msra.mxu2 %v776_v4  ;;  %v708_v11 = vld [vmem:[%s2400_s30 + $0xc0] sm:$0xff]  ;;  %v591_v4 = vld [vmem:[%s3492_s0 + $0x18] sm:$0xff] }
  0xe1   : > { %v774_v8 = vld [vmem:[%s2400_s30 + $0x2d0] sm:$0xff]  ;;  %948 = vmatpush.msra.mxu1 %v744_v7  ;;  %v772_v12 = vld [vmem:[%s2400_s30 + $0x2c0] sm:$0xff]  ;;  %884 = vmatpush.msra.mxu0 %v710_v6  ;;  %v747_v6 = vld [vmem:[%s2400_s30 + $0x1f8] sm:$0xff] }
  0xe2   : > { %v742_v10 = vld [vmem:[%s2400_s30 + $0x1d0] sm:$0xff]  ;;  %1078 = vmatpush.msra.mxu3 %v808_v9  ;;  %1014 = vmatpush.msra.mxu2 %v774_v8  ;;  %v740_v14 = vld [vmem:[%s2400_s30 + $0x1c0] sm:$0xff]  ;;  %v713_v8 = vld [vmem:[%s2400_s30 + $0xe8] sm:$0xff] }
  0xe3   : > { %v806_v13 = vld [vmem:[%s2400_s30 + $0x3d0] sm:$0xff]  ;;  %v804_v15 = vld [vmem:[%s2400_s30 + $0x3c0] sm:$0xff]  ;;  %949 = vmatpush.msra.mxu1 %v742_v10  ;;  %885 = vmatpush.msra.mxu0 %v708_v11  ;;  %v745_v10 = vld [vmem:[%s2400_s30 + $0x1e8] sm:$0xff] }
  0xe4   : > { %1079 = vmatpush.msra.mxu3 %v806_v13  ;;  %v706_v16 = vld [vmem:[%s2400_s30 + $0xb0] sm:$0xff]  ;;  %1015 = vmatpush.msra.mxu2 %v772_v12  ;;  %v704_v20 = vld [vmem:[%s2400_s30 + $0xa0] sm:$0xff]  ;;  %v711_v12 = vld [vmem:[%s2400_s30 + $0xd8] sm:$0xff] }
  0xe5   : > { %v770_v17 = vld [vmem:[%s2400_s30 + $0x2b0] sm:$0xff]  ;;  %950 = vmatpush.msra.mxu1 %v740_v14  ;;  %v768_v21 = vld [vmem:[%s2400_s30 + $0x2a0] sm:$0xff]  ;;  %886 = vmatpush.msra.mxu0 %v706_v16  ;;  %v743_v16 = vld [vmem:[%s2400_s30 + $0x1d8] sm:$0xff] }
  0xe6   : > { %v738_v18 = vld [vmem:[%s2400_s30 + $0x1b0] sm:$0xff]  ;;  %1080 = vmatpush.msra.mxu3 %v804_v15  ;;  %1016 = vmatpush.msra.mxu2 %v770_v17  ;;  %v736_v22 = vld [vmem:[%s2400_s30 + $0x1a0] sm:$0xff] }
  0xe7   : > { %v802_v19 = vld [vmem:[%s2400_s30 + $0x3b0] sm:$0xff]  ;;  %v800_v23 = vld [vmem:[%s2400_s30 + $0x3a0] sm:$0xff]  ;;  %951 = vmatpush.msra.mxu1 %v738_v18  ;;  %887 = vmatpush.msra.mxu0 %v704_v20  ;;  %v2507_v18 = vld [vmem:[%s3492_s0 + $0x38] sm:$0xff] }
  0xe8   : > { %1081 = vmatpush.msra.mxu3 %v802_v19  ;;  %v702_v24 = vld [vmem:[%s2400_s30 + $0x90] sm:$0xff]  ;;  %1017 = vmatpush.msra.mxu2 %v768_v21  ;;  %v700_v28 = vld [vmem:[%s2400_s30 + $0x80] sm:$0xff]  ;;  %v709_v19 = vld [vmem:[%s2400_s30 + $0xc8] sm:$0xff] }
  0xe9   : > { %v766_v25 = vld [vmem:[%s2400_s30 + $0x290] sm:$0xff]  ;;  %952 = vmatpush.msra.mxu1 %v736_v22  ;;  %v764_v29 = vld [vmem:[%s2400_s30 + $0x280] sm:$0xff]  ;;  %888 = vmatpush.msra.mxu0 %v702_v24  ;;  %v597_v20 = vld [vmem:[%s3492_s0 + $0x48] sm:$0xff] }
  0xea   : > { %v734_v26 = vld [vmem:[%s2400_s30 + $0x190] sm:$0xff]  ;;  %1082 = vmatpush.msra.mxu3 %v800_v23  ;;  %1018 = vmatpush.msra.mxu2 %v766_v25  ;;  %v732_v30 = vld [vmem:[%s2400_s30 + $0x180] sm:$0xff]  ;;  %v741_v22 = vld [vmem:[%s2400_s30 + $0x1c8] sm:$0xff] }
  0xeb   : > { %v798_v27 = vld [vmem:[%s2400_s30 + $0x390] sm:$0xff]  ;;  %v796_v31 = vld [vmem:[%s2400_s30 + $0x380] sm:$0xff]  ;;  %953 = vmatpush.msra.mxu1 %v734_v26  ;;  %889 = vmatpush.msra.mxu0 %v700_v28  ;;  %v707_v24 = vld [vmem:[%s2400_s30 + $0xb8] sm:$0xff] }
  0xec   : > { %1083 = vmatpush.msra.mxu3 %v798_v27  ;;  %v698_v32 = vld [vmem:[%s2400_s30 + $0x70] sm:$0xff]  ;;  %1019 = vmatpush.msra.mxu2 %v764_v29  ;;  %v696_v36 = vld [vmem:[%s2400_s30 + $0x60] sm:$0xff]  ;;  %v739_v26 = vld [vmem:[%s2400_s30 + $0x1b8] sm:$0xff] }
  0xed   : > { %v762_v33 = vld [vmem:[%s2400_s30 + $0x270] sm:$0xff]  ;;  %954 = vmatpush.msra.mxu1 %v732_v30  ;;  %v760_v37 = vld [vmem:[%s2400_s30 + $0x260] sm:$0xff]  ;;  %890 = vmatpush.msra.mxu0 %v698_v32  ;;  %v705_v28 = vld [vmem:[%s2400_s30 + $0xa8] sm:$0xff] }
  0xee   : > { %v730_v34 = vld [vmem:[%s2400_s30 + $0x170] sm:$0xff]  ;;  %1084 = vmatpush.msra.mxu3 %v796_v31  ;;  %1020 = vmatpush.msra.mxu2 %v762_v33  ;;  %v728_v38 = vld [vmem:[%s2400_s30 + $0x160] sm:$0xff]  ;;  %v737_v32 = vld [vmem:[%s2400_s30 + $0x1a8] sm:$0xff] }
  0xef   : > { %v794_v35 = vld [vmem:[%s2400_s30 + $0x370] sm:$0xff]  ;;  %v792_v39 = vld [vmem:[%s2400_s30 + $0x360] sm:$0xff]  ;;  %955 = vmatpush.msra.mxu1 %v730_v34  ;;  %891 = vmatpush.msra.mxu0 %v696_v36  ;;  %v2537_v34 = vld [vmem:[%s3492_s0 + $0x68] sm:$0xff] }
  0xf0   : > { %1085 = vmatpush.msra.mxu3 %v794_v35  ;;  %v694_v40 = vld [vmem:[%s2400_s30 + $0x50] sm:$0xff]  ;;  %1021 = vmatpush.msra.mxu2 %v760_v37  ;;  %v692_v44 = vld [vmem:[%s2400_s30 + $0x40] sm:$0xff]  ;;  %v603_v35 = vld [vmem:[%s3492_s0 + $0x78] sm:$0xff] }
  0xf1   : > { %v758_v41 = vld [vmem:[%s2400_s30 + $0x250] sm:$0xff]  ;;  %956 = vmatpush.msra.mxu1 %v728_v38  ;;  %v756_v45 = vld [vmem:[%s2400_s30 + $0x240] sm:$0xff]  ;;  %892 = vmatpush.msra.mxu0 %v694_v40  ;;  %v703_v36 = vld [vmem:[%s2400_s30 + $0x98] sm:$0xff] }
  0xf2   : > { %v726_v42 = vld [vmem:[%s2400_s30 + $0x150] sm:$0xff]  ;;  %1086 = vmatpush.msra.mxu3 %v792_v39  ;;  %1022 = vmatpush.msra.mxu2 %v758_v41  ;;  %v724_v46 = vld [vmem:[%s2400_s30 + $0x140] sm:$0xff]  ;;  %v735_v38 = vld [vmem:[%s2400_s30 + $0x198] sm:$0xff] }
  0xf3   : > { %v790_v43 = vld [vmem:[%s2400_s30 + $0x350] sm:$0xff]  ;;  %v788_v47 = vld [vmem:[%s2400_s30 + $0x340] sm:$0xff]  ;;  %957 = vmatpush.msra.mxu1 %v726_v42  ;;  %893 = vmatpush.msra.mxu0 %v692_v44  ;;  %v2559_v42 = vld [vmem:[%s3492_s0 + $0x98] sm:$0xff] }
  0xf4   : > { %1087 = vmatpush.msra.mxu3 %v790_v43  ;;  %v690_v48 = vld [vmem:[%s2400_s30 + $0x30] sm:$0xff]  ;;  %1023 = vmatpush.msra.mxu2 %v756_v45  ;;  %v688_v52 = vld [vmem:[%s2400_s30 + $0x20] sm:$0xff]  ;;  %v609_v43 = vld [vmem:[%s3492_s0 + $0xa8] sm:$0xff] }
  0xf5   : > { %v754_v49 = vld [vmem:[%s2400_s30 + $0x230] sm:$0xff]  ;;  %958 = vmatpush.msra.mxu1 %v724_v46  ;;  %v752_v53 = vld [vmem:[%s2400_s30 + $0x220] sm:$0xff]  ;;  %894 = vmatpush.msra.mxu0 %v690_v48  ;;  %v701_v44 = vld [vmem:[%s2400_s30 + $0x88] sm:$0xff] }
  0xf6   : > { %v722_v50 = vld [vmem:[%s2400_s30 + $0x130] sm:$0xff]  ;;  %1088 = vmatpush.msra.mxu3 %v788_v47  ;;  %1024 = vmatpush.msra.mxu2 %v754_v49  ;;  %v720_v54 = vld [vmem:[%s2400_s30 + $0x120] sm:$0xff]  ;;  %v733_v46 = vld [vmem:[%s2400_s30 + $0x188] sm:$0xff] }
  0xf7   : > { %v786_v51 = vld [vmem:[%s2400_s30 + $0x330] sm:$0xff]  ;;  %v784_v55 = vld [vmem:[%s2400_s30 + $0x320] sm:$0xff]  ;;  %959 = vmatpush.msra.mxu1 %v722_v50  ;;  %895 = vmatpush.msra.mxu0 %v688_v52  ;;  %v2581_v50 = vld [vmem:[%s3492_s0 + $0xc8] sm:$0xff] }
  0xf8   : > { %1089 = vmatpush.msra.mxu3 %v786_v51  ;;  %v686_v56 = vld [vmem:[%s2400_s30 + $0x10] sm:$0xff]  ;;  %1025 = vmatpush.msra.mxu2 %v752_v53  ;;  %v684_v60 = vld [vmem:[%s2400_s30] sm:$0xff]  ;;  %v615_v51 = vld [vmem:[%s3492_s0 + $0xd8] sm:$0xff] }
  0xf9   : > { %v750_v57 = vld [vmem:[%s2400_s30 + $0x210] sm:$0xff]  ;;  %960 = vmatpush.msra.mxu1 %v720_v54  ;;  %v748_v61 = vld [vmem:[%s2400_s30 + $0x200] sm:$0xff]  ;;  %896 = vmatpush.msra.mxu0 %v686_v56  ;;  %v699_v52 = vld [vmem:[%s2400_s30 + $0x78] sm:$0xff] }
  0xfa   : > { %v718_v58 = vld [vmem:[%s2400_s30 + $0x110] sm:$0xff]  ;;  %1090 = vmatpush.msra.mxu3 %v784_v55  ;;  %1026 = vmatpush.msra.mxu2 %v750_v57  ;;  %v2467_v62 = vld [vmem:[%s3492_s0] sm:$0xff]  ;;  %v731_v54 = vld [vmem:[%s2400_s30 + $0x178] sm:$0xff] }
  0xfb   : > { %v782_v59 = vld [vmem:[%s2400_s30 + $0x310] sm:$0xff]  ;;  %961 = vmatpush.msra.mxu1 %v718_v58  ;;  %v716_v1 = vld [vmem:[%s2400_s30 + $0x100] sm:$0xff]  ;;  %897 = vmatpush.msra.mxu0 %v684_v60  ;;  %v2603_v58 = vld [vmem:[%s3492_s0 + $0xf8] sm:$0xff] }
  0xfc   : > { %v590_v63 = vld [vmem:[%s3492_s0 + $0x10] sm:$0xff]  ;;  %1091 = vmatpush.msra.mxu3 %v782_v59  ;;  %1027 = vmatpush.msra.mxu2 %v748_v61  ;;  %v780_v2 = vld [vmem:[%s2400_s30 + $0x300] sm:$0xff]  ;;  %v621_v59 = vld [vmem:[%s3492_s0 + $0x108] sm:$0xff] }
  0xfd   : > { %898 = vmatmul.f32.vlgmr.msra.gmra.mxu0 %v2467_v62  ;;  %1028 = vmatmul.f32.vlgmr.msra.gmra.mxu2 %v590_v63  ;;  %v842_v5 = vld [vmem:[%s2400_s30 + $0x4f0] sm:$0xff]  ;;  %v840_v9 = vld [vmem:[%s2400_s30 + $0x4e0] sm:$0xff]  ;;  %v697_v60 = vld [vmem:[%s2400_s30 + $0x68] sm:$0xff] }
  0xfe   : > { %1272 = vmatpush.msrb.mxu2 %v715_v0  ;;  %962 = vmatpush.msra.mxu1 %v716_v1  ;;  %v874_v7 = vld [vmem:[%s2400_s30 + $0x5f0] sm:$0xff]  ;;  %v872_v11 = vld [vmem:[%s2400_s30 + $0x5e0] sm:$0xff]  ;;  %v729_v63 = vld [vmem:[%s2400_s30 + $0x168] sm:$0xff] }
  0xff   : > { %1092 = vmatpush.msra.mxu3 %v780_v2  ;;  %963 = vmatmul.f32.vlgmr.msra.gmra.mxu1 %v2478_v3  ;;  %v838_v13 = vld [vmem:[%s2400_s30 + $0x4d0] sm:$0xff]  ;;  %v596_v15 = vld [vmem:[%s3492_s0 + $0x40] sm:$0xff] }
 0x100   : > { %1093 = vmatmul.f32.vlgmr.msra.gmra.mxu3 %v591_v4  ;;  %1142 = vmatpush.msrb.mxu0 %v842_v5  ;;  %v2497_v14 = vld [vmem:[%s3492_s0 + $0x30] sm:$0xff]  ;;  %v836_v21 = vld [vmem:[%s2400_s30 + $0x4c0] sm:$0xff]  ;;  %v2625_v4 = vld [vmem:[%s3492_s0 + $0x128] sm:$0xff] }
 0x101   : > { %1337 = vmatpush.msrb.mxu3 %v747_v6  ;;  %1207 = vmatpush.msrb.mxu1 %v874_v7  ;;  %v870_v17 = vld [vmem:[%s2400_s30 + $0x5d0] sm:$0xff]  ;;  %v868_v23 = vld [vmem:[%s2400_s30 + $0x5c0] sm:$0xff]  ;;  %v627_v5 = vld [vmem:[%s3492_s0 + $0x138] sm:$0xff] }
 0x102   : > { %1273 = vmatpush.msrb.mxu2 %v713_v8  ;;  %1143 = vmatpush.msrb.mxu0 %v840_v9  ;;  %v834_v25 = vld [vmem:[%s2400_s30 + $0x4b0] sm:$0xff]  ;;  %v832_v29 = vld [vmem:[%s2400_s30 + $0x4a0] sm:$0xff]  ;;  %v695_v6 = vld [vmem:[%s2400_s30 + $0x58] sm:$0xff] }
 0x103   : > { %1338 = vmatpush.msrb.mxu3 %v745_v10  ;;  %1208 = vmatpush.msrb.mxu1 %v872_v11  ;;  %v866_v27 = vld [vmem:[%s2400_s30 + $0x5b0] sm:$0xff]  ;;  %v2527_v30 = vld [vmem:[%s3492_s0 + $0x60] sm:$0xff]  ;;  %v727_v8 = vld [vmem:[%s2400_s30 + $0x158] sm:$0xff] }
 0x104   : > { %1274 = vmatpush.msrb.mxu2 %v711_v12  ;;  %1144 = vmatpush.msrb.mxu0 %v838_v13  ;;  %v602_v31 = vld [vmem:[%s3492_s0 + $0x70] sm:$0xff]  ;;  %v864_v33 = vld [vmem:[%s2400_s30 + $0x5a0] sm:$0xff]  ;;  %v2647_v12 = vld [vmem:[%s3492_s0 + $0x158] sm:$0xff] }
 0x105   : > { %901 = vmatmul.f32.gmra.mxu0 %v2497_v14  ;;  %1031 = vmatmul.f32.gmra.mxu2 %v596_v15  ;;  %v830_v37 = vld [vmem:[%s2400_s30 + $0x490] sm:$0xff]  ;;  %v608_v41 = vld [vmem:[%s3492_s0 + $0xa0] sm:$0xff]  ;;  %v633_v13 = vld [vmem:[%s3492_s0 + $0x168] sm:$0xff] }
 0x106   : > { %1339 = vmatpush.msrb.mxu3 %v743_v16  ;;  %1209 = vmatpush.msrb.mxu1 %v870_v17  ;;  %v862_v39 = vld [vmem:[%s2400_s30 + $0x590] sm:$0xff]  ;;  %v828_v45 = vld [vmem:[%s2400_s30 + $0x480] sm:$0xff]  ;;  %v693_v15 = vld [vmem:[%s2400_s30 + $0x48] sm:$0xff] }
 0x107   : > { %966 = vmatmul.f32.gmra.mxu1 %v2507_v18  ;;  %1275 = vmatpush.msrb.mxu2 %v709_v19  ;;  %v2551_v40 = vld [vmem:[%s3492_s0 + $0x90] sm:$0xff]  ;;  %v860_v47 = vld [vmem:[%s2400_s30 + $0x580] sm:$0xff]  ;;  %v725_v17 = vld [vmem:[%s2400_s30 + $0x148] sm:$0xff] }
 0x108   : > { %1096 = vmatmul.f32.gmra.mxu3 %v597_v20  ;;  %1145 = vmatpush.msrb.mxu0 %v836_v21  ;;  %v2573_v48 = vld [vmem:[%s3492_s0 + $0xc0] sm:$0xff]  ;;  %v614_v49 = vld [vmem:[%s3492_s0 + $0xd0] sm:$0xff] }
 0x109   : > { %1340 = vmatpush.msrb.mxu3 %v741_v22  ;;  %1210 = vmatpush.msrb.mxu1 %v868_v23  ;;  %v826_v53 = vld [vmem:[%s2400_s30 + $0x470] sm:$0xff]  ;;  %v620_v57 = vld [vmem:[%s3492_s0 + $0x100] sm:$0xff]  ;;  %v2669_v22 = vld [vmem:[%s3492_s0 + $0x188] sm:$0xff] }
 0x10a   : > { %1276 = vmatpush.msrb.mxu2 %v707_v24  ;;  %1146 = vmatpush.msrb.mxu0 %v834_v25  ;;  %v858_v55 = vld [vmem:[%s2400_s30 + $0x570] sm:$0xff]  ;;  %v824_v61 = vld [vmem:[%s2400_s30 + $0x460] sm:$0xff]  ;;  %v639_v23 = vld [vmem:[%s3492_s0 + $0x198] sm:$0xff] }
 0x10b   : > { %1341 = vmatpush.msrb.mxu3 %v739_v26  ;;  %1211 = vmatpush.msrb.mxu1 %v866_v27  ;;  %v2595_v56 = vld [vmem:[%s3492_s0 + $0xf0] sm:$0xff]  ;;  %v856_v0 = vld [vmem:[%s2400_s30 + $0x560] sm:$0xff]  ;;  %v691_v24 = vld [vmem:[%s2400_s30 + $0x38] sm:$0xff] }
 0x10c   : > { %1277 = vmatpush.msrb.mxu2 %v705_v28  ;;  %1147 = vmatpush.msrb.mxu0 %v832_v29  ;;  %v2617_v1 = vld [vmem:[%s3492_s0 + $0x120] sm:$0xff]  ;;  %v626_v2 = vld [vmem:[%s3492_s0 + $0x130] sm:$0xff]  ;;  %v723_v26 = vld [vmem:[%s2400_s30 + $0x138] sm:$0xff] }
 0x10d   : > { %904 = vmatmul.f32.gmra.mxu0 %v2527_v30  ;;  %1034 = vmatmul.f32.gmra.mxu2 %v602_v31  ;;  %v822_v7 = vld [vmem:[%s2400_s30 + $0x450] sm:$0xff]  ;;  %v632_v11 = vld [vmem:[%s3492_s0 + $0x160] sm:$0xff]  ;;  %v2691_v31 = vld [vmem:[%s3492_s0 + $0x1b8] sm:$0xff] }
 0x10e   : > { %1342 = vmatpush.msrb.mxu3 %v737_v32  ;;  %1212 = vmatpush.msrb.mxu1 %v864_v33  ;;  %v854_v9 = vld [vmem:[%s2400_s30 + $0x550] sm:$0xff]  ;;  %v820_v16 = vld [vmem:[%s2400_s30 + $0x440] sm:$0xff]  ;;  %v645_v32 = vld [vmem:[%s3492_s0 + $0x1c8] sm:$0xff] }
 0x10f   : > { %969 = vmatmul.f32.gmra.mxu1 %v2537_v34  ;;  %1278 = vmatpush.msrb.mxu2 %v703_v36  ;;  %v2639_v10 = vld [vmem:[%s3492_s0 + $0x150] sm:$0xff]  ;;  %v852_v19 = vld [vmem:[%s2400_s30 + $0x540] sm:$0xff]  ;;  %v689_v33 = vld [vmem:[%s2400_s30 + $0x28] sm:$0xff] }
 0x110   : > { %1099 = vmatmul.f32.gmra.mxu3 %v603_v35  ;;  %1148 = vmatpush.msrb.mxu0 %v830_v37  ;;  %v2661_v20 = vld [vmem:[%s3492_s0 + $0x180] sm:$0xff]  ;;  %v638_v21 = vld [vmem:[%s3492_s0 + $0x190] sm:$0xff]  ;;  %v721_v36 = vld [vmem:[%s2400_s30 + $0x128] sm:$0xff] }
 0x111   : > { %1343 = vmatpush.msrb.mxu3 %v735_v38  ;;  %1213 = vmatpush.msrb.mxu1 %v862_v39  ;;  %v818_v25 = vld [vmem:[%s2400_s30 + $0x430] sm:$0xff]  ;;  %v644_v29 = vld [vmem:[%s3492_s0 + $0x1c0] sm:$0xff] }
 0x112   : > { %1279 = vmatpush.msrb.mxu2 %v701_v44  ;;  %1149 = vmatpush.msrb.mxu0 %v828_v45  ;;  %v850_v27 = vld [vmem:[%s2400_s30 + $0x530] sm:$0xff]  ;;  %v816_v35 = vld [vmem:[%s2400_s30 + $0x420] sm:$0xff]  ;;  %v687_v44 = vld [vmem:[%s2400_s30 + $0x18] sm:$0xff] }
 0x113   : > { %1344 = vmatpush.msrb.mxu3 %v733_v46  ;;  %1214 = vmatpush.msrb.mxu1 %v860_v47  ;;  %v2683_v28 = vld [vmem:[%s3492_s0 + $0x1b0] sm:$0xff]  ;;  %v848_v37 = vld [vmem:[%s2400_s30 + $0x520] sm:$0xff]  ;;  %v719_v46 = vld [vmem:[%s2400_s30 + $0x118] sm:$0xff] }
 0x114   : > { %1280 = vmatpush.msrb.mxu2 %v699_v52  ;;  %1150 = vmatpush.msrb.mxu0 %v826_v53  ;;  %v2705_v38 = vld [vmem:[%s3492_s0 + $0x1e0] sm:$0xff]  ;;  %v650_v39 = vld [vmem:[%s3492_s0 + $0x1f0] sm:$0xff]  ;;  %v2735_v52 = vld [vmem:[%s3492_s0 + $0x218] sm:$0xff] }
 0x115   : > { %907 = vmatmul.f32.gmra.mxu0 %v2551_v40  ;;  %1037 = vmatmul.f32.gmra.mxu2 %v608_v41  ;;  %v2713_v41 = vld [vmem:[%s3492_s0 + $0x1e8] sm:$0xff]  ;;  %v814_v45 = vld [vmem:[%s2400_s30 + $0x410] sm:$0xff] }
 0x116   : > { %1345 = vmatpush.msrb.mxu3 %v731_v54  ;;  %1215 = vmatpush.msrb.mxu1 %v858_v55  ;;  %v846_v47 = vld [vmem:[%s2400_s30 + $0x510] sm:$0xff]  ;;  %v657_v53 = vld [vmem:[%s3492_s0 + $0x228] sm:$0xff]  ;;  %v812_v55 = vld [vmem:[%s2400_s30 + $0x400] sm:$0xff] }
 0x117   : > { %972 = vmatmul.f32.gmra.mxu1 %v2559_v42  ;;  %1281 = vmatpush.msrb.mxu2 %v697_v60  ;;  %v685_v54 = vld [vmem:[%s2400_s30 + $0x8] sm:$0xff]  ;;  %v2749_v60 = vld [vmem:[%s3492_s0 + $0x240] sm:$0xff] }
 0x118   : > { %1102 = vmatmul.f32.gmra.mxu3 %v609_v43  ;;  %1151 = vmatpush.msrb.mxu0 %v824_v61  ;;  %v651_v43 = vld [vmem:[%s3492_s0 + $0x1f8] sm:$0xff]  ;;  %v662_v61 = vld [vmem:[%s3492_s0 + $0x250] sm:$0xff] }
 0x119   : > { %1346 = vmatpush.msrb.mxu3 %v729_v63  ;;  %1216 = vmatpush.msrb.mxu1 %v856_v0  ;;  %v2757_v63 = vld [vmem:[%s3492_s0 + $0x248] sm:$0xff]  ;;  %v663_v0 = vld [vmem:[%s3492_s0 + $0x258] sm:$0xff] }
 0x11a   : > { %1282 = vmatpush.msrb.mxu2 %v695_v6  ;;  %1152 = vmatpush.msrb.mxu0 %v822_v7  ;;  %v875_v6 = vld [vmem:[%s2400_s30 + $0x5f8] sm:$0xff] }
 0x11b   : > { %1347 = vmatpush.msrb.mxu3 %v727_v8  ;;  %1217 = vmatpush.msrb.mxu1 %v854_v9  ;;  %v811_v7 = vld [vmem:[%s2400_s30 + $0x3f8] sm:$0xff]  ;;  %v2771_v8 = vld [vmem:[%s3492_s0 + $0x270] sm:$0xff]  ;;  %v668_v9 = vld [vmem:[%s3492_s0 + $0x280] sm:$0xff] }
 0x11c   : > { %1283 = vmatpush.msrb.mxu2 %v693_v15  ;;  %1153 = vmatpush.msrb.mxu0 %v820_v16  ;;  %v841_v15 = vld [vmem:[%s2400_s30 + $0x4e8] sm:$0xff] }
 0x11d   : > { %910 = vmatmul.f32.gmra.mxu0 %v2573_v48  ;;  %1040 = vmatmul.f32.gmra.mxu2 %v614_v49  ;;  %v2727_v49 = vld [vmem:[%s3492_s0 + $0x210] sm:$0xff]  ;;  %v777_v16 = vld [vmem:[%s2400_s30 + $0x2e8] sm:$0xff] }
 0x11e   : > { %1348 = vmatpush.msrb.mxu3 %v725_v17  ;;  %1218 = vmatpush.msrb.mxu1 %v852_v19  ;;  %v873_v17 = vld [vmem:[%s2400_s30 + $0x5e8] sm:$0xff] }
 0x11f   : > { %975 = vmatmul.f32.gmra.mxu1 %v2581_v50  ;;  %1284 = vmatpush.msrb.mxu2 %v691_v24  ;;  %v809_v19 = vld [vmem:[%s2400_s30 + $0x3e8] sm:$0xff] }
 0x120   : > { %1105 = vmatmul.f32.gmra.mxu3 %v615_v51  ;;  %1154 = vmatpush.msrb.mxu0 %v818_v25  ;;  %v656_v51 = vld [vmem:[%s3492_s0 + $0x220] sm:$0xff]  ;;  %v2802_v24 = vld [vmem:[%s3492_s0 + $0x2a8] sm:$0xff]  ;;  %v675_v25 = vld [vmem:[%s3492_s0 + $0x2b8] sm:$0xff] }
 0x121   : > { %1349 = vmatpush.msrb.mxu3 %v723_v26  ;;  %1219 = vmatpush.msrb.mxu1 %v850_v27  ;;  %v839_v26 = vld [vmem:[%s2400_s30 + $0x4d8] sm:$0xff] }
 0x122   : > { %1285 = vmatpush.msrb.mxu2 %v689_v33  ;;  %1155 = vmatpush.msrb.mxu0 %v816_v35  ;;  %v775_v27 = vld [vmem:[%s2400_s30 + $0x2d8] sm:$0xff]  ;;  %v2819_v33 = vld [vmem:[%s3492_s0 + $0x2d0] sm:$0xff]  ;;  %v680_v35 = vld [vmem:[%s3492_s0 + $0x2e0] sm:$0xff] }
 0x123   : > { %1350 = vmatpush.msrb.mxu3 %v721_v36  ;;  %1220 = vmatpush.msrb.mxu1 %v848_v37  ;;  %v2827_v36 = vld [vmem:[%s3492_s0 + $0x2d8] sm:$0xff]  ;;  %v2829_v37 = vld [vmem:[%s585_s17] sm:$0x3]  ;;  %s3418_s17 = scalar_lea.vmem (%p1997_p5), %s3495_s3, %s1863_s11 }
 0x124   : > { %1286 = vmatpush.msrb.mxu2 %v687_v44  ;;  %1156 = vmatpush.msrb.mxu0 %v814_v45  ;;  %v2838_v44 = vperm.slane %v2829_v37, 0  ;;  %v773_v45 = vld [vmem:[%s2400_s30 + $0x2c8] sm:$0xff] }
 0x125   : > { %913 = vmatmul.f32.gmra.mxu0 %v2595_v56  ;;  %1043 = vmatmul.f32.gmra.mxu2 %v620_v57  ;;  %v717_v57 = vld [vmem:[%s2400_s30 + $0x108] sm:$0xff] }
 0x126   : > { %1351 = vmatpush.msrb.mxu3 %v719_v46  ;;  %1221 = vmatpush.msrb.mxu1 %v846_v47  ;;  %v869_v46 = vld [vmem:[%s2400_s30 + $0x5c8] sm:$0xff] }
 0x127   : > { %978 = vmatmul.f32.gmra.mxu1 %v2603_v58  ;;  %1287 = vmatpush.msrb.mxu2 %v685_v54  ;;  %v805_v47 = vld [vmem:[%s2400_s30 + $0x3c8] sm:$0xff] }
 0x128   : > { %1108 = vmatmul.f32.gmra.mxu3 %v621_v59  ;;  %v844_v59 = vld [vmem:[%s2400_s30 + $0x500] sm:$0xff]  ;;  %1157 = vmatpush.msrb.mxu0 %v812_v55 }
 0x129   : > { %1352 = vmatpush.msrb.mxu3 %v717_v57  ;;  %1222 = vmatpush.msrb.mxu1 %v844_v59  ;;  %v2852_v57 = vld [vmem:[%s3492_s0 + $0x28] sm:$0xff] }
 0x12b   : > { %1597 = vmatpush.msra.mxu3 %v875_v6  ;;  %1467 = vmatpush.msra.mxu1 %v811_v7  ;;  %v803_v7 = vld [vmem:[%s2400_s30 + $0x3b8] sm:$0xff] }
 0x12d   : > { %916 = vmatmul.f32.gmra.mxu0 %v2617_v1  ;;  %1046 = vmatmul.f32.gmra.mxu2 %v626_v2  ;;  %v843_v2 = vld [vmem:[%s2400_s30 + $0x4f8] sm:$0xff] }
 0x12e   : > { %1532 = vmatpush.msra.mxu2 %v843_v2  ;;  %1598 = vmatpush.msra.mxu3 %v873_v17  ;;  %v771_v2 = vld [vmem:[%s2400_s30 + $0x2b8] sm:$0xff] }
 0x12f   : > { %981 = vmatmul.f32.gmra.mxu1 %v2625_v4  ;;  %v2873_v17 = vld [vmem:[%s3492_s0 + $0x58] sm:$0xff] }
 0x130   : > { %1111 = vmatmul.f32.gmra.mxu3 %v627_v5  ;;  %v779_v5 = vld [vmem:[%s2400_s30 + $0x2f8] sm:$0xff]  ;;  %1533 = vmatpush.msra.mxu2 %v841_v15 }
 0x131   : > { %1402 = vmatpush.msra.mxu0 %v779_v5  ;;  %1468 = vmatpush.msra.mxu1 %v809_v19  ;;  %v867_v5 = vld [vmem:[%s2400_s30 + $0x5b8] sm:$0xff] }
 0x132   : > { %1534 = vmatpush.msra.mxu2 %v839_v26  ;;  %v769_v26 = vld [vmem:[%s2400_s30 + $0x2a8] sm:$0xff] }
 0x133   : > { %1403 = vmatpush.msra.mxu0 %v777_v16 }
 0x135   : > { %919 = vmatmul.f32.gmra.mxu0 %v2639_v10  ;;  %1049 = vmatmul.f32.gmra.mxu2 %v632_v11  ;;  %v2779_v11 = vld [vmem:[%s3492_s0 + $0x278] sm:$0xff] }
 0x136   : > { %1404 = vmatpush.msra.mxu0 %v775_v27  ;;  %v865_v27 = vld [vmem:[%s2400_s30 + $0x5a8] sm:$0xff] }
 0x137   : > { %984 = vmatmul.f32.gmra.mxu1 %v2647_v12 }
 0x138   : > { %1114 = vmatmul.f32.gmra.mxu3 %v633_v13  ;;  %v669_v13 = vld [vmem:[%s3492_s0 + $0x288] sm:$0xff]  ;;  %1405 = vmatpush.msra.mxu0 %v773_v45 }
 0x13a   : > { %1406 = vmatpush.msra.mxu0 %v771_v2 }
 0x13c   : > { %1407 = vmatpush.msra.mxu0 %v769_v26  ;;  %v797_v26 = vld [vmem:[%s2400_s30 + $0x388] sm:$0xff] }
 0x13d   : > { %922 = vmatmul.f32.gmra.mxu0 %v2661_v20  ;;  %1052 = vmatmul.f32.gmra.mxu2 %v638_v21  ;;  %v2794_v21 = vld [vmem:[%s3492_s0 + $0x2a0] sm:$0xff] }
 0x13f   : > { %987 = vmatmul.f32.gmra.mxu1 %v2669_v22 }
 0x140   : > { %1117 = vmatmul.f32.gmra.mxu3 %v639_v23  ;;  %v674_v23 = vld [vmem:[%s3492_s0 + $0x2b0] sm:$0xff] }
 0x145   : > { %925 = vmatmul.f32.gmra.mxu0 %v2683_v28  ;;  %1055 = vmatmul.f32.gmra.mxu2 %v644_v29  ;;  %v871_v29 = vld [vmem:[%s2400_s30 + $0x5d8] sm:$0xff] }
 0x146   : > { %1599 = vmatpush.msra.mxu3 %v871_v29 }
 0x147   : > { %990 = vmatmul.f32.gmra.mxu1 %v2691_v31 }
 0x148   : > { %1120 = vmatmul.f32.gmra.mxu3 %v645_v32  ;;  %v807_v32 = vld [vmem:[%s2400_s30 + $0x3d8] sm:$0xff] }
 0x149   : > { %1469 = vmatpush.msra.mxu1 %v807_v32  ;;  %1600 = vmatpush.msra.mxu3 %v869_v46  ;;  %v801_v32 = vld [vmem:[%s2400_s30 + $0x3a8] sm:$0xff] }
 0x14a   : > { %v2894_v46 = vld [vmem:[%s3492_s0 + $0x88] sm:$0xff] }
 0x14b   : > { %1470 = vmatpush.msra.mxu1 %v805_v47  ;;  %1601 = vmatpush.msra.mxu3 %v867_v5 }
 0x14d   : > { %928 = vmatmul.f32.gmra.mxu0 %v2705_v38  ;;  %1058 = vmatmul.f32.gmra.mxu2 %v650_v39  ;;  %v681_v39 = vld [vmem:[%s3492_s0 + $0x2e8] sm:$0xff] }
 0x14e   : > { %1471 = vmatpush.msra.mxu1 %v803_v7  ;;  %1602 = vmatpush.msra.mxu3 %v865_v27 }
 0x14f   : > { %993 = vmatmul.f32.gmra.mxu1 %v2713_v41 }
 0x150   : > { %1123 = vmatmul.f32.gmra.mxu3 %v651_v43  ;;  %v837_v43 = vld [vmem:[%s2400_s30 + $0x4c8] sm:$0xff]  ;;  %1472 = vmatpush.msra.mxu1 %v801_v32 }
 0x151   : > { %1535 = vmatpush.msra.mxu2 %v837_v43 }
 0x155   : > { %931 = vmatmul.f32.gmra.mxu0 %v2727_v49  ;;  %1061 = vmatmul.f32.gmra.mxu2 %v656_v51 }
 0x157   : > { %996 = vmatmul.f32.gmra.mxu1 %v2735_v52 }
 0x158   : > { %1126 = vmatmul.f32.gmra.mxu3 %v657_v53  ;;  %v2846_v53 = vld [vmem:[%s3492_s0 + $0x20] sm:$0xff] }
 0x15d   : > { %934 = vmatmul.f32.gmra.mxu0 %v2749_v60  ;;  %1064 = vmatmul.f32.gmra.mxu2 %v662_v61  ;;  %v835_v61 = vld [vmem:[%s2400_s30 + $0x4b8] sm:$0xff] }
 0x15e   : > { %1536 = vmatpush.msra.mxu2 %v835_v61 }
 0x15f   : > { %999 = vmatmul.f32.gmra.mxu1 %v2757_v63 }
 0x160   : > { %1129 = vmatmul.f32.gmra.mxu3 %v663_v0 }
 0x165   : > { %937 = vmatmul.f32.gmra.mxu0 %v2771_v8  ;;  %1067 = vmatmul.f32.gmra.mxu2 %v668_v9 }
 0x167   : > { %1002 = vmatmul.f32.gmra.mxu1 %v2779_v11 }
 0x168   : > { %1132 = vmatmul.f32.gmra.mxu3 %v669_v13 }
 0x16d   : > { %940 = vmatmul.f32.gmra.mxu0 %v2794_v21  ;;  %1070 = vmatmul.f32.gmra.mxu2 %v674_v23  ;;  %v833_v23 = vld [vmem:[%s2400_s30 + $0x4a8] sm:$0xff] }
 0x16e   : > { %1537 = vmatpush.msra.mxu2 %v833_v23  ;;  %v861_v23 = vld [vmem:[%s2400_s30 + $0x588] sm:$0xff] }
 0x16f   : > { %1005 = vmatmul.f32.gmra.mxu1 %v2802_v24 }
 0x170   : > { %1135 = vmatmul.f32.gmra.mxu3 %v675_v25 }
 0x175   : > { %943 = vmatmul.f32.gmra.mxu0 %v2819_v33  ;;  %1073 = vmatmul.f32.gmra.mxu2 %v680_v35 }
 0x177   : > { %1008 = vmatmul.f32.gmra.mxu1 %v2827_v36 }
 0x178   : > { %1138 = vmatmul.f32.gmra.mxu3 %v681_v39 }
 0x17a   : > { %v899_v51 = vpop.f32.mrf.mxu0 }
 0x17b   : > { %v900_v54 = vadd.f32 %v899_v51, %v2838_v44  ;;  %v831_v51 = vld [vmem:[%s2400_s30 + $0x498] sm:$0xff] }
 0x17c   : > { %v964_v55 = vpop.f32.mrf.mxu1  ;;  %1538 = vmatpush.msra.mxu2 %v831_v51  ;;  %v763_v51 = vld [vmem:[%s2400_s30 + $0x278] sm:$0xff] }
 0x17d   : > { %v965_v59 = vadd.f32 %v964_v55, %v900_v54  ;;  %1158 = vmatmul.f32.vlgmr.msrb.gmra.mxu0 %v2846_v53  ;;  %1288 = vmatmul.f32.vlgmr.msrb.gmra.mxu2 %v2467_v62  ;;  %v2865_v62 = vld [vmem:[%s3492_s0 + $0x50] sm:$0xff]  ;;  %v767_v55 = vld [vmem:[%s2400_s30 + $0x298] sm:$0xff] }
 0x17e   : > { %1408 = vmatpush.msra.mxu0 %v767_v55 }
 0x17f   : > { %1223 = vmatmul.f32.vlgmr.msrb.gmra.mxu1 %v2852_v57 }
 0x180   : > { %1353 = vmatmul.f32.vlgmr.msrb.gmra.mxu3 %v2478_v3  ;;  %v1029_v0 = vpop.f32.mrf.mxu2 }
 0x181   : > { %v1030_v6 = vadd.f32 %v1029_v0, %v965_v59  ;;  %v863_v59 = vld [vmem:[%s2400_s30 + $0x598] sm:$0xff] }
 0x182   : > { %v902_v9 = vpop.f32.mrf.mxu0  ;;  %1603 = vmatpush.msra.mxu3 %v863_v59  ;;  %v799_v0 = vld [vmem:[%s2400_s30 + $0x398] sm:$0xff] }
 0x183   : > { %v903_v13 = vadd.f32 %v902_v9, %v2838_v44  ;;  %v1094_v3 = vpop.f32.mrf.mxu3  ;;  %1473 = vmatpush.msra.mxu1 %v799_v0  ;;  %v2915_v9 = vld [vmem:[%s3492_s0 + $0xb8] sm:$0xff] }
 0x184   : > { %v2868_v15 = vadd.f32 %v1094_v3, %v1030_v6  ;;  %v967_v16 = vpop.f32.mrf.mxu1  ;;  %v829_v3 = vld [vmem:[%s2400_s30 + $0x488] sm:$0xff]  ;;  %1604 = vmatpush.msra.mxu3 %v861_v23  ;;  %v795_v59 = vld [vmem:[%s2400_s30 + $0x378] sm:$0xff] }
 0x185   : > { %v968_v19 = vadd.f32 %v967_v16, %v903_v13  ;;  %1161 = vmatmul.f32.gmra.mxu0 %v2865_v62  ;;  %1291 = vmatmul.f32.gmra.mxu2 %v2497_v14  ;;  %v2886_v14 = vld [vmem:[%s3492_s0 + $0x80] sm:$0xff] }
 0x186   : > { %1539 = vmatpush.msra.mxu2 %v829_v3  ;;  %1474 = vmatpush.msra.mxu1 %v797_v26 }
 0x187   : > { %1226 = vmatmul.f32.gmra.mxu1 %v2873_v17 }
 0x188   : > { %1356 = vmatmul.f32.gmra.mxu3 %v2507_v18  ;;  %v1032_v25 = vpop.f32.mrf.mxu2  ;;  %1475 = vmatpush.msra.mxu1 %v795_v59  ;;  %v791_v59 = vld [vmem:[%s2400_s30 + $0x358] sm:$0xff] }
 0x189   : > { %v1033_v29 = vadd.f32 %v1032_v25, %v968_v19  ;;  %v765_v19 = vld [vmem:[%s2400_s30 + $0x288] sm:$0xff] }
 0x18a   : > { %v905_v35 = vpop.f32.mrf.mxu0  ;;  %1409 = vmatpush.msra.mxu0 %v765_v19  ;;  %v857_v19 = vld [vmem:[%s2400_s30 + $0x568] sm:$0xff] }
 0x18b   : > { %v906_v39 = vadd.f32 %v905_v35, %v2838_v44  ;;  %v1097_v18 = vpop.f32.mrf.mxu3 }
 0x18c   : > { %v2889_v43 = vadd.f32 %v1097_v18, %v1033_v29  ;;  %v970_v45 = vpop.f32.mrf.mxu1  ;;  %1410 = vmatpush.msra.mxu0 %v763_v51  ;;  %v759_v51 = vld [vmem:[%s2400_s30 + $0x258] sm:$0xff] }
 0x18d   : > { %v971_v47 = vadd.f32 %v970_v45, %v906_v39  ;;  %1164 = vmatmul.f32.gmra.mxu0 %v2886_v14  ;;  %1294 = vmatmul.f32.gmra.mxu2 %v2527_v30  ;;  %v2907_v30 = vld [vmem:[%s3492_s0 + $0xb0] sm:$0xff]  ;;  %v2936_v39 = vld [vmem:[%s3492_s0 + $0xe8] sm:$0xff]  ;;  %v827_v45 = vld [vmem:[%s2400_s30 + $0x478] sm:$0xff] }
 0x18e   : > { %1540 = vmatpush.msra.mxu2 %v827_v45  ;;  %v823_v45 = vld [vmem:[%s2400_s30 + $0x458] sm:$0xff] }
 0x18f   : > { %1229 = vmatmul.f32.gmra.mxu1 %v2894_v46 }
 0x190   : > { %1359 = vmatmul.f32.gmra.mxu3 %v2537_v34  ;;  %v1035_v54 = vpop.f32.mrf.mxu2 }
 0x191   : > { %v1036_v61 = vadd.f32 %v1035_v54, %v971_v47  ;;  %v859_v54 = vld [vmem:[%s2400_s30 + $0x578] sm:$0xff] }
 0x192   : > { %v908_v2 = vpop.f32.mrf.mxu0  ;;  %1605 = vmatpush.msra.mxu3 %v859_v54  ;;  %v855_v54 = vld [vmem:[%s2400_s30 + $0x558] sm:$0xff] }
 0x193   : > { %v909_v5 = vadd.f32 %v908_v2, %v2838_v44  ;;  %v1100_v34 = vpop.f32.mrf.mxu3 }
 0x194   : > { %v2910_v6 = vadd.f32 %v1100_v34, %v1036_v61  ;;  %v973_v7 = vpop.f32.mrf.mxu1  ;;  %v2957_v34 = vld [vmem:[%s3492_s0 + $0x118] sm:$0xff]  ;;  %1606 = vmatpush.msra.mxu3 %v857_v19  ;;  %v757_v19 = vld [vmem:[%s2400_s30 + $0x248] sm:$0xff] }
 0x195   : > { %v974_v13 = vadd.f32 %v973_v7, %v909_v5  ;;  %1167 = vmatmul.f32.gmra.mxu0 %v2907_v30  ;;  %1297 = vmatmul.f32.gmra.mxu2 %v2551_v40  ;;  %v2928_v40 = vld [vmem:[%s3492_s0 + $0xe0] sm:$0xff] }
 0x196   : > { %1607 = vmatpush.msra.mxu3 %v855_v54 }
 0x197   : > { %1232 = vmatmul.f32.gmra.mxu1 %v2915_v9 }
 0x198   : > { %1362 = vmatmul.f32.gmra.mxu3 %v2559_v42  ;;  %v1038_v16 = vpop.f32.mrf.mxu2 }
 0x199   : > { %v1039_v25 = vadd.f32 %v1038_v16, %v974_v13  ;;  %v825_v13 = vld [vmem:[%s2400_s30 + $0x468] sm:$0xff] }
 0x19a   : > { %v911_v27 = vpop.f32.mrf.mxu0  ;;  %1541 = vmatpush.msra.mxu2 %v825_v13  ;;  %v761_v16 = vld [vmem:[%s2400_s30 + $0x268] sm:$0xff] }
 0x19b   : > { %v912_v29 = vadd.f32 %v911_v27, %v2838_v44  ;;  %v1103_v42 = vpop.f32.mrf.mxu3  ;;  %1411 = vmatpush.msra.mxu0 %v761_v16 }
 0x19c   : > { %v2931_v32 = vadd.f32 %v1103_v42, %v1039_v25  ;;  %v976_v35 = vpop.f32.mrf.mxu1  ;;  %v793_v25 = vld [vmem:[%s2400_s30 + $0x368] sm:$0xff]  ;;  %1542 = vmatpush.msra.mxu2 %v823_v45 }
 0x19d   : > { %v977_v18 = vadd.f32 %v976_v35, %v912_v29  ;;  %1170 = vmatmul.f32.gmra.mxu0 %v2928_v40  ;;  %1300 = vmatmul.f32.gmra.mxu2 %v2573_v48  ;;  %v2949_v48 = vld [vmem:[%s3492_s0 + $0x110] sm:$0xff]  ;;  %v2978_v35 = vld [vmem:[%s3492_s0 + $0x148] sm:$0xff] }
 0x19e   : > { %1476 = vmatpush.msra.mxu1 %v793_v25  ;;  %1412 = vmatpush.msra.mxu0 %v759_v51  ;;  %v3020_v45 = vld [vmem:[%s3492_s0 + $0x1a8] sm:$0xff]  ;;  %v819_v51 = vld [vmem:[%s2400_s30 + $0x438] sm:$0xff] }
 0x19f   : > { %1235 = vmatmul.f32.gmra.mxu1 %v2936_v39 }
 0x1a0   : > { %1365 = vmatmul.f32.gmra.mxu3 %v2581_v50  ;;  %v1041_v47 = vpop.f32.mrf.mxu2  ;;  %1477 = vmatpush.msra.mxu1 %v791_v59  ;;  %v851_v59 = vld [vmem:[%s2400_s30 + $0x538] sm:$0xff] }
 0x1a1   : > { %v1042_v55 = vadd.f32 %v1041_v47, %v977_v18  ;;  %1413 = vmatpush.msra.mxu0 %v757_v19 }
 0x1a2   : > { %v914_v61 = vpop.f32.mrf.mxu0 }
 0x1a3   : > { %v915_v0 = vadd.f32 %v914_v61, %v2838_v44  ;;  %v1106_v50 = vpop.f32.mrf.mxu3 }
 0x1a4   : > { %v2952_v2 = vadd.f32 %v1106_v50, %v1042_v55  ;;  %v979_v5 = vpop.f32.mrf.mxu1 }
 0x1a5   : > { %v980_v7 = vadd.f32 %v979_v5, %v915_v0  ;;  %1173 = vmatmul.f32.gmra.mxu0 %v2949_v48  ;;  %1303 = vmatmul.f32.gmra.mxu2 %v2595_v56  ;;  %v2970_v56 = vld [vmem:[%s3492_s0 + $0x140] sm:$0xff] }
 0x1a7   : > { %1238 = vmatmul.f32.gmra.mxu1 %v2957_v34 }
 0x1a8   : > { %1368 = vmatmul.f32.gmra.mxu3 %v2603_v58  ;;  %v1044_v3 = vpop.f32.mrf.mxu2 }
 0x1a9   : > { %v1045_v23 = vadd.f32 %v1044_v3, %v980_v7  ;;  %v2999_v7 = vld [vmem:[%s3492_s0 + $0x178] sm:$0xff]  ;;  %v821_v3 = vld [vmem:[%s2400_s30 + $0x448] sm:$0xff] }
 0x1aa   : > { %v917_v26 = vpop.f32.mrf.mxu0  ;;  %1543 = vmatpush.msra.mxu2 %v821_v3 }
 0x1ab   : > { %v918_v27 = vadd.f32 %v917_v26, %v2838_v44  ;;  %v1109_v58 = vpop.f32.mrf.mxu3  ;;  %v789_v26 = vld [vmem:[%s2400_s30 + $0x348] sm:$0xff] }
 0x1ac   : > { %v2973_v29 = vadd.f32 %v1109_v58, %v1045_v23  ;;  %v982_v42 = vpop.f32.mrf.mxu1  ;;  %v853_v23 = vld [vmem:[%s2400_s30 + $0x548] sm:$0xff]  ;;  %1478 = vmatpush.msra.mxu1 %v789_v26  ;;  %1544 = vmatpush.msra.mxu2 %v819_v51 }
 0x1ad   : > { %v983_v18 = vadd.f32 %v982_v42, %v918_v27  ;;  %1176 = vmatmul.f32.gmra.mxu0 %v2970_v56  ;;  %1306 = vmatmul.f32.gmra.mxu2 %v2617_v1  ;;  %v2991_v1 = vld [vmem:[%s3492_s0 + $0x170] sm:$0xff]  ;;  %v753_v26 = vld [vmem:[%s2400_s30 + $0x228] sm:$0xff] }
 0x1ae   : > { %1608 = vmatpush.msra.mxu3 %v853_v23  ;;  %v817_v23 = vld [vmem:[%s2400_s30 + $0x428] sm:$0xff] }
 0x1af   : > { %1241 = vmatmul.f32.gmra.mxu1 %v2978_v35  ;;  %1545 = vmatpush.msra.mxu2 %v817_v23 }
 0x1b0   : > { %1371 = vmatmul.f32.gmra.mxu3 %v2625_v4  ;;  %v1047_v47 = vpop.f32.mrf.mxu2 }
 0x1b1   : > { %v1048_v55 = vadd.f32 %v1047_v47, %v983_v18  ;;  %1609 = vmatpush.msra.mxu3 %v851_v59 }
 0x1b2   : > { %v920_v61 = vpop.f32.mrf.mxu0 }
 0x1b3   : > { %v921_v0 = vadd.f32 %v920_v61, %v2838_v44  ;;  %v1112_v4 = vpop.f32.mrf.mxu3 }
 0x1b4   : > { %v2994_v50 = vadd.f32 %v1112_v4, %v1048_v55  ;;  %v985_v5 = vpop.f32.mrf.mxu1  ;;  %v755_v55 = vld [vmem:[%s2400_s30 + $0x238] sm:$0xff] }
 0x1b5   : > { %v986_v13 = vadd.f32 %v985_v5, %v921_v0  ;;  %1179 = vmatmul.f32.gmra.mxu0 %v2991_v1  ;;  %1309 = vmatmul.f32.gmra.mxu2 %v2639_v10  ;;  %v3012_v10 = vld [vmem:[%s3492_s0 + $0x1a0] sm:$0xff]  ;;  %v787_v0 = vld [vmem:[%s2400_s30 + $0x338] sm:$0xff] }
 0x1b6   : > { %1414 = vmatpush.msra.mxu0 %v755_v55  ;;  %1479 = vmatpush.msra.mxu1 %v787_v0  ;;  %v3062_v55 = vld [vmem:[%s3492_s0 + $0x208] sm:$0xff] }
 0x1b7   : > { %1244 = vmatmul.f32.gmra.mxu1 %v2999_v7 }
 0x1b8   : > { %1374 = vmatmul.f32.gmra.mxu3 %v2647_v12  ;;  %v1050_v16 = vpop.f32.mrf.mxu2  ;;  %1415 = vmatpush.msra.mxu0 %v753_v26 }
 0x1b9   : > { %v1051_v25 = vadd.f32 %v1050_v16, %v986_v13  ;;  %v3041_v16 = vld [vmem:[%s3492_s0 + $0x1d8] sm:$0xff] }
 0x1ba   : > { %v923_v27 = vpop.f32.mrf.mxu0 }
 0x1bb   : > { %v924_v58 = vadd.f32 %v923_v27, %v2838_v44  ;;  %v1115_v12 = vpop.f32.mrf.mxu3  ;;  %v849_v27 = vld [vmem:[%s2400_s30 + $0x528] sm:$0xff] }
 0x1bc   : > { %v3015_v42 = vadd.f32 %v1115_v12, %v1051_v25  ;;  %v988_v18 = vpop.f32.mrf.mxu1  ;;  %1610 = vmatpush.msra.mxu3 %v849_v27  ;;  %v785_v12 = vld [vmem:[%s2400_s30 + $0x328] sm:$0xff]  ;;  %v3083_v27 = vld [vmem:[%s3492_s0 + $0x238] sm:$0xff] }
 0x1bd   : > { %v989_v47 = vadd.f32 %v988_v18, %v924_v58  ;;  %1182 = vmatmul.f32.gmra.mxu0 %v3012_v10  ;;  %1312 = vmatmul.f32.gmra.mxu2 %v2661_v20  ;;  %v3033_v20 = vld [vmem:[%s3492_s0 + $0x1d0] sm:$0xff] }
 0x1be   : > { %1480 = vmatpush.msra.mxu1 %v785_v12  ;;  %v813_v12 = vld [vmem:[%s2400_s30 + $0x408] sm:$0xff] }
 0x1bf   : > { %1247 = vmatmul.f32.gmra.mxu1 %v3020_v45 }
 0x1c0   : > { %1377 = vmatmul.f32.gmra.mxu3 %v2669_v22  ;;  %v1053_v54 = vpop.f32.mrf.mxu2 }
 0x1c1   : > { %v1054_v61 = vadd.f32 %v1053_v54, %v989_v47 }
 0x1c2   : > { %v926_v4 = vpop.f32.mrf.mxu0 }
 0x1c3   : > { %v927_v5 = vadd.f32 %v926_v4, %v2838_v44  ;;  %v1118_v22 = vpop.f32.mrf.mxu3  ;;  %v751_v4 = vld [vmem:[%s2400_s30 + $0x218] sm:$0xff] }
 0x1c4   : > { %v3036_v13 = vadd.f32 %v1118_v22, %v1054_v61  ;;  %v991_v3 = vpop.f32.mrf.mxu1  ;;  %v815_v61 = vld [vmem:[%s2400_s30 + $0x418] sm:$0xff]  ;;  %1416 = vmatpush.msra.mxu0 %v751_v4 }
 0x1c5   : > { %v992_v19 = vadd.f32 %v991_v3, %v927_v5  ;;  %1185 = vmatmul.f32.gmra.mxu0 %v3033_v20  ;;  %1315 = vmatmul.f32.gmra.mxu2 %v2683_v28  ;;  %v3054_v28 = vld [vmem:[%s3492_s0 + $0x200] sm:$0xff]  ;;  %v847_v5 = vld [vmem:[%s2400_s30 + $0x518] sm:$0xff] }
 0x1c6   : > { %1546 = vmatpush.msra.mxu2 %v815_v61  ;;  %1611 = vmatpush.msra.mxu3 %v847_v5  ;;  %v783_v3 = vld [vmem:[%s2400_s30 + $0x318] sm:$0xff] }
 0x1c7   : > { %1250 = vmatmul.f32.gmra.mxu1 %v3041_v16 }
 0x1c8   : > { %1380 = vmatmul.f32.gmra.mxu3 %v2691_v31  ;;  %v1056_v25 = vpop.f32.mrf.mxu2  ;;  %1481 = vmatpush.msra.mxu1 %v783_v3 }
 0x1c9   : > { %v1057_v58 = vadd.f32 %v1056_v25, %v992_v19  ;;  %1547 = vmatpush.msra.mxu2 %v813_v12 }
 0x1ca   : > { %v929_v18 = vpop.f32.mrf.mxu0 }
 0x1cb   : > { %v930_v47 = vadd.f32 %v929_v18, %v2838_v44  ;;  %v1121_v31 = vpop.f32.mrf.mxu3 }
 0x1cc   : > { %v3057_v51 = vadd.f32 %v1121_v31, %v1057_v58  ;;  %v994_v54 = vpop.f32.mrf.mxu1  ;;  %v845_v31 = vld [vmem:[%s2400_s30 + $0x508] sm:$0xff] }
 0x1cd   : > { %v995_v59 = vadd.f32 %v994_v54, %v930_v47  ;;  %1188 = vmatmul.f32.gmra.mxu0 %v3054_v28  ;;  %1318 = vmatmul.f32.gmra.mxu2 %v2705_v38  ;;  %v3075_v38 = vld [vmem:[%s3492_s0 + $0x230] sm:$0xff]  ;;  %v749_v47 = vld [vmem:[%s2400_s30 + $0x208] sm:$0xff] }
 0x1ce   : > { %1417 = vmatpush.msra.mxu0 %v749_v47  ;;  %1612 = vmatpush.msra.mxu3 %v845_v31 }
 0x1cf   : > { %1253 = vmatmul.f32.gmra.mxu1 %v3062_v55 }
 0x1d0   : > { %1383 = vmatmul.f32.gmra.mxu3 %v2713_v41  ;;  %v1059_v0 = vpop.f32.mrf.mxu2 }
 0x1d1   : > { %v1060_v22 = vadd.f32 %v1059_v0, %v995_v59  ;;  %v781_v59 = vld [vmem:[%s2400_s30 + $0x308] sm:$0xff]  ;;  %v3096_v0 = vld [vmem:[%s3492_s0 + $0x260] sm:$0xff] }
 0x1d2   : > { %v932_v19 = vpop.f32.mrf.mxu0  ;;  %1482 = vmatpush.msra.mxu1 %v781_v59 }
 0x1d3   : > { %v933_v23 = vadd.f32 %v932_v19, %v2838_v44  ;;  %v1124_v41 = vpop.f32.mrf.mxu3 }
 0x1d4   : > { %v3078_v25 = vadd.f32 %v1124_v41, %v1060_v22  ;;  %v997_v26 = vpop.f32.mrf.mxu1  ;;  %v3104_v22 = vld [vmem:[%s3492_s0 + $0x268] sm:$0xff] }
 0x1d5   : > { %v998_v58 = vadd.f32 %v997_v26, %v933_v23  ;;  %1191 = vmatmul.f32.gmra.mxu0 %v3075_v38  ;;  %1321 = vmatmul.f32.gmra.mxu2 %v2727_v49  ;;  %v3113_v26 = vld [vmem:[%s3492_s0 + $0x290] sm:$0xff] }
 0x1d7   : > { %1256 = vmatmul.f32.gmra.mxu1 %v3083_v27 }
 0x1d8   : > { %1386 = vmatmul.f32.gmra.mxu3 %v2735_v52  ;;  %v1062_v18 = vpop.f32.mrf.mxu2 }
 0x1d9   : > { %v1063_v54 = vadd.f32 %v1062_v18, %v998_v58 }
 0x1da   : > { %v935_v61 = vpop.f32.mrf.mxu0 }
 0x1db   : > { %v936_v49 = vadd.f32 %v935_v61, %v2838_v44  ;;  %v1127_v4 = vpop.f32.mrf.mxu3  ;;  %v3130_v61 = vld [vmem:[%s3492_s0 + $0x2c0] sm:$0xff] }
 0x1dc   : > { %v3099_v5 = vadd.f32 %v1127_v4, %v1063_v54  ;;  %v1000_v52 = vpop.f32.mrf.mxu1 }
 0x1dd   : > { %v1001_v3 = vadd.f32 %v1000_v52, %v936_v49  ;;  %1194 = vmatmul.f32.gmra.mxu0 %v3096_v0  ;;  %1324 = vmatmul.f32.gmra.mxu2 %v2749_v60  ;;  %v3121_v60 = vld [vmem:[%s3492_s0 + $0x298] sm:$0xff] }
 0x1df   : > { %1259 = vmatmul.f32.gmra.mxu1 %v3104_v22 }
 0x1e0   : > { %1389 = vmatmul.f32.gmra.mxu3 %v2757_v63  ;;  %v1065_v19 = vpop.f32.mrf.mxu2 }
 0x1e1   : > { %v1066_v23 = vadd.f32 %v1065_v19, %v1001_v3 }
 0x1e2   : > { %v938_v41 = vpop.f32.mrf.mxu0 }
 0x1e3   : > { %v939_v58 = vadd.f32 %v938_v41, %v2838_v44  ;;  %v1130_v12 = vpop.f32.mrf.mxu3 }
 0x1e4   : > { %v3116_v18 = vadd.f32 %v1130_v12, %v1066_v23  ;;  %v1003_v47 = vpop.f32.mrf.mxu1 }
 0x1e5   : > { %v1004_v63 = vadd.f32 %v1003_v47, %v939_v58  ;;  %1197 = vmatmul.f32.gmra.mxu0 %v3113_v26  ;;  %1327 = vmatmul.f32.gmra.mxu2 %v2771_v8  ;;  %v3138_v8 = vld [vmem:[%s3492_s0 + $0x2c8] sm:$0xff]  ;;  %v3147_v58 = vld [vmem:[%s3492_s0 + $0x2f0] sm:$0xff] }
 0x1e7   : > { %1262 = vmatmul.f32.gmra.mxu1 %v3121_v60 }
 0x1e8   : > { %1392 = vmatmul.f32.gmra.mxu3 %v2779_v11  ;;  %v1068_v31 = vpop.f32.mrf.mxu2 }
 0x1e9   : > { %v1069_v54 = vadd.f32 %v1068_v31, %v1004_v63 }
 0x1ea   : > { %v941_v59 = vpop.f32.mrf.mxu0 }
 0x1eb   : > { %v942_v49 = vadd.f32 %v941_v59, %v2838_v44  ;;  %v1133_v4 = vpop.f32.mrf.mxu3 }
 0x1ec   : > { %v3133_v52 = vadd.f32 %v1133_v4, %v1069_v54  ;;  %v1006_v3 = vpop.f32.mrf.mxu1 }
 0x1ed   : > { %v1007_v11 = vadd.f32 %v1006_v3, %v942_v49  ;;  %1200 = vmatmul.f32.gmra.mxu0 %v3130_v61  ;;  %1330 = vmatmul.f32.gmra.mxu2 %v2794_v21  ;;  %v3155_v21 = vld [vmem:[%s3492_s0 + $0x2f8] sm:$0xff] }
 0x1ef   : > { %1265 = vmatmul.f32.gmra.mxu1 %v3138_v8 }
 0x1f0   : > { %1395 = vmatmul.f32.gmra.mxu3 %v2802_v24  ;;  %v1071_v19 = vpop.f32.mrf.mxu2 }
 0x1f1   : > { %v1072_v23 = vadd.f32 %v1071_v19, %v1007_v11 }
 0x1f2   : > { %v944_v41 = vpop.f32.mrf.mxu0 }
 0x1f3   : > { %v945_v12 = vadd.f32 %v944_v41, %v2838_v44  ;;  %v1136_v47 = vpop.f32.mrf.mxu3 }
 0x1f4   : > { %v3150_v63 = vadd.f32 %v1136_v47, %v1072_v23  ;;  %v1009_v31 = vpop.f32.mrf.mxu1 }
 0x1f5   : > { %v1010_v24 = vadd.f32 %v1009_v31, %v945_v12  ;;  %1203 = vmatmul.f32.gmra.mxu0 %v3147_v58  ;;  %1333 = vmatmul.f32.gmra.mxu2 %v2819_v33  ;;  %v1890_v33 = vld [vmem:[%s3492_s0 + $0x10] sm:$0xff] }
 0x1f7   : > { %1268 = vmatmul.f32.gmra.mxu1 %v3155_v21 }
 0x1f8   : > { %1398 = vmatmul.f32.gmra.mxu3 %v2827_v36  ;;  %v1074_v54 = vpop.f32.mrf.mxu2  ;;  %v3171_v36 = vperm.slane %v2829_v37, 1 }
 0x1f9   : > { %v1075_v44 = vadd.f32 %v1074_v54, %v1010_v24  ;;  %v1892_v54 = vld [vmem:[%s3492_s0 + $0x40] sm:$0xff] }
 0x1fa   : > { %v1159_v59 = vpop.f32.mrf.mxu0 }
 0x1fb   : > { %v1139_v49 = vpop.f32.mrf.mxu3  ;;  %v1160_v4 = vadd.f32 %v1159_v59, %v2868_v15  ;;  %v1891_v15 = vld [vmem:[%s3492_s0 + $0x18] sm:$0xff] }
 0x1fc   : > { %v3164_v3 = vadd.f32 %v1139_v49, %v1075_v44  ;;  %v1224_v11 = vpop.f32.mrf.mxu1 }
 0x1fd   : > { %v1225_v19 = vadd.f32 %v1224_v11, %v1160_v4  ;;  %1418 = vmatmul.f32.vlgmr.msra.gmra.mxu0 %v1890_v33  ;;  %1548 = vmatmul.f32.vlgmr.msra.gmra.mxu2 %v2846_v53  ;;  %v1894_v33 = vld [vmem:[%s3492_s0 + $0x70] sm:$0xff] }
 0x1ff   : > { %1662 = vst [vmem:[%s3173_s12] sm:$0xff] %v1225_v19  ;;  %1483 = vmatmul.f32.vlgmr.msra.gmra.mxu1 %v1891_v15 }
 0x200   : > { %1613 = vmatmul.f32.vlgmr.msra.gmra.mxu3 %v2852_v57  ;;  %v1289_v23 = vpop.f32.mrf.mxu2  ;;  %v1893_v57 = vld [vmem:[%s3492_s0 + $0x48] sm:$0xff] }
 0x201   : > { %v1290_v41 = vadd.f32 %v1289_v23, %v3171_v36 }
 0x202   : > { %v1162_v12 = vpop.f32.mrf.mxu0 }
 0x203   : > { %v1163_v53 = vadd.f32 %v1162_v12, %v2889_v43  ;;  %v1354_v37 = vpop.f32.mrf.mxu3 }
 0x204   : > { %v3182_v47 = vadd.f32 %v1354_v37, %v1290_v41  ;;  %v1227_v31 = vpop.f32.mrf.mxu1 }
 0x205   : > { %v1228_v24 = vadd.f32 %v1227_v31, %v1163_v53  ;;  %1421 = vmatmul.f32.gmra.mxu0 %v1892_v54  ;;  %1551 = vmatmul.f32.gmra.mxu2 %v2865_v62  ;;  %v1896_v31 = vld [vmem:[%s3492_s0 + $0xa0] sm:$0xff] }
 0x207   : > { %1664 = vst [vmem:[%s3173_s12 + $0x10] sm:$0xff] %v1228_v24  ;;  %1486 = vmatmul.f32.gmra.mxu1 %v1893_v57 }
 0x208   : > { %1616 = vmatmul.f32.gmra.mxu3 %v2873_v17  ;;  %v1292_v43 = vpop.f32.mrf.mxu2  ;;  %v1895_v17 = vld [vmem:[%s3492_s0 + $0x78] sm:$0xff] }
 0x209   : > { %v1293_v44 = vadd.f32 %v1292_v43, %v3171_v36 }
 0x20a   : > { %v1165_v59 = vpop.f32.mrf.mxu0 }
 0x20b   : > { %v1166_v49 = vadd.f32 %v1165_v59, %v2910_v6  ;;  %v1357_v4 = vpop.f32.mrf.mxu3 }
 0x20c   : > { %v3195_v11 = vadd.f32 %v1357_v4, %v1293_v44  ;;  %v1230_v19 = vpop.f32.mrf.mxu1 }
 0x20d   : > { %v1231_v62 = vadd.f32 %v1230_v19, %v1166_v49  ;;  %1424 = vmatmul.f32.gmra.mxu0 %v1894_v33  ;;  %1554 = vmatmul.f32.gmra.mxu2 %v2886_v14  ;;  %v1898_v49 = vld [vmem:[%s3492_s0 + $0xd0] sm:$0xff] }
 0x20f   : > { %1666 = vst [vmem:[%s3173_s12 + $0x20] sm:$0xff] %v1231_v62  ;;  %1489 = vmatmul.f32.gmra.mxu1 %v1895_v17 }
 0x210   : > { %1619 = vmatmul.f32.gmra.mxu3 %v2894_v46  ;;  %v1295_v6 = vpop.f32.mrf.mxu2  ;;  %v1897_v46 = vld [vmem:[%s3492_s0 + $0xa8] sm:$0xff] }
 0x211   : > { %v1296_v15 = vadd.f32 %v1295_v6, %v3171_v36 }
 0x212   : > { %v1168_v23 = vpop.f32.mrf.mxu0 }
 0x213   : > { %v1169_v41 = vadd.f32 %v1168_v23, %v2931_v32  ;;  %v1360_v12 = vpop.f32.mrf.mxu3 }
 0x214   : > { %v3208_v53 = vadd.f32 %v1360_v12, %v1296_v15  ;;  %v1233_v37 = vpop.f32.mrf.mxu1  ;;  %v1900_v15 = vld [vmem:[%s3492_s0 + $0x100] sm:$0xff] }
 0x215   : > { %v1234_v14 = vadd.f32 %v1233_v37, %v1169_v41  ;;  %1427 = vmatmul.f32.gmra.mxu0 %v1896_v31  ;;  %1557 = vmatmul.f32.gmra.mxu2 %v2907_v30 }
 0x217   : > { %1668 = vst [vmem:[%s3173_s12 + $0x30] sm:$0xff] %v1234_v14  ;;  %1492 = vmatmul.f32.gmra.mxu1 %v1897_v46  ;;  %v1902_v46 = vld [vmem:[%s3492_s0 + $0x130] sm:$0xff] }
 0x218   : > { %1622 = vmatmul.f32.gmra.mxu3 %v2915_v9  ;;  %v1298_v32 = vpop.f32.mrf.mxu2  ;;  %v1899_v9 = vld [vmem:[%s3492_s0 + $0xd8] sm:$0xff] }
 0x219   : > { %v1299_v24 = vadd.f32 %v1298_v32, %v3171_v36 }
 0x21a   : > { %v1171_v54 = vpop.f32.mrf.mxu0 }
 0x21b   : > { %v1172_v57 = vadd.f32 %v1171_v54, %v2952_v2  ;;  %v1363_v43 = vpop.f32.mrf.mxu3 }
 0x21c   : > { %v3221_v44 = vadd.f32 %v1363_v43, %v1299_v24  ;;  %v1236_v59 = vpop.f32.mrf.mxu1 }
 0x21d   : > { %v1237_v30 = vadd.f32 %v1236_v59, %v1172_v57  ;;  %1430 = vmatmul.f32.gmra.mxu0 %v1898_v49  ;;  %1560 = vmatmul.f32.gmra.mxu2 %v2928_v40 }
 0x21f   : > { %1670 = vst [vmem:[%s3173_s12 + $0x40] sm:$0xff] %v1237_v30  ;;  %1495 = vmatmul.f32.gmra.mxu1 %v1899_v9  ;;  %v1904_v30 = vld [vmem:[%s3492_s0 + $0x160] sm:$0xff] }
 0x220   : > { %1625 = vmatmul.f32.gmra.mxu3 %v2936_v39  ;;  %v1301_v2 = vpop.f32.mrf.mxu2  ;;  %v1901_v39 = vld [vmem:[%s3492_s0 + $0x108] sm:$0xff] }
 0x221   : > { %v1302_v4 = vadd.f32 %v1301_v2, %v3171_v36 }
 0x222   : > { %v1174_v19 = vpop.f32.mrf.mxu0 }
 0x223   : > { %v1175_v62 = vadd.f32 %v1174_v19, %v2973_v29  ;;  %v1366_v33 = vpop.f32.mrf.mxu3 }
 0x224   : > { %v3234_v17 = vadd.f32 %v1366_v33, %v1302_v4  ;;  %v1239_v6 = vpop.f32.mrf.mxu1  ;;  %v1906_v33 = vld [vmem:[%s3492_s0 + $0x190] sm:$0xff] }
 0x225   : > { %v1240_v40 = vadd.f32 %v1239_v6, %v1175_v62  ;;  %1433 = vmatmul.f32.gmra.mxu0 %v1900_v15  ;;  %1563 = vmatmul.f32.gmra.mxu2 %v2949_v48 }
 0x227   : > { %1672 = vst [vmem:[%s3173_s12 + $0x50] sm:$0xff] %v1240_v40  ;;  %1498 = vmatmul.f32.gmra.mxu1 %v1901_v39 }
 0x228   : > { %1628 = vmatmul.f32.gmra.mxu3 %v2957_v34  ;;  %v1304_v29 = vpop.f32.mrf.mxu2  ;;  %v1903_v34 = vld [vmem:[%s3492_s0 + $0x138] sm:$0xff] }
 0x229   : > { %v1305_v23 = vadd.f32 %v1304_v29, %v3171_v36 }
 0x22a   : > { %v1177_v41 = vpop.f32.mrf.mxu0 }
 0x22b   : > { %v1178_v12 = vadd.f32 %v1177_v41, %v2994_v50  ;;  %v1369_v37 = vpop.f32.mrf.mxu3  ;;  %v1908_v41 = vld [vmem:[%s3492_s0 + $0x1c0] sm:$0xff] }
 0x22c   : > { %v3247_v14 = vadd.f32 %v1369_v37, %v1305_v23  ;;  %v1242_v31 = vpop.f32.mrf.mxu1 }
 0x22d   : > { %v1243_v48 = vadd.f32 %v1242_v31, %v1178_v12  ;;  %1436 = vmatmul.f32.gmra.mxu0 %v1902_v46  ;;  %1566 = vmatmul.f32.gmra.mxu2 %v2970_v56 }
 0x22f   : > { %1674 = vst [vmem:[%s3173_s12 + $0x60] sm:$0xff] %v1243_v48  ;;  %1501 = vmatmul.f32.gmra.mxu1 %v1903_v34 }
 0x230   : > { %1631 = vmatmul.f32.gmra.mxu3 %v2978_v35  ;;  %v1307_v50 = vpop.f32.mrf.mxu2  ;;  %v1905_v35 = vld [vmem:[%s3492_s0 + $0x168] sm:$0xff] }
 0x231   : > { %v1308_v32 = vadd.f32 %v1307_v50, %v3171_v36  ;;  %v1910_v50 = vld [vmem:[%s3492_s0 + $0x1f0] sm:$0xff] }
 0x232   : > { %v1180_v24 = vpop.f32.mrf.mxu0 }
 0x233   : > { %v1181_v54 = vadd.f32 %v1180_v24, %v3015_v42  ;;  %v1372_v57 = vpop.f32.mrf.mxu3 }
 0x234   : > { %v3260_v43 = vadd.f32 %v1372_v57, %v1308_v32  ;;  %v1245_v59 = vpop.f32.mrf.mxu1 }
 0x235   : > { %v1246_v56 = vadd.f32 %v1245_v59, %v1181_v54  ;;  %1439 = vmatmul.f32.gmra.mxu0 %v1904_v30  ;;  %1569 = vmatmul.f32.gmra.mxu2 %v2991_v1  ;;  %v1912_v30 = vld [vmem:[%s3492_s0 + $0x220] sm:$0xff] }
 0x237   : > { %1676 = vst [vmem:[%s3173_s12 + $0x70] sm:$0xff] %v1246_v56  ;;  %1504 = vmatmul.f32.gmra.mxu1 %v1905_v35 }
 0x238   : > { %1634 = vmatmul.f32.gmra.mxu3 %v2999_v7  ;;  %v1310_v42 = vpop.f32.mrf.mxu2  ;;  %v1907_v7 = vld [vmem:[%s3492_s0 + $0x198] sm:$0xff] }
 0x239   : > { %v1311_v49 = vadd.f32 %v1310_v42, %v3171_v36 }
 0x23a   : > { %v1183_v9 = vpop.f32.mrf.mxu0 }
 0x23b   : > { %v1184_v2 = vadd.f32 %v1183_v9, %v3036_v13  ;;  %v1375_v4 = vpop.f32.mrf.mxu3 }
 0x23c   : > { %v3273_v19 = vadd.f32 %v1375_v4, %v1311_v49  ;;  %v1248_v62 = vpop.f32.mrf.mxu1 }
 0x23d   : > { %v1249_v1 = vadd.f32 %v1248_v62, %v1184_v2  ;;  %1442 = vmatmul.f32.gmra.mxu0 %v1906_v33  ;;  %1572 = vmatmul.f32.gmra.mxu2 %v3012_v10  ;;  %v1914_v62 = vld [vmem:[%s3492_s0 + $0x250] sm:$0xff] }
 0x23f   : > { %1678 = vst [vmem:[%s3173_s12 + $0x80] sm:$0xff] %v1249_v1  ;;  %1507 = vmatmul.f32.gmra.mxu1 %v1907_v7 }
 0x240   : > { %1637 = vmatmul.f32.gmra.mxu3 %v3020_v45  ;;  %v1313_v13 = vpop.f32.mrf.mxu2  ;;  %v1909_v45 = vld [vmem:[%s3492_s0 + $0x1c8] sm:$0xff] }
 0x241   : > { %v1314_v6 = vadd.f32 %v1313_v13, %v3171_v36 }
 0x242   : > { %v1186_v40 = vpop.f32.mrf.mxu0 }
 0x243   : > { %v1187_v15 = vadd.f32 %v1186_v40, %v3057_v51  ;;  %v1378_v39 = vpop.f32.mrf.mxu3 }
 0x244   : > { %v3286_v29 = vadd.f32 %v1378_v39, %v1314_v6  ;;  %v1251_v23 = vpop.f32.mrf.mxu1 }
 0x245   : > { %v1252_v10 = vadd.f32 %v1251_v23, %v1187_v15  ;;  %1445 = vmatmul.f32.gmra.mxu0 %v1908_v41  ;;  %1575 = vmatmul.f32.gmra.mxu2 %v3033_v20  ;;  %v1916_v15 = vld [vmem:[%s3492_s0 + $0x280] sm:$0xff] }
 0x247   : > { %1680 = vst [vmem:[%s3173_s12 + $0x90] sm:$0xff] %v1252_v10  ;;  %1510 = vmatmul.f32.gmra.mxu1 %v1909_v45 }
 0x248   : > { %1640 = vmatmul.f32.gmra.mxu3 %v3041_v16  ;;  %v1316_v51 = vpop.f32.mrf.mxu2  ;;  %v1911_v16 = vld [vmem:[%s3492_s0 + $0x1f8] sm:$0xff] }
 0x249   : > { %v1317_v12 = vadd.f32 %v1316_v51, %v3171_v36 }
 0x24a   : > { %v1189_v37 = vpop.f32.mrf.mxu0 }
 0x24b   : > { %v1190_v31 = vadd.f32 %v1189_v37, %v3078_v25  ;;  %v1381_v48 = vpop.f32.mrf.mxu3 }
 0x24c   : > { %v3299_v46 = vadd.f32 %v1381_v48, %v1317_v12  ;;  %v1254_v34 = vpop.f32.mrf.mxu1  ;;  %v1918_v12 = vld [vmem:[%s3492_s0 + $0x2b0] sm:$0xff] }
 0x24d   : > { %v1255_v20 = vadd.f32 %v1254_v34, %v1190_v31  ;;  %1448 = vmatmul.f32.gmra.mxu0 %v1910_v50  ;;  %1578 = vmatmul.f32.gmra.mxu2 %v3054_v28 }
 0x24f   : > { %1682 = vst [vmem:[%s3173_s12 + $0xa0] sm:$0xff] %v1255_v20  ;;  %1513 = vmatmul.f32.gmra.mxu1 %v1911_v16  ;;  %v1920_v16 = vld [vmem:[%s3492_s0 + $0x2e0] sm:$0xff] }
 0x250   : > { %1643 = vmatmul.f32.gmra.mxu3 %v3062_v55  ;;  %v1319_v25 = vpop.f32.mrf.mxu2  ;;  %v1913_v55 = vld [vmem:[%s3492_s0 + $0x228] sm:$0xff] }
 0x251   : > { %v1320_v32 = vadd.f32 %v1319_v25, %v3171_v36 }
 0x252   : > { %v1192_v24 = vpop.f32.mrf.mxu0 }
 0x253   : > { %v1193_v54 = vadd.f32 %v1192_v24, %v3099_v5  ;;  %v1384_v57 = vpop.f32.mrf.mxu3 }
 0x254   : > { %v3312_v59 = vadd.f32 %v1384_v57, %v1320_v32  ;;  %v1257_v56 = vpop.f32.mrf.mxu1 }
 0x255   : > { %v1258_v28 = vadd.f32 %v1257_v56, %v1193_v54  ;;  %1451 = vmatmul.f32.gmra.mxu0 %v1912_v30  ;;  %1581 = vmatmul.f32.gmra.mxu2 %v3075_v38 }
 0x257   : > { %1684 = vst [vmem:[%s3173_s12 + $0xb0] sm:$0xff] %v1258_v28  ;;  %1516 = vmatmul.f32.gmra.mxu1 %v1913_v55 }
 0x258   : > { %1646 = vmatmul.f32.gmra.mxu3 %v3083_v27  ;;  %v1322_v5 = vpop.f32.mrf.mxu2  ;;  %v1915_v27 = vld [vmem:[%s3492_s0 + $0x258] sm:$0xff] }
 0x259   : > { %v1323_v35 = vadd.f32 %v1322_v5, %v3171_v36 }
 0x25a   : > { %v1195_v42 = vpop.f32.mrf.mxu0 }
 0x25b   : > { %v1196_v49 = vadd.f32 %v1195_v42, %v3116_v18  ;;  %v1387_v9 = vpop.f32.mrf.mxu3 }
 0x25c   : > { %v3325_v2 = vadd.f32 %v1387_v9, %v1323_v35  ;;  %v1260_v4 = vpop.f32.mrf.mxu1 }
 0x25d   : > { %v1261_v38 = vadd.f32 %v1260_v4, %v1196_v49  ;;  %1454 = vmatmul.f32.gmra.mxu0 %v1914_v62  ;;  %1584 = vmatmul.f32.gmra.mxu2 %v3096_v0 }
 0x25f   : > { %1686 = vst [vmem:[%s3173_s12 + $0xc0] sm:$0xff] %v1261_v38  ;;  %1519 = vmatmul.f32.gmra.mxu1 %v1915_v27 }
 0x260   : > { %1649 = vmatmul.f32.gmra.mxu3 %v3104_v22  ;;  %v1325_v18 = vpop.f32.mrf.mxu2  ;;  %v1917_v22 = vld [vmem:[%s3492_s0 + $0x288] sm:$0xff] }
 0x261   : > { %v1326_v1 = vadd.f32 %v1325_v18, %v3171_v36 }
 0x262   : > { %v1198_v33 = vpop.f32.mrf.mxu0 }
 0x263   : > { %v1199_v7 = vadd.f32 %v1198_v33, %v3133_v52  ;;  %v1390_v13 = vpop.f32.mrf.mxu3 }
 0x264   : > { %v3338_v6 = vadd.f32 %v1390_v13, %v1326_v1  ;;  %v1263_v40 = vpop.f32.mrf.mxu1 }
 0x265   : > { %v1264_v0 = vadd.f32 %v1263_v40, %v1199_v7  ;;  %1457 = vmatmul.f32.gmra.mxu0 %v1916_v15  ;;  %1587 = vmatmul.f32.gmra.mxu2 %v3113_v26 }
 0x267   : > { %1688 = vst [vmem:[%s3173_s12 + $0xd0] sm:$0xff] %v1264_v0  ;;  %1522 = vmatmul.f32.gmra.mxu1 %v1917_v22 }
 0x268   : > { %1652 = vmatmul.f32.gmra.mxu3 %v3121_v60  ;;  %v1328_v52 = vpop.f32.mrf.mxu2  ;;  %v1919_v60 = vld [vmem:[%s3492_s0 + $0x2b8] sm:$0xff] }
 0x269   : > { %v1329_v39 = vadd.f32 %v1328_v52, %v3171_v36 }
 0x26a   : > { %v1201_v23 = vpop.f32.mrf.mxu0 }
 0x26b   : > { %v1202_v10 = vadd.f32 %v1201_v23, %v3150_v63  ;;  %v1393_v41 = vpop.f32.mrf.mxu3 }
 0x26c   : > { %v3351_v45 = vadd.f32 %v1393_v41, %v1329_v39  ;;  %v1266_v51 = vpop.f32.mrf.mxu1 }
 0x26d   : > { %v1267_v26 = vadd.f32 %v1266_v51, %v1202_v10  ;;  %1460 = vmatmul.f32.gmra.mxu0 %v1918_v12  ;;  %1590 = vmatmul.f32.gmra.mxu2 %v3130_v61 }
 0x26f   : > { %1690 = vst [vmem:[%s3173_s12 + $0xe0] sm:$0xff] %v1267_v26  ;;  %1525 = vmatmul.f32.gmra.mxu1 %v1919_v60 }
 0x270   : > { %1655 = vmatmul.f32.gmra.mxu3 %v3138_v8  ;;  %v1331_v63 = vpop.f32.mrf.mxu2  ;;  %v1921_v8 = vld [vmem:[%s3492_s0 + $0x2e8] sm:$0xff] }
 0x271   : > { %v1332_v37 = vadd.f32 %v1331_v63, %v3171_v36 }
 0x272   : > { %v1204_v31 = vpop.f32.mrf.mxu0 }
 0x273   : > { %v1205_v48 = vadd.f32 %v1204_v31, %v3164_v3  ;;  %v1396_v34 = vpop.f32.mrf.mxu3 }
 0x274   : > { %v3364_v20 = vadd.f32 %v1396_v34, %v1332_v37  ;;  %v1269_v50 = vpop.f32.mrf.mxu1 }
 0x275   : > { %v1270_v61 = vadd.f32 %v1269_v50, %v1205_v48  ;;  %1463 = vmatmul.f32.gmra.mxu0 %v1920_v16  ;;  %1593 = vmatmul.f32.gmra.mxu2 %v3147_v58 }
 0x277   : > { %1692 = vst [vmem:[%s3173_s12 + $0xf0] sm:$0xff] %v1270_v61  ;;  %1528 = vmatmul.f32.gmra.mxu1 %v1921_v8 }
 0x278   : > { %1658 = vmatmul.f32.gmra.mxu3 %v3155_v21  ;;  %v1334_v3 = vpop.f32.mrf.mxu2 }
 0x279   : > { %v1335_v25 = vadd.f32 %v1334_v3, %v3171_v36 }
 0x27a   : > { %v1419_v32 = vpop.f32.mrf.mxu0 }
 0x27b   : > { %v1399_v24 = vpop.f32.mrf.mxu3  ;;  %v1420_v54 = vadd.f32 %v1419_v32, %v3182_v47 }
 0x27c   : > { %v3377_v57 = vadd.f32 %v1399_v24, %v1335_v25  ;;  %v1484_v56 = vpop.f32.mrf.mxu1 }
 0x27d   : > { %v1485_v58 = vadd.f32 %v1484_v56, %v1420_v54 }
 0x280   : > { %v1549_v28 = vpop.f32.mrf.mxu2 }
 0x281   : > { %v1550_v30 = vadd.f32 %v1549_v28, %v1485_v58 }
 0x282   : > { %v1422_v55 = vpop.f32.mrf.mxu0 }
 0x283   : > { %v1423_v5 = vadd.f32 %v1422_v55, %v3195_v11  ;;  %v1614_v35 = vpop.f32.mrf.mxu3 }
 0x284   : > { %v1615_v21 = vadd.f32 %v1614_v35, %v1550_v30  ;;  %v1487_v42 = vpop.f32.mrf.mxu1 }
 0x285   : > { %v1488_v49 = vadd.f32 %v1487_v42, %v1423_v5 }
 0x286   : > { %1663 = vst [vmem:[%s3173_s12 + $0x8] sm:$0xff] %v1615_v21 }
 0x288   : > { %v1552_v36 = vpop.f32.mrf.mxu2 }
 0x289   : > { %v1553_v9 = vadd.f32 %v1552_v36, %v1488_v49 }
 0x28a   : > { %v1425_v4 = vpop.f32.mrf.mxu0 }
 0x28b   : > { %v1426_v47 = vadd.f32 %v1425_v4, %v3208_v53  ;;  %v1617_v38 = vpop.f32.mrf.mxu3 }
 0x28c   : > { %v1618_v62 = vadd.f32 %v1617_v38, %v1553_v9  ;;  %v1490_v27 = vpop.f32.mrf.mxu1 }
 0x28d   : > { %v1491_v18 = vadd.f32 %v1490_v27, %v1426_v47 }
 0x28e   : > { %1665 = vst [vmem:[%s3173_s12 + $0x18] sm:$0xff] %v1618_v62 }
 0x290   : > { %v1555_v1 = vpop.f32.mrf.mxu2 }
 0x291   : > { %v1556_v33 = vadd.f32 %v1555_v1, %v1491_v18 }
 0x292   : > { %v1428_v11 = vpop.f32.mrf.mxu0 }
 0x293   : > { %v1429_v7 = vadd.f32 %v1428_v11, %v3221_v44  ;;  %v1620_v13 = vpop.f32.mrf.mxu3 }
 0x294   : > { %v1621_v40 = vadd.f32 %v1620_v13, %v1556_v33  ;;  %v1493_v0 = vpop.f32.mrf.mxu1 }
 0x295   : > { %v1494_v15 = vadd.f32 %v1493_v0, %v1429_v7 }
 0x296   : > { %1667 = vst [vmem:[%s3173_s12 + $0x28] sm:$0xff] %v1621_v40 }
 0x298   : > { %v1558_v22 = vpop.f32.mrf.mxu2 }
 0x299   : > { %v1559_v52 = vadd.f32 %v1558_v22, %v1494_v15 }
 0x29a   : > { %v1431_v53 = vpop.f32.mrf.mxu0 }
 0x29b   : > { %v1432_v39 = vadd.f32 %v1431_v53, %v3234_v17  ;;  %v1623_v23 = vpop.f32.mrf.mxu3 }
 0x29c   : > { %v1624_v10 = vadd.f32 %v1623_v23, %v1559_v52  ;;  %v1496_v41 = vpop.f32.mrf.mxu1 }
 0x29d   : > { %v1497_v51 = vadd.f32 %v1496_v41, %v1432_v39 }
 0x29e   : > { %1669 = vst [vmem:[%s3173_s12 + $0x38] sm:$0xff] %v1624_v10 }
 0x2a0   : > { %v1561_v26 = vpop.f32.mrf.mxu2 }
 0x2a1   : > { %v1562_v12 = vadd.f32 %v1561_v26, %v1497_v51 }
 0x2a2   : > { %v1434_v44 = vpop.f32.mrf.mxu0 }
 0x2a3   : > { %v1435_v60 = vadd.f32 %v1434_v44, %v3247_v14  ;;  %v1626_v63 = vpop.f32.mrf.mxu3 }
 0x2a4   : > { %v1627_v37 = vadd.f32 %v1626_v63, %v1562_v12  ;;  %v1499_v31 = vpop.f32.mrf.mxu1 }
 0x2a5   : > { %v1500_v48 = vadd.f32 %v1499_v31, %v1435_v60 }
 0x2a6   : > { %1671 = vst [vmem:[%s3173_s12 + $0x48] sm:$0xff] %v1627_v37 }
 0x2a8   : > { %v1564_v34 = vpop.f32.mrf.mxu2 }
 0x2a9   : > { %v1565_v50 = vadd.f32 %v1564_v34, %v1500_v48 }
 0x2aa   : > { %v1437_v17 = vpop.f32.mrf.mxu0 }
 0x2ab   : > { %v1438_v61 = vadd.f32 %v1437_v17, %v3260_v43  ;;  %v1629_v16 = vpop.f32.mrf.mxu3 }
 0x2ac   : > { %v1630_v8 = vadd.f32 %v1629_v16, %v1565_v50  ;;  %v1502_v3 = vpop.f32.mrf.mxu1 }
 0x2ad   : > { %v1503_v25 = vadd.f32 %v1502_v3, %v1438_v61 }
 0x2ae   : > { %1673 = vst [vmem:[%s3173_s12 + $0x58] sm:$0xff] %v1630_v8 }
 0x2b0   : > { %v1567_v32 = vpop.f32.mrf.mxu2 }
 0x2b1   : > { %v1568_v24 = vadd.f32 %v1567_v32, %v1503_v25 }
 0x2b2   : > { %v1440_v14 = vpop.f32.mrf.mxu0 }
 0x2b3   : > { %v1441_v54 = vadd.f32 %v1440_v14, %v3273_v19  ;;  %v1632_v56 = vpop.f32.mrf.mxu3 }
 0x2b4   : > { %v1633_v58 = vadd.f32 %v1632_v56, %v1568_v24  ;;  %v1505_v28 = vpop.f32.mrf.mxu1 }
 0x2b5   : > { %v1506_v30 = vadd.f32 %v1505_v28, %v1441_v54 }
 0x2b6   : > { %1675 = vst [vmem:[%s3173_s12 + $0x68] sm:$0xff] %v1633_v58 }
 0x2b8   : > { %v1570_v55 = vpop.f32.mrf.mxu2 }
 0x2b9   : > { %v1571_v5 = vadd.f32 %v1570_v55, %v1506_v30 }
 0x2ba   : > { %v1443_v43 = vpop.f32.mrf.mxu0 }
 0x2bb   : > { %v1444_v35 = vadd.f32 %v1443_v43, %v3286_v29  ;;  %v1635_v21 = vpop.f32.mrf.mxu3 }
 0x2bc   : > { %v1636_v42 = vadd.f32 %v1635_v21, %v1571_v5  ;;  %v1508_v49 = vpop.f32.mrf.mxu1 }
 0x2bd   : > { %v1509_v36 = vadd.f32 %v1508_v49, %v1444_v35  ;;  %v1720_v49 = vld [vmem:[%s3173_s12 + $0x10] sm:$0xff] (%p1997_p5) }
 0x2be   : > { %1677 = vst [vmem:[%s3173_s12 + $0x78] sm:$0xff] %v1636_v42  ;;  %v1718_v42 = vld [vmem:[%s3173_s12 + $0x8] sm:$0xff] (%p1997_p5) }
 0x2bf   : > { %1719 = vst [vmem:[%s3418_s17 + $0x8] sm:$0xff] (%p1997_p5), %v1718_v42 }
 0x2c0   : > { %v1573_v9 = vpop.f32.mrf.mxu2  ;;  %1721 = vst [vmem:[%s3418_s17 + $0x40] sm:$0xff] (%p1997_p5), %v1720_v49 }
 0x2c1   : > { %v1574_v4 = vadd.f32 %v1573_v9, %v1509_v36  ;;  %v1722_v36 = vld [vmem:[%s3173_s12 + $0x18] sm:$0xff] (%p1997_p5)  ;;  %v1724_v9 = vld [vmem:[%s3173_s12 + $0x20] sm:$0xff] (%p1997_p5) }
 0x2c2   : > { %v1446_v19 = vpop.f32.mrf.mxu0  ;;  %1723 = vst [vmem:[%s3418_s17 + $0x48] sm:$0xff] (%p1997_p5), %v1722_v36 }
 0x2c3   : > { %v1447_v47 = vadd.f32 %v1446_v19, %v3299_v46  ;;  %v1638_v38 = vpop.f32.mrf.mxu3  ;;  %v1728_v19 = vld [vmem:[%s3173_s12 + $0x30] sm:$0xff] (%p1997_p5)  ;;  %1725 = vst [vmem:[%s3418_s17 + $0x80] sm:$0xff] (%p1997_p5), %v1724_v9 }
 0x2c4   : > { %v1639_v62 = vadd.f32 %v1638_v38, %v1574_v4  ;;  %v1511_v27 = vpop.f32.mrf.mxu1  ;;  %v1726_v4 = vld [vmem:[%s3173_s12 + $0x28] sm:$0xff] (%p1997_p5)  ;;  %v1732_v38 = vld [vmem:[%s3173_s12 + $0x40] sm:$0xff] (%p1997_p5)  ;;  %1729 = vst [vmem:[%s3418_s17 + $0xc0] sm:$0xff] (%p1997_p5), %v1728_v19 }
 0x2c5   : > { %v1512_v18 = vadd.f32 %v1511_v27, %v1447_v47  ;;  %v1730_v47 = vld [vmem:[%s3173_s12 + $0x38] sm:$0xff] (%p1997_p5)  ;;  %1727 = vst [vmem:[%s3418_s17 + $0x88] sm:$0xff] (%p1997_p5), %v1726_v4  ;;  %v1736_v27 = vld [vmem:[%s3173_s12 + $0x50] sm:$0xff] (%p1997_p5) }
 0x2c6   : > { %1679 = vst [vmem:[%s3173_s12 + $0x88] sm:$0xff] %v1639_v62  ;;  %v1734_v62 = vld [vmem:[%s3173_s12 + $0x48] sm:$0xff] (%p1997_p5) }
 0x2c7   : > { %1731 = vst [vmem:[%s3418_s17 + $0xc8] sm:$0xff] (%p1997_p5), %v1730_v47 }
 0x2c8   : > { %v1576_v1 = vpop.f32.mrf.mxu2  ;;  %1733 = vst [vmem:[%s3418_s17 + $0x100] sm:$0xff] (%p1997_p5), %v1732_v38 }
 0x2c9   : > { %v1577_v33 = vadd.f32 %v1576_v1, %v1512_v18  ;;  %v1738_v18 = vld [vmem:[%s3173_s12 + $0x58] sm:$0xff] (%p1997_p5)  ;;  %1735 = vst [vmem:[%s3418_s17 + $0x108] sm:$0xff] (%p1997_p5), %v1734_v62  ;;  %v1740_v1 = vld [vmem:[%s3173_s12 + $0x60] sm:$0xff] (%p1997_p5) }
 0x2ca   : > { %v1449_v29 = vpop.f32.mrf.mxu0  ;;  %1737 = vst [vmem:[%s3418_s17 + $0x140] sm:$0xff] (%p1997_p5), %v1736_v27 }
 0x2cb   : > { %v1450_v11 = vadd.f32 %v1449_v29, %v3312_v59  ;;  %v1641_v7 = vpop.f32.mrf.mxu3  ;;  %1739 = vst [vmem:[%s3418_s17 + $0x148] sm:$0xff] (%p1997_p5), %v1738_v18  ;;  %v1744_v29 = vld [vmem:[%s3173_s12 + $0x70] sm:$0xff] (%p1997_p5) }
 0x2cc   : > { %v1642_v13 = vadd.f32 %v1641_v7, %v1577_v33  ;;  %v1514_v40 = vpop.f32.mrf.mxu1  ;;  %v1742_v33 = vld [vmem:[%s3173_s12 + $0x68] sm:$0xff] (%p1997_p5)  ;;  %1741 = vst [vmem:[%s3418_s17 + $0x180] sm:$0xff] (%p1997_p5), %v1740_v1  ;;  %v1748_v7 = vld [vmem:[%s3173_s12 + $0x80] sm:$0xff] (%p1997_p5) }
 0x2cd   : > { %v1515_v0 = vadd.f32 %v1514_v40, %v1450_v11  ;;  %v1746_v11 = vld [vmem:[%s3173_s12 + $0x78] sm:$0xff] (%p1997_p5)  ;;  %1743 = vst [vmem:[%s3418_s17 + $0x188] sm:$0xff] (%p1997_p5), %v1742_v33  ;;  %v1752_v40 = vld [vmem:[%s3173_s12 + $0x90] sm:$0xff] (%p1997_p5) }
 0x2ce   : > { %1681 = vst [vmem:[%s3173_s12 + $0x98] sm:$0xff] %v1642_v13  ;;  %v1750_v13 = vld [vmem:[%s3173_s12 + $0x88] sm:$0xff] (%p1997_p5) }
 0x2cf   : > { %1745 = vst [vmem:[%s3418_s17 + $0x1c0] sm:$0xff] (%p1997_p5), %v1744_v29 }
 0x2d0   : > { %v1579_v15 = vpop.f32.mrf.mxu2  ;;  %1747 = vst [vmem:[%s3418_s17 + $0x1c8] sm:$0xff] (%p1997_p5), %v1746_v11 }
 0x2d1   : > { %v1580_v22 = vadd.f32 %v1579_v15, %v1515_v0  ;;  %1749 = vst [vmem:[%s3418_s17 + $0x200] sm:$0xff] (%p1997_p5), %v1748_v7  ;;  %v1756_v15 = vld [vmem:[%s3173_s12 + $0xa0] sm:$0xff] (%p1997_p5) }
 0x2d2   : > { %v1452_v46 = vpop.f32.mrf.mxu0  ;;  %1751 = vst [vmem:[%s3418_s17 + $0x208] sm:$0xff] (%p1997_p5), %v1750_v13 }
 0x2d3   : > { %v1453_v52 = vadd.f32 %v1452_v46, %v3325_v2  ;;  %v1644_v53 = vpop.f32.mrf.mxu3  ;;  %1753 = vst [vmem:[%s3418_s17 + $0x240] sm:$0xff] (%p1997_p5), %v1752_v40  ;;  %v1760_v46 = vld [vmem:[%s3173_s12 + $0xb0] sm:$0xff] (%p1997_p5) }
 0x2d4   : > { %v1645_v39 = vadd.f32 %v1644_v53, %v1580_v22  ;;  %v1517_v23 = vpop.f32.mrf.mxu1  ;;  %1757 = vst [vmem:[%s3418_s17 + $0x280] sm:$0xff] (%p1997_p5), %v1756_v15  ;;  %v1764_v53 = vld [vmem:[%s3173_s12 + $0xc0] sm:$0xff] (%p1997_p5) }
 0x2d5   : > { %v1518_v10 = vadd.f32 %v1517_v23, %v1453_v52  ;;  %v1754_v0 = vld [vmem:[%s3173_s12 + $0x98] sm:$0xff] (%p1997_p5)  ;;  %1761 = vst [vmem:[%s3418_s17 + $0x2c0] sm:$0xff] (%p1997_p5), %v1760_v46  ;;  %v1768_v23 = vld [vmem:[%s3173_s12 + $0xd0] sm:$0xff] (%p1997_p5) }
 0x2d6   : > { %1683 = vst [vmem:[%s3173_s12 + $0xa8] sm:$0xff] %v1645_v39 }
 0x2d7   : > { %1755 = vst [vmem:[%s3418_s17 + $0x248] sm:$0xff] (%p1997_p5), %v1754_v0 }
 0x2d8   : > { %v1582_v41 = vpop.f32.mrf.mxu2  ;;  %1765 = vst [vmem:[%s3418_s17 + $0x300] sm:$0xff] (%p1997_p5), %v1764_v53 }
 0x2d9   : > { %v1583_v51 = vadd.f32 %v1582_v41, %v1518_v10  ;;  %v1772_v41 = vld [vmem:[%s3173_s12 + $0xe0] sm:$0xff] (%p1997_p5)  ;;  %1769 = vst [vmem:[%s3418_s17 + $0x340] sm:$0xff] (%p1997_p5), %v1768_v23 }
 0x2da   : > { %v1455_v59 = vpop.f32.mrf.mxu0  ;;  %1773 = vst [vmem:[%s3418_s17 + $0x380] sm:$0xff] (%p1997_p5), %v1772_v41 }
 0x2db   : > { %v1456_v26 = vadd.f32 %v1455_v59, %v3338_v6  ;;  %v1647_v12 = vpop.f32.mrf.mxu3  ;;  %v1776_v59 = vld [vmem:[%s3173_s12 + $0xf0] sm:$0xff] (%p1997_p5) }
 0x2dc   : > { %v1648_v44 = vadd.f32 %v1647_v12, %v1583_v51  ;;  %v1520_v60 = vpop.f32.mrf.mxu1  ;;  %1777 = vst [vmem:[%s3418_s17 + $0x3c0] sm:$0xff] (%p1997_p5), %v1776_v59 }
 0x2dd   : > { %v1521_v63 = vadd.f32 %v1520_v60, %v1456_v26  ;;  %v1758_v22 = vld [vmem:[%s3173_s12 + $0xa8] sm:$0xff] (%p1997_p5) }
 0x2de   : > { %1685 = vst [vmem:[%s3173_s12 + $0xb8] sm:$0xff] %v1648_v44 }
 0x2df   : > { %1759 = vst [vmem:[%s3418_s17 + $0x288] sm:$0xff] (%p1997_p5), %v1758_v22 }
 0x2e0   : > { %v1585_v37 = vpop.f32.mrf.mxu2 }
 0x2e1   : > { %v1586_v31 = vadd.f32 %v1585_v37, %v1521_v63 }
 0x2e2   : > { %v1458_v2 = vpop.f32.mrf.mxu0 }
 0x2e3   : > { %v1459_v48 = vadd.f32 %v1458_v2, %v3351_v45  ;;  %v1650_v34 = vpop.f32.mrf.mxu3 }
 0x2e4   : > { %v1651_v50 = vadd.f32 %v1650_v34, %v1586_v31  ;;  %v1523_v17 = vpop.f32.mrf.mxu1 }
 0x2e5   : > { %v1524_v61 = vadd.f32 %v1523_v17, %v1459_v48  ;;  %v1762_v52 = vld [vmem:[%s3173_s12 + $0xb8] sm:$0xff] (%p1997_p5) }
 0x2e6   : > { %1687 = vst [vmem:[%s3173_s12 + $0xc8] sm:$0xff] %v1651_v50 }
 0x2e7   : > { %1763 = vst [vmem:[%s3418_s17 + $0x2c8] sm:$0xff] (%p1997_p5), %v1762_v52 }
 0x2e8   : > { %v1588_v16 = vpop.f32.mrf.mxu2 }
 0x2e9   : > { %v1589_v8 = vadd.f32 %v1588_v16, %v1524_v61 }
 0x2ea   : > { %v1461_v6 = vpop.f32.mrf.mxu0 }
 0x2eb   : > { %v1462_v3 = vadd.f32 %v1461_v6, %v3364_v20  ;;  %v1653_v25 = vpop.f32.mrf.mxu3 }
 0x2ec   : > { %v1654_v32 = vadd.f32 %v1653_v25, %v1589_v8  ;;  %v1526_v24 = vpop.f32.mrf.mxu1 }
 0x2ed   : > { %v1527_v14 = vadd.f32 %v1526_v24, %v1462_v3  ;;  %v1766_v39 = vld [vmem:[%s3173_s12 + $0xc8] sm:$0xff] (%p1997_p5) }
 0x2ee   : > { %1689 = vst [vmem:[%s3173_s12 + $0xd8] sm:$0xff] %v1654_v32 }
 0x2ef   : > { %1767 = vst [vmem:[%s3418_s17 + $0x308] sm:$0xff] (%p1997_p5), %v1766_v39 }
 0x2f0   : > { %v1591_v54 = vpop.f32.mrf.mxu2 }
 0x2f1   : > { %v1592_v56 = vadd.f32 %v1591_v54, %v1527_v14 }
 0x2f2   : > { %v1464_v45 = vpop.f32.mrf.mxu0 }
 0x2f3   : > { %v1465_v58 = vadd.f32 %v1464_v45, %v3377_v57  ;;  %v1656_v28 = vpop.f32.mrf.mxu3  ;;  %v1716_v57 = vld [vmem:[%s3173_s12] sm:$0xff] (%p1997_p5) }
 0x2f4   : > { %v1657_v30 = vadd.f32 %v1656_v28, %v1592_v56  ;;  %v1529_v55 = vpop.f32.mrf.mxu1  ;;  %1717 = vst [vmem:[%s3418_s17] sm:$0xff] (%p1997_p5), %v1716_v57 }
 0x2f5   : > { %v1530_v5 = vadd.f32 %v1529_v55, %v1465_v58  ;;  %v1770_v10 = vld [vmem:[%s3173_s12 + $0xd8] sm:$0xff] (%p1997_p5) }
 0x2f6   : > { %1691 = vst [vmem:[%s3173_s12 + $0xe8] sm:$0xff] %v1657_v30 }
 0x2f7   : > { %1771 = vst [vmem:[%s3418_s17 + $0x348] sm:$0xff] (%p1997_p5), %v1770_v10 }
 0x2f8   : > { %v1594_v43 = vpop.f32.mrf.mxu2 }
 0x2f9   : > { %v1595_v35 = vadd.f32 %v1594_v43, %v1530_v5 }
 0x2fa   : > { %1700 = sbr.rel (!%p1997_p5) target bundleno = 775 (0x307), region = 59 }
 0x2fb   : > { %v1659_v21 = vpop.f32.mrf.mxu3 }
 0x2fc   : > { %v1660_v20 = vadd.f32 %v1659_v21, %v1595_v35 }
 0x2fd   : > { %v1774_v51 = vld [vmem:[%s3173_s12 + $0xe8] sm:$0xff] (%p1997_p5) }
 0x2fe   : > { %1693 = vst [vmem:[%s3173_s12 + $0xf8] sm:$0xff] %v1660_v20 }
 0x2ff   : > { %1775 = vst [vmem:[%s3418_s17 + $0x388] sm:$0xff] %v1774_v51 }
 0x305   : > { %v1778_v26 = vld [vmem:[%s3173_s12 + $0xf8] sm:$0xff] }
 0x306   : > { %1779 = vst [vmem:[%s3418_s17 + $0x3c8] sm:$0xff] %v1778_v26 }
 0x307 PF: > { %p10_p11 = scmp.ge.s32.totalorder %s1985_s16, 6   ;;  %s3497_s12 = smov %s1940_s13 }
 0x308   : > { %s3498_s13 = smov %s1995_s19  ;;  %s3499_s14 = smov %s1985_s16 }
 0x309   :  { %12 = sbr.rel (!%p10_p11) target bundleno = 2 (0x2), region = 116 }

// kernel: rnn_test_forward.3
= control target key start
LH: loop header
LB: loop body
LE: loop exit
PB: predicated region body
PF: predicated region fallthrough
CT: control target
= control target key end

     0   :  { %v1314_v7 = vmov 16.0   ;;  %v1316_v8 = vmov 16.0   ;;  %v1318_v9 = vmov 0.0   ;;  %v1320_v10 = vmov 0.0   ;;  %s2389_s0 = inlined_call_operand.vmem [shape: f32[16,8,1024], index: 0, kind: input, shape index: {}]   ;;  %s2390_s1 = inlined_call_operand.vmem [shape: f32[128,1024], index: 1, kind: input, shape index: {}]   ;;  %s2391_s2 = inlined_call_operand.vmem [shape: f32[1,128], index: 2, kind: input, shape index: {}]   ;;  %s2392_s3 = inlined_call_operand.vmem [shape: f32[1,128], index: 3, kind: input, shape index: {}]   ;;  %s2393_s4 = inlined_call_operand.vmem [shape: f32[1,1024], index: 4, kind: input, shape index: {}]   ;;  %s2394_s5 = inlined_call_operand.vmem [shape: f32[1,1024], index: 5, kind: input, shape index: {}]   ;;  %s2395_s6 = inlined_call_operand.vmem [shape: f32[1024,128], index: 6, kind: input, shape index: {}]   ;;  %s2396_s7 = inlined_call_operand.vmem [shape: f32[128,20], index: 7, kind: input, shape index: {}]   ;;  %s2397_s8 = inlined_call_operand.vmem [shape: f32[1,20], index: 8, kind: input, shape index: {}]   ;;  %s2398_s9 = inlined_call_operand.vmem [shape: f32[1,20], index: 9, kind: input, shape index: {}]   ;;  %s2399_s10 = inlined_call_operand.vmem [shape: f32[1,20], index: 10, kind: input, shape index: {}]   ;;  %s2400_s11 = inlined_call_operand.vmem [shape: f32[8,20], index: 11, kind: output, shape index: {0}]   ;;  %s2401_s12 = inlined_call_operand.vmem [shape: f32[8,128], index: 12, kind: output, shape index: {1}]   ;;  %s2402_s13 = inlined_call_operand.vmem [shape: f32[8,20], index: 13, kind: output, shape index: {2}]   ;;  %s2403_s14 = inlined_call_operand.vmem [shape: f32[8,128], index: 14, kind: output, shape index: {3}]   ;;  %s2404_s15 = inlined_call_operand.vmem [shape: f32[8,20], index: 15, kind: output, shape index: {4}]  }
   0x1   :  { %v1282_v0 = vld [vmem:[%s2391_s2] sm:$0x1]  ;;  %v1322_v11 = vmov 0.0   ;;  %v1324_v12 = vmov 0.0   ;;  %v1326_v13 = vmov 0.0   ;;  %v1328_v14 = vmov 0.0  }
   0x2   :  { %v1287_v1 = vld [vmem:[%s2392_s3] sm:$0x1]  ;;  %v1330_v15 = vmov 0.0   ;;  %v1332_v16 = vmov 0.0   ;;  %v1334_v17 = vmov 0.0   ;;  %v1336_v18 = vmov 0.0  }
   0x3   :  { %v1292_v2 = vld [vmem:[%s2393_s4] sm:$0xff]  ;;  %v1338_v19 = vmov 0.0   ;;  %v1340_v20 = vmov 0.0   ;;  %v1342_v21 = vmov 0.0   ;;  %v1344_v22 = vmov 0.0   ;;  %s1346_s4 = smov 0  }
   0x4   :  { %v1297_v3 = vld [vmem:[%s2394_s5] sm:$0xff] }
   0x5   :  { %v1302_v4 = vld [vmem:[%s2398_s9] sm:$0x1] }
   0x6   :  { %v1307_v5 = vld [vmem:[%s2399_s10] sm:$0x1] }
   0x7   :  { %v1312_v6 = vld [vmem:[%s2397_s8] sm:$0x1] }
   0x8 LB: > { %v205_v23 = vld [vmem:[%s2390_s1 + $0x3d0] sm:$0xff]  ;;  %v206_v25 = vld [vmem:[%s2390_s1 + $0x3d8] sm:$0xff]  ;;  %v203_v27 = vld [vmem:[%s2390_s1 + $0x3c0] sm:$0xff]  ;;  %s918_s19 = sshll.u32 %s1195_s4, 6  ;;  %s820_s9 = scvt.s32.f32 %s1195_s4  ;;  %vm821_vm1 = vcmp.eq.f32.partialorder %v1135_v8, 16.0  ;;  %vm789_vm4 = vcmask 162816   ;;  %s1195_s4 = sphi %s1346_s4, %s55_s4   ;;  %v1191_v22 = vphi %v1344_v22, %v2290_v22   ;;  %v1187_v21 = vphi %v1342_v21, %v2294_v21   ;;  %v1183_v20 = vphi %v1340_v20, %v2415_v20   ;;  %v1179_v19 = vphi %v1338_v19, %v2414_v19   ;;  %v1175_v18 = vphi %v1336_v18, %v2195_v18   ;;  %v1171_v17 = vphi %v1334_v17, %v2202_v17   ;;  %v1167_v16 = vphi %v1332_v16, %v2413_v16   ;;  %v1163_v15 = vphi %v1330_v15, %v2240_v15   ;;  %v1159_v14 = vphi %v1328_v14, %v2236_v14   ;;  %v1155_v13 = vphi %v1326_v13, %v2242_v13   ;;  %v1151_v12 = vphi %v1324_v12, %v785_v12   ;;  %v1147_v11 = vphi %v1322_v11, %v2412_v11   ;;  %v1143_v10 = vphi %v1320_v10, %v2411_v10   ;;  %v1139_v9 = vphi %v1318_v9, %v2410_v9   ;;  %v1135_v8 = vphi %v1316_v8, %v2409_v8   ;;  %v1131_v7 = vphi %v1314_v7, %v2408_v7  }
   0x9   : > { %v197_v24 = vld [vmem:[%s2390_s1 + $0x390] sm:$0xff]  ;;  %251 = vmatpush.msra.mxu2 %v205_v23  ;;  %271 = vmatpush.msra.mxu3 %v206_v25  ;;  %v198_v26 = vld [vmem:[%s2390_s1 + $0x398] sm:$0xff]  ;;  %v195_v30 = vld [vmem:[%s2390_s1 + $0x380] sm:$0xff]  ;;  %s2179_s22 = scalar_lea.vmem %s2389_s0, %s918_s19  ;;  %vm826_vm6 = vcmp.eq.f32.partialorder %v1131_v7, 16.0  ;;  %p814_p0 = scmp.gt.s32.totalorder %s1195_s4, 10 }
   0xa   : > { %v189_v28 = vld [vmem:[%s2390_s1 + $0x350] sm:$0xff]  ;;  %211 = vmatpush.msra.mxu0 %v203_v27  ;;  %v190_v29 = vld [vmem:[%s2390_s1 + $0x358] sm:$0xff]  ;;  %v204_v32 = vld [vmem:[%s2390_s1 + $0x3c8] sm:$0xff]  ;;  %s55_s4 = sadd.s32 1, %s1195_s4  }
   0xb   : > { %252 = vmatpush.msra.mxu2 %v197_v24  ;;  %272 = vmatpush.msra.mxu3 %v198_v26  ;;  %v181_v31 = vld [vmem:[%s2390_s1 + $0x310] sm:$0xff]  ;;  %v182_v33 = vld [vmem:[%s2390_s1 + $0x318] sm:$0xff]  ;;  %v187_v34 = vld [vmem:[%s2390_s1 + $0x340] sm:$0xff]  ;;  %s816_s10 = scalar_select %p814_p0, 1, 0 }
   0xc   : > { %212 = vmatpush.msra.mxu0 %v195_v30  ;;  %231 = vmatpush.msra.mxu1 %v204_v32  ;;  %v196_v35 = vld [vmem:[%s2390_s1 + $0x388] sm:$0xff]  ;;  %v179_v36 = vld [vmem:[%s2390_s1 + $0x300] sm:$0xff]  ;;  %v173_v38 = vld [vmem:[%s2390_s1 + $0x2d0] sm:$0xff]  ;;  %p2317_p1 = scmp.ge.s32.totalorder %s55_s4, 16  }
   0xd   : > { %253 = vmatpush.msra.mxu2 %v189_v28  ;;  %273 = vmatpush.msra.mxu3 %v190_v29  ;;  %v188_v37 = vld [vmem:[%s2390_s1 + $0x348] sm:$0xff]  ;;  %v174_v39 = vld [vmem:[%s2390_s1 + $0x2d8] sm:$0xff]  ;;  %v171_v40 = vld [vmem:[%s2390_s1 + $0x2c0] sm:$0xff] }
   0xe   : > { %213 = vmatpush.msra.mxu0 %v187_v34  ;;  %232 = vmatpush.msra.mxu1 %v196_v35  ;;  %v180_v41 = vld [vmem:[%s2390_s1 + $0x308] sm:$0xff]  ;;  %v165_v42 = vld [vmem:[%s2390_s1 + $0x290] sm:$0xff]  ;;  %v166_v43 = vld [vmem:[%s2390_s1 + $0x298] sm:$0xff] }
   0xf   : > { %254 = vmatpush.msra.mxu2 %v181_v31  ;;  %274 = vmatpush.msra.mxu3 %v182_v33  ;;  %v163_v44 = vld [vmem:[%s2390_s1 + $0x280] sm:$0xff]  ;;  %v172_v45 = vld [vmem:[%s2390_s1 + $0x2c8] sm:$0xff]  ;;  %v157_v46 = vld [vmem:[%s2390_s1 + $0x250] sm:$0xff] }
  0x10   : > { %214 = vmatpush.msra.mxu0 %v179_v36  ;;  %233 = vmatpush.msra.mxu1 %v188_v37  ;;  %v158_v47 = vld [vmem:[%s2390_s1 + $0x258] sm:$0xff]  ;;  %v155_v48 = vld [vmem:[%s2390_s1 + $0x240] sm:$0xff]  ;;  %v164_v49 = vld [vmem:[%s2390_s1 + $0x288] sm:$0xff] }
  0x11   : > { %255 = vmatpush.msra.mxu2 %v173_v38  ;;  %275 = vmatpush.msra.mxu3 %v174_v39  ;;  %v149_v50 = vld [vmem:[%s2390_s1 + $0x210] sm:$0xff]  ;;  %v150_v51 = vld [vmem:[%s2390_s1 + $0x218] sm:$0xff]  ;;  %v147_v52 = vld [vmem:[%s2390_s1 + $0x200] sm:$0xff] }
  0x12   : > { %215 = vmatpush.msra.mxu0 %v171_v40  ;;  %234 = vmatpush.msra.mxu1 %v180_v41  ;;  %v156_v53 = vld [vmem:[%s2390_s1 + $0x248] sm:$0xff]  ;;  %v141_v54 = vld [vmem:[%s2390_s1 + $0x1d0] sm:$0xff]  ;;  %v142_v55 = vld [vmem:[%s2390_s1 + $0x1d8] sm:$0xff] }
  0x13   : > { %256 = vmatpush.msra.mxu2 %v165_v42  ;;  %276 = vmatpush.msra.mxu3 %v166_v43  ;;  %v139_v56 = vld [vmem:[%s2390_s1 + $0x1c0] sm:$0xff]  ;;  %v148_v57 = vld [vmem:[%s2390_s1 + $0x208] sm:$0xff]  ;;  %v133_v58 = vld [vmem:[%s2390_s1 + $0x190] sm:$0xff] }
  0x14   : > { %216 = vmatpush.msra.mxu0 %v163_v44  ;;  %235 = vmatpush.msra.mxu1 %v172_v45  ;;  %v134_v59 = vld [vmem:[%s2390_s1 + $0x198] sm:$0xff]  ;;  %v131_v60 = vld [vmem:[%s2390_s1 + $0x180] sm:$0xff]  ;;  %v140_v61 = vld [vmem:[%s2390_s1 + $0x1c8] sm:$0xff] }
  0x15   : > { %257 = vmatpush.msra.mxu2 %v157_v46  ;;  %277 = vmatpush.msra.mxu3 %v158_v47  ;;  %v125_v62 = vld [vmem:[%s2390_s1 + $0x150] sm:$0xff]  ;;  %v126_v63 = vld [vmem:[%s2390_s1 + $0x158] sm:$0xff]  ;;  %v123_v23 = vld [vmem:[%s2390_s1 + $0x140] sm:$0xff] }
  0x16   : > { %217 = vmatpush.msra.mxu0 %v155_v48  ;;  %236 = vmatpush.msra.mxu1 %v164_v49  ;;  %v132_v24 = vld [vmem:[%s2390_s1 + $0x188] sm:$0xff]  ;;  %v117_v25 = vld [vmem:[%s2390_s1 + $0x110] sm:$0xff]  ;;  %v118_v26 = vld [vmem:[%s2390_s1 + $0x118] sm:$0xff] }
  0x17   : > { %258 = vmatpush.msra.mxu2 %v149_v50  ;;  %278 = vmatpush.msra.mxu3 %v150_v51  ;;  %v115_v27 = vld [vmem:[%s2390_s1 + $0x100] sm:$0xff]  ;;  %v124_v28 = vld [vmem:[%s2390_s1 + $0x148] sm:$0xff]  ;;  %v109_v29 = vld [vmem:[%s2390_s1 + $0xd0] sm:$0xff] }
  0x18   : > { %218 = vmatpush.msra.mxu0 %v147_v52  ;;  %237 = vmatpush.msra.mxu1 %v156_v53  ;;  %v110_v30 = vld [vmem:[%s2390_s1 + $0xd8] sm:$0xff]  ;;  %v107_v31 = vld [vmem:[%s2390_s1 + $0xc0] sm:$0xff]  ;;  %v116_v32 = vld [vmem:[%s2390_s1 + $0x108] sm:$0xff] }
  0x19   : > { %259 = vmatpush.msra.mxu2 %v141_v54  ;;  %279 = vmatpush.msra.mxu3 %v142_v55  ;;  %v101_v33 = vld [vmem:[%s2390_s1 + $0x90] sm:$0xff]  ;;  %v102_v34 = vld [vmem:[%s2390_s1 + $0x98] sm:$0xff]  ;;  %v99_v35 = vld [vmem:[%s2390_s1 + $0x80] sm:$0xff] }
  0x1a   : > { %219 = vmatpush.msra.mxu0 %v139_v56  ;;  %238 = vmatpush.msra.mxu1 %v148_v57  ;;  %v108_v36 = vld [vmem:[%s2390_s1 + $0xc8] sm:$0xff]  ;;  %v93_v37 = vld [vmem:[%s2390_s1 + $0x50] sm:$0xff]  ;;  %v94_v38 = vld [vmem:[%s2390_s1 + $0x58] sm:$0xff] }
  0x1b   : > { %260 = vmatpush.msra.mxu2 %v133_v58  ;;  %280 = vmatpush.msra.mxu3 %v134_v59  ;;  %v91_v39 = vld [vmem:[%s2390_s1 + $0x40] sm:$0xff]  ;;  %v100_v40 = vld [vmem:[%s2390_s1 + $0x88] sm:$0xff]  ;;  %v85_v41 = vld [vmem:[%s2390_s1 + $0x10] sm:$0xff] }
  0x1c   : > { %220 = vmatpush.msra.mxu0 %v131_v60  ;;  %239 = vmatpush.msra.mxu1 %v140_v61  ;;  %v86_v42 = vld [vmem:[%s2390_s1 + $0x18] sm:$0xff]  ;;  %v209_v43 = vld [vmem:[%s2390_s1 + $0x3f0] sm:$0xff]  ;;  %v83_v45 = vld [vmem:[%s2390_s1] sm:$0xff] }
  0x1d   : > { %261 = vmatpush.msra.mxu2 %v125_v62  ;;  %281 = vmatpush.msra.mxu3 %v126_v63  ;;  %v210_v44 = vld [vmem:[%s2390_s1 + $0x3f8] sm:$0xff]  ;;  %v92_v46 = vld [vmem:[%s2390_s1 + $0x48] sm:$0xff]  ;;  %v201_v47 = vld [vmem:[%s2390_s1 + $0x3b0] sm:$0xff] }
  0x1e   : > { %221 = vmatpush.msra.mxu0 %v123_v23  ;;  %240 = vmatpush.msra.mxu1 %v132_v24  ;;  %v202_v48 = vld [vmem:[%s2390_s1 + $0x3b8] sm:$0xff]  ;;  %v207_v49 = vld [vmem:[%s2390_s1 + $0x3e0] sm:$0xff]  ;;  %v84_v50 = vld [vmem:[%s2390_s1 + $0x8] sm:$0xff] }
  0x1f   : > { %262 = vmatpush.msra.mxu2 %v117_v25  ;;  %282 = vmatpush.msra.mxu3 %v118_v26  ;;  %v193_v51 = vld [vmem:[%s2390_s1 + $0x370] sm:$0xff]  ;;  %v194_v52 = vld [vmem:[%s2390_s1 + $0x378] sm:$0xff]  ;;  %v199_v53 = vld [vmem:[%s2390_s1 + $0x3a0] sm:$0xff] }
  0x20   : > { %222 = vmatpush.msra.mxu0 %v115_v27  ;;  %241 = vmatpush.msra.mxu1 %v124_v28  ;;  %v208_v54 = vld [vmem:[%s2390_s1 + $0x3e8] sm:$0xff]  ;;  %v185_v55 = vld [vmem:[%s2390_s1 + $0x330] sm:$0xff]  ;;  %v186_v56 = vld [vmem:[%s2390_s1 + $0x338] sm:$0xff] }
  0x21   : > { %263 = vmatpush.msra.mxu2 %v109_v29  ;;  %283 = vmatpush.msra.mxu3 %v110_v30  ;;  %v191_v57 = vld [vmem:[%s2390_s1 + $0x360] sm:$0xff]  ;;  %v200_v58 = vld [vmem:[%s2390_s1 + $0x3a8] sm:$0xff]  ;;  %v177_v59 = vld [vmem:[%s2390_s1 + $0x2f0] sm:$0xff] }
  0x22   : > { %223 = vmatpush.msra.mxu0 %v107_v31  ;;  %242 = vmatpush.msra.mxu1 %v116_v32  ;;  %v178_v60 = vld [vmem:[%s2390_s1 + $0x2f8] sm:$0xff]  ;;  %v183_v61 = vld [vmem:[%s2390_s1 + $0x320] sm:$0xff]  ;;  %v192_v62 = vld [vmem:[%s2390_s1 + $0x368] sm:$0xff] }
  0x23   : > { %264 = vmatpush.msra.mxu2 %v101_v33  ;;  %284 = vmatpush.msra.mxu3 %v102_v34  ;;  %v169_v63 = vld [vmem:[%s2390_s1 + $0x2b0] sm:$0xff]  ;;  %v170_v23 = vld [vmem:[%s2390_s1 + $0x2b8] sm:$0xff]  ;;  %v175_v24 = vld [vmem:[%s2390_s1 + $0x2e0] sm:$0xff] }
  0x24   : > { %224 = vmatpush.msra.mxu0 %v99_v35  ;;  %243 = vmatpush.msra.mxu1 %v108_v36  ;;  %v184_v25 = vld [vmem:[%s2390_s1 + $0x328] sm:$0xff]  ;;  %v161_v26 = vld [vmem:[%s2390_s1 + $0x270] sm:$0xff]  ;;  %v162_v27 = vld [vmem:[%s2390_s1 + $0x278] sm:$0xff] }
  0x25   : > { %265 = vmatpush.msra.mxu2 %v93_v37  ;;  %285 = vmatpush.msra.mxu3 %v94_v38  ;;  %v167_v28 = vld [vmem:[%s2390_s1 + $0x2a0] sm:$0xff]  ;;  %v176_v29 = vld [vmem:[%s2390_s1 + $0x2e8] sm:$0xff]  ;;  %v153_v30 = vld [vmem:[%s2390_s1 + $0x230] sm:$0xff] }
  0x26   : > { %225 = vmatpush.msra.mxu0 %v91_v39  ;;  %244 = vmatpush.msra.mxu1 %v100_v40  ;;  %v154_v31 = vld [vmem:[%s2390_s1 + $0x238] sm:$0xff]  ;;  %v159_v32 = vld [vmem:[%s2390_s1 + $0x260] sm:$0xff]  ;;  %v168_v33 = vld [vmem:[%s2390_s1 + $0x2a8] sm:$0xff] }
  0x27   : > { %266 = vmatpush.msra.mxu2 %v85_v41  ;;  %286 = vmatpush.msra.mxu3 %v86_v42  ;;  %v145_v34 = vld [vmem:[%s2390_s1 + $0x1f0] sm:$0xff]  ;;  %v146_v35 = vld [vmem:[%s2390_s1 + $0x1f8] sm:$0xff]  ;;  %v151_v36 = vld [vmem:[%s2390_s1 + $0x220] sm:$0xff] }
  0x28   : > { %226 = vmatpush.msra.mxu0 %v83_v45  ;;  %245 = vmatpush.msra.mxu1 %v92_v46  ;;  %v160_v37 = vld [vmem:[%s2390_s1 + $0x268] sm:$0xff]  ;;  %v137_v38 = vld [vmem:[%s2390_s1 + $0x1b0] sm:$0xff]  ;;  %v138_v39 = vld [vmem:[%s2390_s1 + $0x1b8] sm:$0xff] }
  0x29   : > { %331 = vmatpush.msrb.mxu2 %v209_v43  ;;  %351 = vmatpush.msrb.mxu3 %v210_v44  ;;  %v143_v40 = vld [vmem:[%s2390_s1 + $0x1e0] sm:$0xff]  ;;  %v129_v41 = vld [vmem:[%s2390_s1 + $0x170] sm:$0xff]  ;;  %v152_v42 = vld [vmem:[%s2390_s1 + $0x228] sm:$0xff] }
  0x2a   : > { %291 = vmatpush.msrb.mxu0 %v207_v49  ;;  %246 = vmatpush.msra.mxu1 %v84_v50  ;;  %v130_v43 = vld [vmem:[%s2390_s1 + $0x178] sm:$0xff]  ;;  %v135_v44 = vld [vmem:[%s2390_s1 + $0x1a0] sm:$0xff]  ;;  %v121_v45 = vld [vmem:[%s2390_s1 + $0x130] sm:$0xff] }
  0x2b   : > { %332 = vmatpush.msrb.mxu2 %v201_v47  ;;  %352 = vmatpush.msrb.mxu3 %v202_v48  ;;  %v144_v46 = vld [vmem:[%s2390_s1 + $0x1e8] sm:$0xff]  ;;  %v122_v47 = vld [vmem:[%s2390_s1 + $0x138] sm:$0xff]  ;;  %v113_v48 = vld [vmem:[%s2390_s1 + $0xf0] sm:$0xff] }
  0x2c   : > { %292 = vmatpush.msrb.mxu0 %v199_v53  ;;  %311 = vmatpush.msrb.mxu1 %v208_v54  ;;  %v127_v49 = vld [vmem:[%s2390_s1 + $0x160] sm:$0xff]  ;;  %v136_v50 = vld [vmem:[%s2390_s1 + $0x1a8] sm:$0xff] }
  0x2d   : > { %333 = vmatpush.msrb.mxu2 %v193_v51  ;;  %353 = vmatpush.msrb.mxu3 %v194_v52  ;;  %v114_v51 = vld [vmem:[%s2390_s1 + $0xf8] sm:$0xff]  ;;  %v105_v52 = vld [vmem:[%s2390_s1 + $0xb0] sm:$0xff]  ;;  %v119_v53 = vld [vmem:[%s2390_s1 + $0x120] sm:$0xff] }
  0x2e   : > { %293 = vmatpush.msrb.mxu0 %v191_v57  ;;  %312 = vmatpush.msrb.mxu1 %v200_v58  ;;  %v128_v54 = vld [vmem:[%s2390_s1 + $0x168] sm:$0xff]  ;;  %v111_v57 = vld [vmem:[%s2390_s1 + $0xe0] sm:$0xff] }
  0x2f   : > { %334 = vmatpush.msrb.mxu2 %v185_v55  ;;  %354 = vmatpush.msrb.mxu3 %v186_v56  ;;  %v106_v55 = vld [vmem:[%s2390_s1 + $0xb8] sm:$0xff]  ;;  %v97_v56 = vld [vmem:[%s2390_s1 + $0x70] sm:$0xff]  ;;  %v120_v58 = vld [vmem:[%s2390_s1 + $0x128] sm:$0xff] }
  0x30   : > { %294 = vmatpush.msrb.mxu0 %v183_v61  ;;  %313 = vmatpush.msrb.mxu1 %v192_v62  ;;  %v103_v61 = vld [vmem:[%s2390_s1 + $0xa0] sm:$0xff]  ;;  %v112_v62 = vld [vmem:[%s2390_s1 + $0xe8] sm:$0xff] }
  0x31   : > { %335 = vmatpush.msrb.mxu2 %v177_v59  ;;  %355 = vmatpush.msrb.mxu3 %v178_v60  ;;  %v89_v59 = vld [vmem:[%s2390_s1 + $0x30] sm:$0xff]  ;;  %v98_v60 = vld [vmem:[%s2390_s1 + $0x78] sm:$0xff] }
  0x32   : > { %295 = vmatpush.msrb.mxu0 %v175_v24  ;;  %314 = vmatpush.msrb.mxu1 %v184_v25  ;;  %v95_v24 = vld [vmem:[%s2390_s1 + $0x60] sm:$0xff]  ;;  %v104_v25 = vld [vmem:[%s2390_s1 + $0xa8] sm:$0xff] }
  0x33   : > { %336 = vmatpush.msrb.mxu2 %v169_v63  ;;  %356 = vmatpush.msrb.mxu3 %v170_v23  ;;  %v90_v63 = vld [vmem:[%s2390_s1 + $0x38] sm:$0xff] }
  0x34   : > { %296 = vmatpush.msrb.mxu0 %v167_v28  ;;  %315 = vmatpush.msrb.mxu1 %v176_v29  ;;  %v484_v23 = vld [vmem:[%s2395_s6 + $0x178] sm:$0xff]  ;;  %v96_v29 = vld [vmem:[%s2390_s1 + $0x68] sm:$0xff] }
  0x35   : > { %337 = vmatpush.msrb.mxu2 %v161_v26  ;;  %357 = vmatpush.msrb.mxu3 %v162_v27  ;;  %v483_v26 = vld [vmem:[%s2395_s6 + $0x170] sm:$0xff]  ;;  %v87_v27 = vld [vmem:[%s2390_s1 + $0x20] sm:$0xff]  ;;  %v500_v28 = vld [vmem:[%s2395_s6 + $0x1f8] sm:$0xff] }
  0x36   : > { %297 = vmatpush.msrb.mxu0 %v159_v32  ;;  %316 = vmatpush.msrb.mxu1 %v168_v33  ;;  %v88_v32 = vld [vmem:[%s2390_s1 + $0x28] sm:$0xff]  ;;  %v499_v33 = vld [vmem:[%s2395_s6 + $0x1f0] sm:$0xff] }
  0x37   : > { %338 = vmatpush.msrb.mxu2 %v153_v30  ;;  %358 = vmatpush.msrb.mxu3 %v154_v31  ;;  %v452_v30 = vld [vmem:[%s2395_s6 + $0x78] sm:$0xff]  ;;  %v482_v31 = vld [vmem:[%s2395_s6 + $0x168] sm:$0xff] }
  0x38   : > { %298 = vmatpush.msrb.mxu0 %v151_v36  ;;  %317 = vmatpush.msrb.mxu1 %v160_v37  ;;  %v481_v36 = vld [vmem:[%s2395_s6 + $0x160] sm:$0xff]  ;;  %v450_v37 = vld [vmem:[%s2395_s6 + $0x68] sm:$0xff] }
  0x39   : > { %339 = vmatpush.msrb.mxu2 %v145_v34  ;;  %359 = vmatpush.msrb.mxu3 %v146_v35  ;;  %v451_v34 = vld [vmem:[%s2395_s6 + $0x70] sm:$0xff]  ;;  %v468_v35 = vld [vmem:[%s2395_s6 + $0xf8] sm:$0xff] }
  0x3a   : > { %267 = vmatmul.f32.vlgmr.msra.gmra.mxu2 %v1187_v21  ;;  %299 = vmatpush.msrb.mxu0 %v143_v40  ;;  %v480_v40 = vld [vmem:[%s2395_s6 + $0x158] sm:$0xff] }
  0x3b   : > { %340 = vmatpush.msrb.mxu2 %v137_v38  ;;  %360 = vmatpush.msrb.mxu3 %v138_v39  ;;  %v498_v38 = vld [vmem:[%s2395_s6 + $0x1e8] sm:$0xff]  ;;  %v467_v39 = vld [vmem:[%s2395_s6 + $0xf0] sm:$0xff] }
  0x3c   : > { %318 = vmatpush.msrb.mxu1 %v152_v42  ;;  %300 = vmatpush.msrb.mxu0 %v135_v44  ;;  %v497_v42 = vld [vmem:[%s2395_s6 + $0x1e0] sm:$0xff]  ;;  %v479_v44 = vld [vmem:[%s2395_s6 + $0x150] sm:$0xff] }
  0x3d   : > { %341 = vmatpush.msrb.mxu2 %v129_v41  ;;  %361 = vmatpush.msrb.mxu3 %v130_v43  ;;  %v449_v41 = vld [vmem:[%s2395_s6 + $0x60] sm:$0xff]  ;;  %v466_v43 = vld [vmem:[%s2395_s6 + $0xe8] sm:$0xff] }
  0x3e   : > { %287 = vmatmul.f32.vlgmr.msra.gmra.mxu3 %v1187_v21  ;;  %319 = vmatpush.msrb.mxu1 %v144_v46  ;;  %v496_v46 = vld [vmem:[%s2395_s6 + $0x1d8] sm:$0xff] }
  0x3f   : > { %342 = vmatpush.msrb.mxu2 %v121_v45  ;;  %362 = vmatpush.msrb.mxu3 %v122_v47  ;;  %v448_v45 = vld [vmem:[%s2395_s6 + $0x58] sm:$0xff]  ;;  %v465_v47 = vld [vmem:[%s2395_s6 + $0xe0] sm:$0xff] }
  0x40   : > { %301 = vmatpush.msrb.mxu0 %v127_v49  ;;  %320 = vmatpush.msrb.mxu1 %v136_v50  ;;  %v447_v49 = vld [vmem:[%s2395_s6 + $0x50] sm:$0xff] }
  0x41   : > { %343 = vmatpush.msrb.mxu2 %v113_v48  ;;  %363 = vmatpush.msrb.mxu3 %v114_v51  ;;  %v478_v48 = vld [vmem:[%s2395_s6 + $0x148] sm:$0xff]  ;;  %v495_v50 = vld [vmem:[%s2395_s6 + $0x1d0] sm:$0xff]  ;;  %v464_v51 = vld [vmem:[%s2395_s6 + $0xd8] sm:$0xff] }
  0x42   : > { %302 = vmatpush.msrb.mxu0 %v119_v53  ;;  %321 = vmatpush.msrb.mxu1 %v128_v54  ;;  %v446_v53 = vld [vmem:[%s2395_s6 + $0x48] sm:$0xff] }
  0x43   : > { %344 = vmatpush.msrb.mxu2 %v105_v52  ;;  %364 = vmatpush.msrb.mxu3 %v106_v55  ;;  %v477_v52 = vld [vmem:[%s2395_s6 + $0x140] sm:$0xff]  ;;  %v494_v54 = vld [vmem:[%s2395_s6 + $0x1c8] sm:$0xff]  ;;  %v463_v55 = vld [vmem:[%s2395_s6 + $0xd0] sm:$0xff] }
  0x44   : > { %227 = vmatmul.f32.vlgmr.msra.gmra.mxu0 %v1187_v21  ;;  %322 = vmatpush.msrb.mxu1 %v120_v58  ;;  %v493_v58 = vld [vmem:[%s2395_s6 + $0x1c0] sm:$0xff] }
  0x45   : > { %345 = vmatpush.msrb.mxu2 %v97_v56  ;;  %303 = vmatpush.msrb.mxu0 %v111_v57  ;;  %v476_v56 = vld [vmem:[%s2395_s6 + $0x138] sm:$0xff]  ;;  %v445_v57 = vld [vmem:[%s2395_s6 + $0x40] sm:$0xff] }
  0x46   : > { %365 = vmatpush.msrb.mxu3 %v98_v60  ;;  %247 = vmatmul.f32.vlgmr.msra.gmra.mxu1 %v1187_v21  ;;  %v475_v60 = vld [vmem:[%s2395_s6 + $0x130] sm:$0xff] }
  0x47   : > { %346 = vmatpush.msrb.mxu2 %v89_v59  ;;  %304 = vmatpush.msrb.mxu0 %v103_v61  ;;  %v462_v59 = vld [vmem:[%s2395_s6 + $0xc8] sm:$0xff]  ;;  %v444_v61 = vld [vmem:[%s2395_s6 + $0x38] sm:$0xff] }
  0x48   : > { %347 = vmatmul.f32.vlgmr.msrb.gmra.mxu2 %v1187_v21  ;;  %323 = vmatpush.msrb.mxu1 %v112_v62  ;;  %v492_v62 = vld [vmem:[%s2395_s6 + $0x1b8] sm:$0xff] }
  0x49   : > { %366 = vmatpush.msrb.mxu3 %v90_v63  ;;  %605 = vmatpush.msra.mxu2 %v484_v23  ;;  %v461_v63 = vld [vmem:[%s2395_s6 + $0xc0] sm:$0xff]  ;;  %v474_v23 = vld [vmem:[%s2395_s6 + $0x128] sm:$0xff] }
  0x4a   : > { %367 = vmatmul.f32.vlgmr.msrb.gmra.mxu3 %v1187_v21  ;;  %305 = vmatpush.msrb.mxu0 %v95_v24  ;;  %v443_v24 = vld [vmem:[%s2395_s6 + $0x30] sm:$0xff] }
  0x4b   : > { %324 = vmatpush.msrb.mxu1 %v104_v25  ;;  %606 = vmatpush.msra.mxu2 %v483_v26  ;;  %v491_v25 = vld [vmem:[%s2395_s6 + $0x1b0] sm:$0xff]  ;;  %v460_v26 = vld [vmem:[%s2395_s6 + $0xb8] sm:$0xff] }
  0x4c   : > { %306 = vmatpush.msrb.mxu0 %v87_v27  ;;  %625 = vmatpush.msra.mxu3 %v500_v28  ;;  %v473_v27 = vld [vmem:[%s2395_s6 + $0x120] sm:$0xff]  ;;  %v442_v28 = vld [vmem:[%s2395_s6 + $0x28] sm:$0xff] }
  0x4d   : > { %325 = vmatpush.msrb.mxu1 %v96_v29  ;;  %307 = vmatmul.f32.vlgmr.msrb.gmra.mxu0 %v1187_v21  ;;  %v490_v29 = vld [vmem:[%s2395_s6 + $0x1a8] sm:$0xff] }
  0x4e   : > { %565 = vmatpush.msra.mxu0 %v452_v30  ;;  %607 = vmatpush.msra.mxu2 %v482_v31  ;;  %v459_v30 = vld [vmem:[%s2395_s6 + $0xb0] sm:$0xff]  ;;  %v472_v31 = vld [vmem:[%s2395_s6 + $0x118] sm:$0xff] }
  0x4f   : > { %326 = vmatpush.msrb.mxu1 %v88_v32  ;;  %626 = vmatpush.msra.mxu3 %v499_v33  ;;  %v441_v32 = vld [vmem:[%s2395_s6 + $0x20] sm:$0xff] }
  0x50   : > { %327 = vmatmul.f32.vlgmr.msrb.gmra.mxu1 %v1187_v21  ;;  %566 = vmatpush.msra.mxu0 %v451_v34  ;;  %v489_v33 = vld [vmem:[%s2395_s6 + $0x1a0] sm:$0xff]  ;;  %v458_v34 = vld [vmem:[%s2395_s6 + $0xa8] sm:$0xff] }
  0x51   : > { %585 = vmatpush.msra.mxu1 %v468_v35  ;;  %608 = vmatpush.msra.mxu2 %v481_v36  ;;  %v471_v35 = vld [vmem:[%s2395_s6 + $0x110] sm:$0xff]  ;;  %v440_v36 = vld [vmem:[%s2395_s6 + $0x18] sm:$0xff] }
  0x52   : > { %567 = vmatpush.msra.mxu0 %v450_v37  ;;  %627 = vmatpush.msra.mxu3 %v498_v38  ;;  %v488_v37 = vld [vmem:[%s2395_s6 + $0x198] sm:$0xff]  ;;  %v457_v38 = vld [vmem:[%s2395_s6 + $0xa0] sm:$0xff] }
  0x53   : > { %586 = vmatpush.msra.mxu1 %v467_v39  ;;  %609 = vmatpush.msra.mxu2 %v480_v40  ;;  %v470_v39 = vld [vmem:[%s2395_s6 + $0x108] sm:$0xff]  ;;  %v439_v40 = vld [vmem:[%s2395_s6 + $0x10] sm:$0xff] }
  0x54   : > { %568 = vmatpush.msra.mxu0 %v449_v41  ;;  %628 = vmatpush.msra.mxu3 %v497_v42  ;;  %v487_v41 = vld [vmem:[%s2395_s6 + $0x190] sm:$0xff]  ;;  %v456_v42 = vld [vmem:[%s2395_s6 + $0x98] sm:$0xff] }
  0x55   : > { %587 = vmatpush.msra.mxu1 %v466_v43  ;;  %610 = vmatpush.msra.mxu2 %v479_v44  ;;  %v469_v43 = vld [vmem:[%s2395_s6 + $0x100] sm:$0xff]  ;;  %v438_v44 = vld [vmem:[%s2395_s6 + $0x8] sm:$0xff] }
  0x56   : > { %569 = vmatpush.msra.mxu0 %v448_v45  ;;  %629 = vmatpush.msra.mxu3 %v496_v46  ;;  %v486_v45 = vld [vmem:[%s2395_s6 + $0x188] sm:$0xff]  ;;  %v455_v46 = vld [vmem:[%s2395_s6 + $0x90] sm:$0xff] }
  0x57   : > { %588 = vmatpush.msra.mxu1 %v465_v47  ;;  %611 = vmatpush.msra.mxu2 %v478_v48  ;;  %v548_v47 = vld [vmem:[%s2395_s6 + $0x378] sm:$0xff]  ;;  %v437_v48 = vld [vmem:[%s2395_s6] sm:$0xff] }
  0x58   : > { %570 = vmatpush.msra.mxu0 %v447_v49  ;;  %630 = vmatpush.msra.mxu3 %v495_v50  ;;  %v485_v49 = vld [vmem:[%s2395_s6 + $0x180] sm:$0xff]  ;;  %v454_v50 = vld [vmem:[%s2395_s6 + $0x88] sm:$0xff] }
  0x59   : > { %589 = vmatpush.msra.mxu1 %v464_v51  ;;  %612 = vmatpush.msra.mxu2 %v477_v52  ;;  %v516_v51 = vld [vmem:[%s2395_s6 + $0x278] sm:$0xff]  ;;  %v547_v52 = vld [vmem:[%s2395_s6 + $0x370] sm:$0xff] }
  0x5a   : > { %571 = vmatpush.msra.mxu0 %v446_v53  ;;  %631 = vmatpush.msra.mxu3 %v494_v54  ;;  %v564_v53 = vld [vmem:[%s2395_s6 + $0x3f8] sm:$0xff]  ;;  %v453_v54 = vld [vmem:[%s2395_s6 + $0x80] sm:$0xff] }
  0x5b   : > { %590 = vmatpush.msra.mxu1 %v463_v55  ;;  %613 = vmatpush.msra.mxu2 %v476_v56  ;;  %v515_v55 = vld [vmem:[%s2395_s6 + $0x270] sm:$0xff]  ;;  %v532_v56 = vld [vmem:[%s2395_s6 + $0x2f8] sm:$0xff] }
  0x5c   : > { %572 = vmatpush.msra.mxu0 %v445_v57  ;;  %632 = vmatpush.msra.mxu3 %v493_v58  ;;  %v546_v57 = vld [vmem:[%s2395_s6 + $0x368] sm:$0xff] }
  0x5d   : > { %591 = vmatpush.msra.mxu1 %v462_v59  ;;  %614 = vmatpush.msra.mxu2 %v475_v60  ;;  %v514_v58 = vld [vmem:[%s2395_s6 + $0x268] sm:$0xff]  ;;  %v563_v59 = vld [vmem:[%s2395_s6 + $0x3f0] sm:$0xff] }
  0x5e   : > { %573 = vmatpush.msra.mxu0 %v444_v61  ;;  %633 = vmatpush.msra.mxu3 %v492_v62  ;;  %v531_v60 = vld [vmem:[%s2395_s6 + $0x2f0] sm:$0xff]  ;;  %v545_v61 = vld [vmem:[%s2395_s6 + $0x360] sm:$0xff] }
  0x5f   : > { %592 = vmatpush.msra.mxu1 %v461_v63  ;;  %615 = vmatpush.msra.mxu2 %v474_v23  ;;  %v513_v62 = vld [vmem:[%s2395_s6 + $0x260] sm:$0xff]  ;;  %v562_v63 = vld [vmem:[%s2395_s6 + $0x3e8] sm:$0xff] }
  0x60   : > { %574 = vmatpush.msra.mxu0 %v443_v24  ;;  %634 = vmatpush.msra.mxu3 %v491_v25  ;;  %v530_v23 = vld [vmem:[%s2395_s6 + $0x2e8] sm:$0xff]  ;;  %v544_v24 = vld [vmem:[%s2395_s6 + $0x358] sm:$0xff] }
  0x61   : > { %593 = vmatpush.msra.mxu1 %v460_v26  ;;  %616 = vmatpush.msra.mxu2 %v473_v27  ;;  %v512_v25 = vld [vmem:[%s2395_s6 + $0x258] sm:$0xff]  ;;  %v561_v26 = vld [vmem:[%s2395_s6 + $0x3e0] sm:$0xff] }
  0x62   : > { %575 = vmatpush.msra.mxu0 %v442_v28  ;;  %635 = vmatpush.msra.mxu3 %v490_v29  ;;  %v529_v27 = vld [vmem:[%s2395_s6 + $0x2e0] sm:$0xff]  ;;  %v543_v28 = vld [vmem:[%s2395_s6 + $0x350] sm:$0xff] }
  0x63   : > { %594 = vmatpush.msra.mxu1 %v459_v30  ;;  %617 = vmatpush.msra.mxu2 %v472_v31  ;;  %v511_v29 = vld [vmem:[%s2395_s6 + $0x250] sm:$0xff]  ;;  %v560_v30 = vld [vmem:[%s2395_s6 + $0x3d8] sm:$0xff] }
  0x64   : > { %576 = vmatpush.msra.mxu0 %v441_v32  ;;  %636 = vmatpush.msra.mxu3 %v489_v33  ;;  %v528_v31 = vld [vmem:[%s2395_s6 + $0x2d8] sm:$0xff]  ;;  %v542_v32 = vld [vmem:[%s2395_s6 + $0x348] sm:$0xff] }
  0x65   : > { %595 = vmatpush.msra.mxu1 %v458_v34  ;;  %618 = vmatpush.msra.mxu2 %v471_v35  ;;  %v510_v33 = vld [vmem:[%s2395_s6 + $0x248] sm:$0xff]  ;;  %v559_v34 = vld [vmem:[%s2395_s6 + $0x3d0] sm:$0xff] }
  0x66   : > { %577 = vmatpush.msra.mxu0 %v440_v36  ;;  %637 = vmatpush.msra.mxu3 %v488_v37  ;;  %v527_v35 = vld [vmem:[%s2395_s6 + $0x2d0] sm:$0xff]  ;;  %v509_v36 = vld [vmem:[%s2395_s6 + $0x240] sm:$0xff]  ;;  %v526_v37 = vld [vmem:[%s2395_s6 + $0x2c8] sm:$0xff] }
  0x67   : > { %596 = vmatpush.msra.mxu1 %v457_v38  ;;  %619 = vmatpush.msra.mxu2 %v470_v39  ;;  %v541_v38 = vld [vmem:[%s2395_s6 + $0x340] sm:$0xff]  ;;  %v558_v39 = vld [vmem:[%s2395_s6 + $0x3c8] sm:$0xff] }
  0x68   : > { %578 = vmatpush.msra.mxu0 %v439_v40  ;;  %638 = vmatpush.msra.mxu3 %v487_v41  ;;  %v508_v40 = vld [vmem:[%s2395_s6 + $0x238] sm:$0xff]  ;;  %v525_v41 = vld [vmem:[%s2395_s6 + $0x2c0] sm:$0xff] }
  0x69   : > { %597 = vmatpush.msra.mxu1 %v456_v42  ;;  %620 = vmatpush.msra.mxu2 %v469_v43  ;;  %v540_v42 = vld [vmem:[%s2395_s6 + $0x338] sm:$0xff]  ;;  %v557_v43 = vld [vmem:[%s2395_s6 + $0x3c0] sm:$0xff] }
  0x6a   : > { %579 = vmatpush.msra.mxu0 %v438_v44  ;;  %639 = vmatpush.msra.mxu3 %v486_v45  ;;  %v507_v44 = vld [vmem:[%s2395_s6 + $0x230] sm:$0xff]  ;;  %v524_v45 = vld [vmem:[%s2395_s6 + $0x2b8] sm:$0xff] }
  0x6b   : > { %598 = vmatpush.msra.mxu1 %v455_v46  ;;  %685 = vmatpush.msrb.mxu2 %v548_v47  ;;  %v539_v46 = vld [vmem:[%s2395_s6 + $0x330] sm:$0xff]  ;;  %v556_v47 = vld [vmem:[%s2395_s6 + $0x3b8] sm:$0xff] }
  0x6c   : > { %580 = vmatpush.msra.mxu0 %v437_v48  ;;  %640 = vmatpush.msra.mxu3 %v485_v49  ;;  %v506_v48 = vld [vmem:[%s2395_s6 + $0x228] sm:$0xff]  ;;  %v523_v49 = vld [vmem:[%s2395_s6 + $0x2b0] sm:$0xff] }
  0x6d   : > { %599 = vmatpush.msra.mxu1 %v454_v50  ;;  %686 = vmatpush.msrb.mxu2 %v547_v52  ;;  %v538_v50 = vld [vmem:[%s2395_s6 + $0x328] sm:$0xff]  ;;  %v505_v52 = vld [vmem:[%s2395_s6 + $0x220] sm:$0xff] }
  0x6e   : > { %645 = vmatpush.msrb.mxu0 %v516_v51  ;;  %705 = vmatpush.msrb.mxu3 %v564_v53  ;;  %v555_v51 = vld [vmem:[%s2395_s6 + $0x3b0] sm:$0xff]  ;;  %v522_v53 = vld [vmem:[%s2395_s6 + $0x2a8] sm:$0xff] }
  0x6f   : > { %600 = vmatpush.msra.mxu1 %v453_v54  ;;  %687 = vmatpush.msrb.mxu2 %v546_v57  ;;  %v537_v54 = vld [vmem:[%s2395_s6 + $0x320] sm:$0xff] }
  0x70   : > { %646 = vmatpush.msrb.mxu0 %v515_v55  ;;  %706 = vmatpush.msrb.mxu3 %v563_v59  ;;  %v554_v55 = vld [vmem:[%s2395_s6 + $0x3a8] sm:$0xff]  ;;  %v521_v57 = vld [vmem:[%s2395_s6 + $0x2a0] sm:$0xff] }
  0x71   : > { %665 = vmatpush.msrb.mxu1 %v532_v56  ;;  %688 = vmatpush.msrb.mxu2 %v545_v61  ;;  %v504_v56 = vld [vmem:[%s2395_s6 + $0x218] sm:$0xff]  ;;  %v553_v59 = vld [vmem:[%s2395_s6 + $0x3a0] sm:$0xff] }
  0x72   : > { %647 = vmatpush.msrb.mxu0 %v514_v58  ;;  %707 = vmatpush.msrb.mxu3 %v562_v63  ;;  %v536_v58 = vld [vmem:[%s2395_s6 + $0x318] sm:$0xff] }
  0x73   : > { %666 = vmatpush.msrb.mxu1 %v531_v60  ;;  %689 = vmatpush.msrb.mxu2 %v544_v24  ;;  %v503_v60 = vld [vmem:[%s2395_s6 + $0x210] sm:$0xff]  ;;  %v520_v61 = vld [vmem:[%s2395_s6 + $0x298] sm:$0xff] }
  0x74   : > { %648 = vmatpush.msrb.mxu0 %v513_v62  ;;  %708 = vmatpush.msrb.mxu3 %v561_v26  ;;  %v535_v62 = vld [vmem:[%s2395_s6 + $0x310] sm:$0xff]  ;;  %v552_v63 = vld [vmem:[%s2395_s6 + $0x398] sm:$0xff] }
  0x75   : > { %667 = vmatpush.msrb.mxu1 %v530_v23  ;;  %690 = vmatpush.msrb.mxu2 %v543_v28  ;;  %v502_v23 = vld [vmem:[%s2395_s6 + $0x208] sm:$0xff]  ;;  %v519_v24 = vld [vmem:[%s2395_s6 + $0x290] sm:$0xff] }
  0x76   : > { %649 = vmatpush.msrb.mxu0 %v512_v25  ;;  %709 = vmatpush.msrb.mxu3 %v560_v30  ;;  %v534_v25 = vld [vmem:[%s2395_s6 + $0x308] sm:$0xff]  ;;  %v551_v26 = vld [vmem:[%s2395_s6 + $0x390] sm:$0xff] }
  0x77   : > { %668 = vmatpush.msrb.mxu1 %v529_v27  ;;  %691 = vmatpush.msrb.mxu2 %v542_v32  ;;  %v501_v27 = vld [vmem:[%s2395_s6 + $0x200] sm:$0xff]  ;;  %v518_v28 = vld [vmem:[%s2395_s6 + $0x288] sm:$0xff] }
  0x78   : > { %650 = vmatpush.msrb.mxu0 %v511_v29  ;;  %710 = vmatpush.msrb.mxu3 %v559_v34  ;;  %v533_v29 = vld [vmem:[%s2395_s6 + $0x300] sm:$0xff]  ;;  %v550_v30 = vld [vmem:[%s2395_s6 + $0x388] sm:$0xff]  ;;  %v77_v34 = vld [vmem:[%s2179_s22 + $0x10] sm:$0xff] }
  0x79   : > { %669 = vmatpush.msrb.mxu1 %v528_v31  ;;  %692 = vmatpush.msrb.mxu2 %v541_v38  ;;  %v517_v31 = vld [vmem:[%s2395_s6 + $0x280] sm:$0xff]  ;;  %v383_v38 = vperm.slane %v1292_v2, 3 }
  0x7a   : > { %651 = vmatpush.msrb.mxu0 %v510_v33  ;;  %711 = vmatpush.msrb.mxu3 %v558_v39  ;;  %v549_v32 = vld [vmem:[%s2395_s6 + $0x380] sm:$0xff]  ;;  %v382_v33 = vperm.slane %v1292_v2, 2 }
  0x7b   : > { %670 = vmatpush.msrb.mxu1 %v527_v35  ;;  %693 = vmatpush.msrb.mxu2 %v540_v42  ;;  %v407_v35 = vperm.slane %v1297_v3, 2  ;;  %v78_v42 = vld [vmem:[%s2179_s22 + $0x18] sm:$0xff] }
  0x7c   : > { %652 = vmatpush.msrb.mxu0 %v509_v36  ;;  %712 = vmatpush.msrb.mxu3 %v557_v43  ;;  %v380_v36 = vperm.slane %v1292_v2, 0  ;;  %v405_v43 = vperm.slane %v1297_v3, 0 }
  0x7d   : > { %671 = vmatpush.msrb.mxu1 %v526_v37  ;;  %694 = vmatpush.msrb.mxu2 %v539_v46 }
  0x7e   : > { %653 = vmatpush.msrb.mxu0 %v508_v40  ;;  %713 = vmatpush.msrb.mxu3 %v556_v47  ;;  %v398_v40 = vmul.f32 %v1175_v18, %v382_v33  ;;  %v396_v47 = vmul.f32 %v1183_v20, %v380_v36  ;;  %v387_v33 = vperm.slane %v1292_v2, 7 }
  0x7f   : > { %672 = vmatpush.msrb.mxu1 %v525_v41  ;;  %695 = vmatpush.msrb.mxu2 %v538_v50  ;;  %v75_v41 = vld [vmem:[%s2179_s22] sm:$0xff] }
  0x80   : > { %654 = vmatpush.msrb.mxu0 %v507_v44  ;;  %714 = vmatpush.msrb.mxu3 %v555_v51  ;;  %v408_v44 = vperm.slane %v1297_v3, 3 }
  0x81   : > { %673 = vmatpush.msrb.mxu1 %v524_v45  ;;  %696 = vmatpush.msrb.mxu2 %v537_v54  ;;  %v406_v54 = vperm.slane %v1297_v3, 1 }
  0x82   : > { %655 = vmatpush.msrb.mxu0 %v506_v48  ;;  %715 = vmatpush.msrb.mxu3 %v554_v55 }
  0x83   : > { %674 = vmatpush.msrb.mxu1 %v523_v49  ;;  %697 = vmatpush.msrb.mxu2 %v536_v58  ;;  %v381_v49 = vperm.slane %v1292_v2, 1 }
  0x84   : > { %656 = vmatpush.msrb.mxu0 %v505_v52  ;;  %716 = vmatpush.msrb.mxu3 %v553_v59  ;;  %v399_v52 = vmul.f32 %v1171_v17, %v383_v38  ;;  %v82_v38 = vld [vmem:[%s2179_s22 + $0x38] sm:$0xff] }
  0x85   : > { %675 = vmatpush.msrb.mxu1 %v522_v53  ;;  %698 = vmatpush.msrb.mxu2 %v535_v62  ;;  %v76_v53 = vld [vmem:[%s2179_s22 + $0x8] sm:$0xff]  ;;  %v397_v20 = vmul.f32 %v1179_v19, %v381_v49  ;;  %v753_v62 = vld [vmem:[%s2396_s7 + $0x78] sm:$0xff]  ;;  %v79_v19 = vld [vmem:[%s2179_s22 + $0x20] sm:$0xff] }
  0x86   : > { %657 = vmatpush.msrb.mxu0 %v504_v56  ;;  %717 = vmatpush.msrb.mxu3 %v552_v63 }
  0x87   : > { %676 = vmatpush.msrb.mxu1 %v521_v57  ;;  %699 = vmatpush.msrb.mxu2 %v534_v25 }
  0x88   : > { %658 = vmatpush.msrb.mxu0 %v503_v60  ;;  %718 = vmatpush.msrb.mxu3 %v551_v26  ;;  %v384_v60 = vperm.slane %v1292_v2, 4  ;;  %v409_v26 = vperm.slane %v1297_v3, 4 }
  0x89   : > { %677 = vmatpush.msrb.mxu1 %v520_v61  ;;  %700 = vmatpush.msrb.mxu2 %v533_v29  ;;  %v386_v61 = vperm.slane %v1292_v2, 6 }
  0x8a   : > { %659 = vmatpush.msrb.mxu0 %v502_v23  ;;  %719 = vmatpush.msrb.mxu3 %v550_v30  ;;  %v81_v23 = vld [vmem:[%s2179_s22 + $0x30] sm:$0xff]  ;;  %v400_v29 = vmul.f32 %v1167_v16, %v384_v60  ;;  %v410_v16 = vperm.slane %v1297_v3, 5 }
  0x8b   : > { %678 = vmatpush.msrb.mxu1 %v519_v24  ;;  %v752_v24 = vld [vmem:[%s2396_s7 + $0x70] sm:$0xff] }
  0x8c   : > { %660 = vmatpush.msrb.mxu0 %v501_v27  ;;  %720 = vmatpush.msrb.mxu3 %v549_v32  ;;  %v411_v27 = vperm.slane %v1297_v3, 6  ;;  %v385_v32 = vperm.slane %v1292_v2, 5  ;;  %v740_v60 = vld [vmem:[%s2396_s7 + $0x10] sm:$0xff] }
  0x8d   : > { %679 = vmatpush.msrb.mxu1 %v518_v28 }
  0x8f   : > { %680 = vmatpush.msrb.mxu1 %v517_v31  ;;  %v402_v31 = vmul.f32 %v1159_v14, %v386_v61  ;;  %v739_v61 = vld [vmem:[%s2396_s7 + $0x8] sm:$0xff] }
  0xbd   : > { %v268_v37 = vpop.f32.mrf.mxu2 }
  0xbe   : > { %v373_v39 = vadd.f32 %v268_v37, %v77_v34  ;;  %v751_v34 = vld [vmem:[%s2396_s7 + $0x68] sm:$0xff] }
  0xbf   : > { %v80_v37 = vld [vmem:[%s2179_s22 + $0x28] sm:$0xff] }
  0xc0   : > { %v423_v45 = vmul.f32 %v407_v35, %v373_v39  ;;  %v412_v39 = vperm.slane %v1297_v3, 7 }
  0xc1   : > { %v228_v46 = vpop.f32.mrf.mxu0  ;;  %v288_v48 = vpop.f32.mrf.mxu3 }
  0xc2   : > { %v371_v50 = vadd.f32 %v228_v46, %v75_v41  ;;  %v374_v51 = vadd.f32 %v288_v48, %v78_v42  ;;  %v2195_v18 = vadd.f32 %v423_v45, %v398_v40   ;;  %v403_v46 = vmul.f32 %v1155_v13, %v387_v33 }
  0xc3   : > { %v248_v57 = vpop.f32.mrf.mxu1 }
  0xc4   : > { %v421_v55 = vmul.f32 %v405_v43, %v371_v50  ;;  %v424_v56 = vmul.f32 %v408_v44, %v374_v51  ;;  %v372_v58 = vadd.f32 %v248_v57, %v76_v53  ;;  %621 = vmatmul.f32.vlgmr.msra.gmra.mxu2 %v2195_v18  ;;  %v401_v44 = vmul.f32 %v1163_v15, %v385_v32  ;;  %v750_v50 = vld [vmem:[%s2396_s7 + $0x60] sm:$0xff]  ;;  %v749_v51 = vld [vmem:[%s2396_s7 + $0x58] sm:$0xff]  ;;  %v747_v53 = vld [vmem:[%s2396_s7 + $0x48] sm:$0xff] }
  0xc5   : > { %v743_v57 = vld [vmem:[%s2396_s7 + $0x28] sm:$0xff] }
  0xc6   : > { %v2200_v59 = vadd.f32 %v421_v55, %v396_v47   ;;  %v2202_v17 = vadd.f32 %v424_v56, %v399_v52   ;;  %v422_v63 = vmul.f32 %v406_v54, %v372_v58  ;;  %v748_v52 = vld [vmem:[%s2396_s7 + $0x50] sm:$0xff]  ;;  %v746_v54 = vld [vmem:[%s2396_s7 + $0x40] sm:$0xff]  ;;  %v745_v55 = vld [vmem:[%s2396_s7 + $0x38] sm:$0xff] }
  0xc7   : > { %v744_v56 = vld [vmem:[%s2396_s7 + $0x30] sm:$0xff]  ;;  %v742_v58 = vld [vmem:[%s2396_s7 + $0x20] sm:$0xff] }
  0xc8   : > { %581 = vmatmul.f32.vlgmr.msra.gmra.mxu0 %v2200_v59  ;;  %641 = vmatmul.f32.vlgmr.msra.gmra.mxu3 %v2202_v17  ;;  %v2216_v25 = vadd.f32 %v422_v63, %v397_v20   ;;  %v741_v20 = vld [vmem:[%s2396_s7 + $0x18] sm:$0xff] }
  0xc9   : > { %757 = vmatpush.msra.mxu0 %v753_v62  ;;  %v738_v62 = vld [vmem:[%s2396_s7] sm:$0xff] }
  0xca   : > { %v308_v28 = vpop.f32.mrf.mxu0  ;;  %601 = vmatmul.f32.vlgmr.msra.gmra.mxu1 %v2216_v25 }
  0xcb   : > { %v348_v30 = vpop.f32.mrf.mxu2  ;;  %v375_v35 = vadd.f32 %v308_v28, %v79_v19  ;;  %758 = vmatpush.msra.mxu0 %v752_v24 }
  0xcc   : > { %v377_v36 = vadd.f32 %v348_v30, %v81_v23 }
  0xcd   : > { %v425_v14 = vmul.f32 %v409_v26, %v375_v35  ;;  %v328_v41 = vpop.f32.mrf.mxu1  ;;  %v368_v42 = vpop.f32.mrf.mxu3  ;;  %759 = vmatpush.msra.mxu0 %v751_v34  ;;  %v726_v34 = vperm.slane %v1282_v0, 0 }
  0xce   : > { %v427_v40 = vmul.f32 %v411_v27, %v377_v36  ;;  %v376_v43 = vadd.f32 %v328_v41, %v80_v37  ;;  %v378_v45 = vadd.f32 %v368_v42, %v82_v38  ;;  %v730_v36 = vperm.slane %v1287_v1, 0 }
  0xcf   : > { %v2234_v47 = vadd.f32 %v425_v14, %v400_v29   ;;  %760 = vmatpush.msra.mxu0 %v750_v50  ;;  %v1197_v41 = vmov 0.0   ;;  %v1198_v42 = vmov 1.0  }
  0xd0   : > { %v2236_v14 = vadd.f32 %v427_v40, %v402_v31   ;;  %v426_v48 = vmul.f32 %v410_v16, %v376_v43  ;;  %v428_v49 = vmul.f32 %v412_v39, %v378_v45  ;;  %v728_v16 = vmul.f32 %v1191_v22, %v726_v34 }
  0xd1   : > { %661 = vmatmul.f32.vlgmr.msrb.gmra.mxu0 %v2234_v47  ;;  %v824_v43 = vstv %s820_s9 }
  0xd2   : > { %701 = vmatmul.f32.vlgmr.msrb.gmra.mxu2 %v2236_v14  ;;  %v2240_v15 = vadd.f32 %v426_v48, %v401_v44   ;;  %v2242_v13 = vadd.f32 %v428_v49, %v403_v46   ;;  %761 = vmatpush.msra.mxu0 %v749_v51  ;;  %v755_v46 = vperm.slane %v1312_v6, 0  ;;  %v778_v48 = vperm.slane %v1302_v4, 0 }
  0xd3   : > { %v782_v49 = vperm.slane %v1307_v5, 0 }
  0xd4   : > { %681 = vmatmul.f32.vlgmr.msrb.gmra.mxu1 %v2240_v15  ;;  %721 = vmatmul.f32.vlgmr.msrb.gmra.mxu3 %v2242_v13 }
  0xd5   : > { %762 = vmatpush.msra.mxu0 %v748_v52  ;;  %v780_v52 = vmul.f32 %v1151_v12, %v778_v48 }
  0xd7   : > { %763 = vmatpush.msra.mxu0 %v747_v53 }
  0xd9   : > { %764 = vmatpush.msra.mxu0 %v746_v54 }
  0xdb   : > { %765 = vmatpush.msra.mxu0 %v745_v55 }
  0xdd   : > { %766 = vmatpush.msra.mxu0 %v744_v56 }
  0xdf   : > { %767 = vmatpush.msra.mxu0 %v743_v57 }
  0xe1   : > { %768 = vmatpush.msra.mxu0 %v742_v58 }
  0xe3   : > { %769 = vmatpush.msra.mxu0 %v741_v20 }
  0xe5   : > { %770 = vmatpush.msra.mxu0 %v740_v60 }
  0xe7   : > { %771 = vmatpush.msra.mxu0 %v739_v61 }
  0xe9   : > { %772 = vmatpush.msra.mxu0 %v738_v62 }
 0x145   : > { %v582_v63 = vpop.f32.mrf.mxu0 }
 0x147   : > { %v602_v19 = vpop.f32.mrf.mxu1  ;;  %v622_v23 = vpop.f32.mrf.mxu2 }
 0x148   : > { %v603_v24 = vadd.f32 %v602_v19, %v582_v63 }
 0x14a   : > { %v623_v26 = vadd.f32 %v622_v23, %v603_v24 }
 0x14b   : > { %v642_v27 = vpop.f32.mrf.mxu3 }
 0x14c   : > { %v643_v28 = vadd.f32 %v642_v27, %v623_v26  ;;  %v817_v27 = vstv %s816_s10 }
 0x14d   : > { %vm818_vm13 = vcmp.eq.s32.totalorder %v817_v27, 1 }
 0x14e   : > { %v662_v29 = vpop.f32.mrf.mxu0 }
 0x14f   : > { %v663_v30 = vadd.f32 %v662_v29, %v643_v28 }
 0x151   : > { %v682_v31 = vpop.f32.mrf.mxu1 }
 0x152   : > { %v683_v32 = vadd.f32 %v682_v31, %v663_v30 }
 0x155   : > { %v702_v33 = vpop.f32.mrf.mxu2 }
 0x156   : > { %v703_v35 = vadd.f32 %v702_v33, %v683_v32 }
 0x157   : > { %v722_v37 = vpop.f32.mrf.mxu3 }
 0x158   : > { %v723_v38 = vadd.f32 %v722_v37, %v703_v35 }
 0x15a   : > { %v732_v39 = vmul.f32 %v730_v36, %v723_v38 }
 0x15c   : > { %v733_v40 = vadd.f32 %v732_v39, %v728_v16  ;;  %v2413_v16 = vmov %v2234_v47 }
 0x15e   : > { %v2290_v22 = vsub.f32 %v733_v40, %v1187_v21  }
 0x160   : > { %vm735_vm0 = vcmp.gt.f32.partialorder %v2290_v22, 1.0 }
 0x161   : > { %v2294_v21 = vsel %vm735_vm0, 1.0, %v1197_v41   ;;  %916 = vmatmul.msk.f32.vlgmr.msra.gmra.mxu0 %vm735_vm0, %v1198_v42 }
 0x162   : > { %vm822_vm2 = vcmp.eq.f32.partialorder %v2294_v21, 1.0  ;;  %v2299_v10 = vmax.f32 %v1143_v10, %v2294_v21  }
 0x163   : > { %vm823_vm3 = vmand %vm821_vm1, %vm822_vm2 }
 0x164   : > { %v2405_v44 = vmov %v2299_v10  ;;  %v2302_v8 = vsel %vm823_vm3, %v824_v43, %v1135_v8  }
 0x165   : > { %v2406_v45 = vmov %v2302_v8  ;;  %834 = vst [vmem:[%s2401_s12] sm:$0xff] (%p2317_p1), %v2405_v44 }
 0x166   :  { %836 = vst [vmem:[%s2403_s14] sm:$0xff] (%p2317_p1), %v2406_v45 }
 0x1de   : > { %v774_v50 = vpop.f32.mrf.mxu0 }
 0x1df   : > { %v775_v51 = vadd.f32 %v774_v50, %v755_v46 }
 0x1e1   : > { %v784_v53 = vmul.f32 %v782_v49, %v775_v51 }
 0x1e3   : > { %v785_v12 = vadd.f32 %v784_v53, %v780_v52  }
 0x1e5   : > { %v790_v54 = vsel %vm789_vm4, %v785_v12, -inf  ;;  %vm786_vm5 = vcmp.gt.f32.partialorder %v785_v12, 0.0 }
 0x1e6   : > { %791 = vmax.xlane.f32.xlu0 %v790_v54  ;;  %v917_v8 = vsel %vm786_vm5, 1.0, %v1197_v41 }
 0x1e7   : > { %vm827_vm7 = vcmp.eq.f32.partialorder %v917_v8, 1.0  ;;  %v831_v55 = vmax.f32 %v1139_v9, %v917_v8   ;;  %v2409_v8 = vmov %v2406_v45 }
 0x1e8   : > { %vm828_vm8 = vmand %vm826_vm6, %vm827_vm7 }
 0x1e9   : > { %v829_v56 = vsel %vm828_vm8, %v824_v43, %v1131_v7   ;;  %835 = vst.msk [vmem:[%s2402_s13] sm:$0xff] (%p2317_p1), %vm789_vm4, %v831_v55 }
 0x1ea   :  { %837 = vst.msk [vmem:[%s2404_s15] sm:$0xff] (%p2317_p1), %vm789_vm4, %v829_v56 }
 0x259   : > { %v792_v10 = vpop.xlane.xlu0 %791 }
 0x25a   : > { %v793_v57 = vsub.f32 %v785_v12, %v792_v10  ;;  %v2411_v10 = vmov %v2405_v44 }
 0x25c   : > { %v794_v58 = vmul.f32 1.442695, %v793_v57 }
 0x25e   : > { %1057 = vpow2.f32 %v794_v58 }
 0x264   : > { %v1058_v20 = vpop.eup %1057 }
 0x265   : > { %v796_v60 = vsel %vm789_vm4, %v1058_v20, 0.0 }
 0x266   : > { %797 = vadd.xlane.f32.xlu0 %v796_v60 }
 0x2d9   : > { %v798_v61 = vpop.xlane.xlu0 %797 }
 0x2da   : > { %1059 = vrcp.f32 %v798_v61  ;;  %v810_v23 = vand.u32 2147483648, %v798_v61  ;;  %v808_v24 = vand.u32 2147483647, %v798_v61  ;;  %vm804_vm10 = vweird.f32 %v798_v61 }
 0x2dc   : > { %v811_v26 = vor.u32 1.1754944e-38, %v810_v23  ;;  %vm809_vm12 = vcmp.eq.f32.partialorder %v808_v24, 8.507059e+37 }
 0x2e0   : > { %v1060_v62 = vpop.eup %1059 }
 0x2e1   : > { %v800_v63 = vmul.f32 %v1060_v62, %v798_v61  ;;  %vm805_vm9 = vweird.f32 %v1060_v62 }
 0x2e2   : > { %vm806_vm11 = vmor %vm804_vm10, %vm805_vm9 }
 0x2e3   : > { %v801_v19 = vsub.f32 1.0, %v800_v63 }
 0x2e5   : > { %v802_v9 = vmul.f32 %v1060_v62, %v801_v19  ;;  %v2414_v19 = vmov %v2216_v25 }
 0x2e7   : > { %v803_v7 = vadd.f32 %v1060_v62, %v802_v9  ;;  %v2410_v9 = vmov %v831_v55 }
 0x2e9   : > { %v807_v28 = vsel %vm806_vm11, %v1060_v62, %v803_v7  ;;  %v2408_v7 = vmov %v829_v56 }
 0x2ea   : > { %v812_v29 = vsel %vm809_vm12, %v811_v26, %v807_v28 }
 0x2eb   : > { %v813_v30 = vmul.f32 %v1058_v20, %v812_v29  ;;  %v2415_v20 = vmov %v2200_v59 }
 0x2ec   :  { %54 = sbr.rel (!%p2317_p1) target bundleno = 8 (0x8), region = 104 }
 0x2ed   : > { %v815_v31 = vadd.f32 %v1147_v11, %v813_v30 }
 0x2ef   : > { %v819_v32 = vsel %vm818_vm13, %v815_v31, %v1147_v11  }
 0x2f0   : > { %v2412_v11 = vmov %v819_v32  ;;  %833 = vst.msk [vmem:[%s2400_s11] sm:$0xff] (%p2317_p1), %vm789_vm4, %v819_v32 }

</bundles_post_ra>
